<compile_context>
chip_gen: v6e
topology: v6e:2x2x1
jax: 0.10.0
libtpu: 0.0.40
codegen_flags: <defaults>
</compile_context>

<pallas_src>
import functools
import math

import jax
import jax.numpy as jnp
from jax.experimental import pallas as pl
from jax.experimental.pallas import tpu as pltpu

EPS = 1e-5    # nn.BatchNorm2d default eps
LANE = 128    # TPU lane width; channel dims are padded to multiples of this


# ------------------------------ small helpers -------------------------------

def _round_up(x, m):
    return ((x + m - 1) // m) * m


def _pad_to_lane(c):
    return _round_up(c, LANE)


def _pick_tile(m, cap):
    """Row tile: multiple of 8, <= cap.  Rows get zero-padded up to a multiple."""
    cap = max(8, cap - cap % 8)
    if m <= cap:
        return _round_up(m, 8)
    m8 = _round_up(m, 8)
    for tm in range(cap, cap // 2, -8):   # prefer a divisor (no row padding)
        if m8 % tm == 0:
            return tm
    return cap                            # otherwise pad rows up to a multiple of cap


def _vmem_limit_bytes():
    cap = 128 * 1024 * 1024
    try:
        info = pltpu.get_tpu_info()
        cap = int(getattr(info, "vmem_capacity_bytes", cap))
    except Exception:
        pass
    # Leave headroom for double buffers / internal scratch:
    #   v7x (64 MiB physical) -> 48 MiB, v5e/v6e (128 MiB) -> 96 MiB.
    return min((cap * 3) // 4, 96 * 1024 * 1024)


def _mosaic_params(n_axes, vmem_limit):
    # TODO(synk): on v7x, split the stats/normalize structure so a row-tile axis
    # can be "parallel" across the 2 TensorCores (the pinned stats accumulators
    # force "arbitrary" here, leaving one core idle on that generation).
    return pltpu.CompilerParams(
        dimension_semantics=("arbitrary",) * n_axes,
        vmem_limit_bytes=vmem_limit)


def _bn_from_moments(total, sq_total, gamma, beta, count):
    # NOTE: E[x^2]-E[x]^2 can cancel for channels with |mean| >> std; the clamp
    # guards the rsqrt.  Fine at these scales; switch to a centered / Welford
    # pass if real data drifts beyond tolerance.
    inv = 1.0 / count
    mean = total * inv
    var = jnp.maximum(sq_total * inv - mean * mean, 0.0)
    scale = gamma * jax.lax.rsqrt(var + EPS)
    shift = beta - mean * scale
    return scale, shift


# ------------------------------ Pallas kernels ------------------------------

def conv1x1_stats_kernel(x_ref, w_ref, o_ref, sum_ref, sq_ref):
    """C1: h = x @ w1 (raw, pre-BN).  Writes bf16 h and per-channel sum/sumsq."""
    t = pl.program_id(0)

    @pl.when(t == 0)
    def _init():
        sum_ref[...] = jnp.zeros_like(sum_ref)
        sq_ref[...] = jnp.zeros_like(sq_ref)

    h = jnp.dot(x_ref[...], w_ref[...], preferred_element_type=jnp.float32)
    o_ref[...] = h.astype(o_ref.dtype)
    sum_ref[...] += jnp.sum(h, axis=0, keepdims=True)
    sq_ref[...] += jnp.sum(h * h, axis=0, keepdims=True)


def conv3x3_stats_kernel(xq_ref, w_ref, o_ref, sum_ref, sq_ref,
                         *, stride, ho, wo, row_chunk):
    """C2: 3x3 conv (stride `stride`, pad 1) over one image, SINGLE pass.

    xq_ref: (1, stride*stride, Hq, Wq, Cp) zero-padded (+ space-to-depth for
    stride 2) normalized activation, resident in VMEM.  Each output-row chunk
    builds a (rows, 9*Cp) operand and runs ONE matmul against the concatenated
    (9*Cp, Cp) weight, so tap accumulation stays inside the MXU.  Writes the raw
    (pre-BN2) bf16 result and accumulates per-channel sum / sumsq.
    """
    b = pl.program_id(0)

    @pl.when(b == 0)
    def _init():
        sum_ref[...] = jnp.zeros_like(sum_ref)
        sq_ref[...] = jnp.zeros_like(sq_ref)

    cp = xq_ref.shape[-1]
    for c0 in range(0, ho, row_chunk):            # static chunk loop
        ch = min(row_chunk, ho - c0)
        taps = []
        for dy in range(3):
            for dx in range(3):
                qy, ry = dy // stride, dy % stride
                qx, rx = dx // stride, dx % stride
                plane = ry * stride + rx
                xt = xq_ref[0, plane, pl.ds(c0 + qy, ch), pl.ds(qx, wo), :]
                taps.append(xt.reshape(ch * wo, cp))
        xcat = jnp.concatenate(taps, axis=-1)     # (ch*wo, 9*Cp)
        h = jnp.dot(xcat, w_ref[...], preferred_element_type=jnp.float32)
        o_ref[0, pl.ds(c0 * wo, ch * wo), :] = h.astype(o_ref.dtype)
        sum_ref[...] += jnp.sum(h, axis=0, keepdims=True)
        sq_ref[...] += jnp.sum(h * h, axis=0, keepdims=True)


def _c3_load_and_matmul(h2_ref, s2_ref, t2_ref, w_ref, *, tm, m_valid, masked):
    """BN2 scale/shift + ReLU folded into the load of the raw C2 output."""
    a = jnp.maximum(h2_ref[...].astype(jnp.float32) * s2_ref[...] + t2_ref[...], 0.0)
    if masked:
        # zero out tile-padding rows so they don't pollute the BN3 statistics
        row = pl.program_id(1) * tm + jax.lax.broadcasted_iota(jnp.int32, (tm, 1), 0)
        a = jnp.where(row < m_valid, a, 0.0)
    return jnp.dot(a.astype(jnp.bfloat16), w_ref[...],
                   preferred_element_type=jnp.float32)


def conv1x1_bn_add_relu_proj_kernel(h2_ref, s2_ref, t2_ref, w_ref, g_ref, b_ref,
                                    xs_ref, ws_ref, o_ref, sum_ref, sq_ref,
                                    *, m_valid, tm, masked):
    """C3 (projection shortcut): relu(BN2(h2)) @ w3 -> BN3 -> + x@ws -> ReLU.

    Two-phase grid (phase, row-tile): phase 0 accumulates BN3 stats into VMEM
    scratch, phase 1 recomputes the cheap, narrow-input matmul and writes the
    normalized output with the fused 1x1 projection shortcut.
    """
    p = pl.program_id(0)
    t = pl.program_id(1)
    h = _c3_load_and_matmul(h2_ref, s2_ref, t2_ref, w_ref,
                            tm=tm, m_valid=m_valid, masked=masked)

    @pl.when(p == 0)
    def _stats():
        @pl.when(t == 0)
        def _init():
            sum_ref[...] = jnp.zeros_like(sum_ref)
            sq_ref[...] = jnp.zeros_like(sq_ref)
        sum_ref[...] += jnp.sum(h, axis=0, keepdims=True)
        sq_ref[...] += jnp.sum(h * h, axis=0, keepdims=True)

    @pl.when(p == 1)
    def _normalize():
        scale, shift = _bn_from_moments(sum_ref[...], sq_ref[...], g_ref[...],
                                        b_ref[...], float(m_valid))
        short = jnp.dot(xs_ref[...], ws_ref[...], preferred_element_type=jnp.float32)
        o_ref[...] = jnp.maximum(h * scale + shift + short, 0.0).astype(o_ref.dtype)


def conv1x1_bn_add_relu_ident_kernel(h2_ref, s2_ref, t2_ref, w_ref, g_ref, b_ref,
                                     xs_ref, o_ref, sum_ref, sq_ref,
                                     *, m_valid, tm, masked):
    """C3, identity-shortcut variant (indim == outdim, stride 1)."""
    p = pl.program_id(0)
    t = pl.program_id(1)
    h = _c3_load_and_matmul(h2_ref, s2_ref, t2_ref, w_ref,
                            tm=tm, m_valid=m_valid, masked=masked)

    @pl.when(p == 0)
    def _stats():
        @pl.when(t == 0)
        def _init():
            sum_ref[...] = jnp.zeros_like(sum_ref)
            sq_ref[...] = jnp.zeros_like(sq_ref)
        sum_ref[...] += jnp.sum(h, axis=0, keepdims=True)
        sq_ref[...] += jnp.sum(h * h, axis=0, keepdims=True)

    @pl.when(p == 1)
    def _normalize():
        scale, shift = _bn_from_moments(sum_ref[...], sq_ref[...], g_ref[...],
                                        b_ref[...], float(m_valid))
        short = xs_ref[...].astype(jnp.float32)
        o_ref[...] = jnp.maximum(h * scale + shift + short, 0.0).astype(o_ref.dtype)


# ------------------------------ block wrapper -------------------------------

def bottleneck_block(x_nchw, kp, *, outdim, half_res, row_tile=None,
                     conv_row_chunk=None):
    """Forward pass of BottleneckBlock.  (N, Cin, H, W) f32 -> (N, Cout, Ho, Wo) f32."""
    s = 2 if half_res else 1
    x = jnp.transpose(x_nchw, (0, 2, 3, 1)).astype(jnp.float32)        # NHWC
    n, h_in, w_in, cin = x.shape
    cin_p, cb_p = kp["w1"].shape
    cout_p = kp["w3"].shape[1]

    vmem_limit = _vmem_limit_bytes()
    if row_tile is None:
        # bigger row tiles on 128 MiB VMEM parts (v5e/v6e), smaller on v7x
        row_tile = 1024 if vmem_limit >= 80 * 1024 * 1024 else 512

    ho = (h_in - 1) // s + 1
    wo = (w_in - 1) // s + 1
    if conv_row_chunk is None:
        conv_row_chunk = max(1, min(ho, -(-256 // wo)))   # ~256 matmul rows/chunk

    m1 = n * h_in * w_in
    mo = n * ho * wo

    # lane-dense channel padding + bf16 operands for the MXU
    xp = jnp.pad(x, ((0, 0), (0, 0), (0, 0), (0, cin_p - cin))).astype(jnp.bfloat16)

    # ---- C1 (1x1, no bias): raw output + BN1 moments in ONE pass --------------
    tm1 = _pick_tile(m1, row_tile)
    m1p = _round_up(m1, tm1)
    x_flat = xp.reshape(m1, cin_p)
    if m1p != m1:
        x_flat = jnp.pad(x_flat, ((0, m1p - m1), (0, 0)))   # zero rows: 0 to stats
    h1_raw, sum1, sq1 = pl.pallas_call(
        conv1x1_stats_kernel,
        out_shape=(jax.ShapeDtypeStruct((m1p, cb_p), jnp.bfloat16),
                   jax.ShapeDtypeStruct((1, cb_p), jnp.float32),
                   jax.ShapeDtypeStruct((1, cb_p), jnp.float32)),
        grid_spec=pltpu.PrefetchScalarGridSpec(
            num_scalar_prefetch=0, grid=(m1p // tm1,),
            in_specs=[pl.BlockSpec((tm1, cin_p), lambda t: (t, 0)),
                      pl.BlockSpec((cin_p, cb_p), lambda t: (0, 0))],
            out_specs=[pl.BlockSpec((tm1, cb_p), lambda t: (t, 0)),
                       pl.BlockSpec((1, cb_p), lambda t: (0, 0)),
                       pl.BlockSpec((1, cb_p), lambda t: (0, 0))]),
        compiler_params=_mosaic_params(1, vmem_limit),
    )(x_flat, kp["w1"])

    # ---- BN1 + ReLU + spatial pad (+ space-to-depth for stride 2): XLA glue ---
    # One fused elementwise/transpose pass; the zero padding is applied AFTER the
    # activation so conv border taps see exact zeros.
    scale1, shift1 = _bn_from_moments(sum1, sq1, kp["g1"], kp["b1"], float(m1))
    a1 = jnp.maximum(h1_raw[:m1].astype(jnp.float32) * scale1 + shift1, 0.0)
    a1 = a1.astype(jnp.bfloat16).reshape(n, h_in, w_in, cb_p)

    hp, wp = h_in + 2, w_in + 2
    if s == 2:
        hp2, wp2 = hp + (hp % 2), wp + (wp % 2)
        a1p = jnp.pad(a1, ((0, 0), (1, 1 + hp2 - hp), (1, 1 + wp2 - wp), (0, 0)))
        hq, wq = hp2 // 2, wp2 // 2
        h1q = (a1p.reshape(n, hq, 2, wq, 2, cb_p)
               .transpose(0, 2, 4, 1, 3, 5)
               .reshape(n, 4, hq, wq, cb_p))
    else:
        a1p = jnp.pad(a1, ((0, 0), (1, 1), (1, 1), (0, 0)))
        hq, wq = hp, wp
        h1q = a1p[:, None]

    # ---- C2 (3x3, stride s, pad 1): raw output + BN2 moments, ONE pass --------
    # (C2's conv bias is dropped: a per-channel constant added before
    #  training-mode BN is cancelled exactly by the mean subtraction.)
    # TODO(synk): also tile the Hq axis across the grid for very large feature
    # maps (one padded per-image activation must currently fit in VMEM).
    h2_raw, sum2, sq2 = pl.pallas_call(
        functools.partial(conv3x3_stats_kernel, stride=s, ho=ho, wo=wo,
                          row_chunk=conv_row_chunk),
        out_shape=(jax.ShapeDtypeStruct((n, ho * wo, cb_p), jnp.bfloat16),
                   jax.ShapeDtypeStruct((1, cb_p), jnp.float32),
                   jax.ShapeDtypeStruct((1, cb_p), jnp.float32)),
        grid_spec=pltpu.PrefetchScalarGridSpec(
            num_scalar_prefetch=0, grid=(n,),
            in_specs=[pl.BlockSpec((1, s * s, hq, wq, cb_p),
                                   lambda b: (b, 0, 0, 0, 0)),
                      pl.BlockSpec((9 * cb_p, cb_p), lambda b: (0, 0))],
            out_specs=[pl.BlockSpec((1, ho * wo, cb_p), lambda b: (b, 0, 0)),
                       pl.BlockSpec((1, cb_p), lambda b: (0, 0)),
                       pl.BlockSpec((1, cb_p), lambda b: (0, 0))]),
        compiler_params=_mosaic_params(1, vmem_limit),
    )(h1q, kp["w2"])

    scale2, shift2 = _bn_from_moments(sum2, sq2, kp["g2"], kp["b2"], float(mo))
    h2_flat = h2_raw.reshape(mo, cb_p)

    # ---- C3 (1x1, no bias) -> BN3 -> + shortcut -> ReLU (shortcut fused) ------
    # Two-phase recompute: the narrow cb_p input read twice beats writing and
    # re-reading the 4x wider raw cout_p intermediate.  BN2+ReLU folded on load.
    tm3 = _pick_tile(mo, row_tile)
    mop = _round_up(mo, tm3)
    t3 = mop // tm3
    masked = mop != mo
    if masked:
        h2_flat = jnp.pad(h2_flat, ((0, mop - mo), (0, 0)))

    if "ws" in kp:
        xs = xp[:, ::s, ::s, :].reshape(mo, cin_p)
        if masked:
            xs = jnp.pad(xs, ((0, mop - mo), (0, 0)))
        kern = functools.partial(conv1x1_bn_add_relu_proj_kernel,
                                 m_valid=mo, tm=tm3, masked=masked)
        args = (h2_flat, scale2, shift2, kp["w3"], kp["g3"], kp["b3"], xs, kp["ws"])
        in_specs = [pl.BlockSpec((tm3, cb_p), lambda p, t: (t, 0)),
                    pl.BlockSpec((1, cb_p), lambda p, t: (0, 0)),
                    pl.BlockSpec((1, cb_p), lambda p, t: (0, 0)),
                    pl.BlockSpec((cb_p, cout_p), lambda p, t: (0, 0)),
                    pl.BlockSpec((1, cout_p), lambda p, t: (0, 0)),
                    pl.BlockSpec((1, cout_p), lambda p, t: (0, 0)),
                    # p*t keeps the shortcut pinned (one fetch) during phase 0
                    pl.BlockSpec((tm3, cin_p), lambda p, t: (p * t, 0)),
                    pl.BlockSpec((cin_p, cout_p), lambda p, t: (0, 0))]
    else:
        assert s == 1 and cin_p == cout_p, \
            "identity shortcut requires indim == outdim and stride 1"
        xs = xp.reshape(m1, cin_p)
        if masked:
            xs = jnp.pad(xs, ((0, mop - mo), (0, 0)))
        kern = functools.partial(conv1x1_bn_add_relu_ident_kernel,
                                 m_valid=mo, tm=tm3, masked=masked)
        args = (h2_flat, scale2, shift2, kp["w3"], kp["g3"], kp["b3"], xs)
        in_specs = [pl.BlockSpec((tm3, cb_p), lambda p, t: (t, 0)),
                    pl.BlockSpec((1, cb_p), lambda p, t: (0, 0)),
                    pl.BlockSpec((1, cb_p), lambda p, t: (0, 0)),
                    pl.BlockSpec((cb_p, cout_p), lambda p, t: (0, 0)),
                    pl.BlockSpec((1, cout_p), lambda p, t: (0, 0)),
                    pl.BlockSpec((1, cout_p), lambda p, t: (0, 0)),
                    pl.BlockSpec((tm3, cin_p), lambda p, t: (p * t, 0))]

    out_p = pl.pallas_call(
        kern,
        out_shape=jax.ShapeDtypeStruct((mop, cout_p), jnp.float32),
        grid_spec=pltpu.PrefetchScalarGridSpec(
            num_scalar_prefetch=0, grid=(2, t3),
            in_specs=in_specs,
            # p*t keeps the output block pinned to 0 during the stats phase (no
            # garbage write-backs), then walks the row tiles during phase 1.
            out_specs=pl.BlockSpec((tm3, cout_p), lambda p, t: (p * t, 0)),
            scratch_shapes=[pltpu.VMEM((1, cout_p), jnp.float32),
                            pltpu.VMEM((1, cout_p), jnp.float32)]),
        compiler_params=_mosaic_params(2, vmem_limit),
    )(*args)

    out = out_p[:mo, :outdim].reshape(n, ho, wo, outdim)
    return jnp.transpose(out, (0, 3, 1, 2))                            # back to NCHW


# ----------------------- params (PyTorch-equivalent init) -------------------

def init_params(key, indim, outdim):
    """Raw f32 params mirroring init_layer() / nn.Conv2d defaults."""
    cb = outdim // 4
    k1, k2, k3, ks, kbias = jax.random.split(key, 5)

    def conv_w(k, co, ci, kh, kw):
        nfan = kh * kw * co               # init_layer: normal(0, sqrt(2/n))
        return jax.random.normal(k, (co, ci, kh, kw), jnp.float32) * math.sqrt(2.0 / nfan)

    bound = 1.0 / math.sqrt(cb * 9)       # PyTorch default bias init for C2
    raw = {
        "w1": conv_w(k1, cb, indim, 1, 1),
        "w2": conv_w(k2, cb, cb, 3, 3),
        "w3": conv_w(k3, outdim, cb, 1, 1),
        "cb2": jax.random.uniform(kbias, (cb,), jnp.float32, -bound, bound),
        "g1": jnp.ones((cb,), jnp.float32), "b1": jnp.zeros((cb,), jnp.float32),
        "g2": jnp.ones((cb,), jnp.float32), "b2": jnp.zeros((cb,), jnp.float32),
        "g3": jnp.ones((outdim,), jnp.float32), "b3": jnp.zeros((outdim,), jnp.float32),
    }
    if indim != outdim:
        raw["ws"] = conv_w(ks, outdim, indim, 1, 1)
    return raw


def prepare_kernel_params(raw):
    """Lane-pad + bf16-cast weights.  C2's bias is dropped: a per-channel constant
    added before training-mode BN is removed exactly by the mean subtraction."""
    cb, indim = raw["w1"].shape[0], raw["w1"].shape[1]
    outdim = raw["w3"].shape[0]
    cin_p, cb_p, cout_p = _pad_to_lane(indim), _pad_to_lane(cb), _pad_to_lane(outdim)

    def pad_mat(w2d, rp, cp):
        r, c = w2d.shape
        return jnp.pad(w2d, ((0, rp - r), (0, cp - c))).astype(jnp.bfloat16)

    def pad_vec(v, cp, fill):
        return jnp.pad(v, (0, cp - v.shape[0]),
                       constant_values=fill).reshape(1, cp).astype(jnp.float32)

    # (dy*3+dx, Ci, Co) taps, zero-padded, stacked along the contraction dim so
    # the 3x3 conv is ONE matmul against a (9*cb_p, cb_p) weight.
    w2_taps = raw["w2"].transpose(2, 3, 1, 0).reshape(9, cb, cb)
    w2_cat = jnp.pad(w2_taps, ((0, 0), (0, cb_p - cb), (0, cb_p - cb)))
    w2_cat = w2_cat.reshape(9 * cb_p, cb_p).astype(jnp.bfloat16)

    kp = {
        "w1": pad_mat(raw["w1"][:, :, 0, 0].T, cin_p, cb_p),
        "w2": w2_cat,
        "w3": pad_mat(raw["w3"][:, :, 0, 0].T, cb_p, cout_p),
        "g1": pad_vec(raw["g1"], cb_p, 1.0), "b1": pad_vec(raw["b1"], cb_p, 0.0),
        "g2": pad_vec(raw["g2"], cb_p, 1.0), "b2": pad_vec(raw["b2"], cb_p, 0.0),
        "g3": pad_vec(raw["g3"], cout_p, 1.0), "b3": pad_vec(raw["b3"], cout_p, 0.0),
    }
    if "ws" in raw:
        kp["ws"] = pad_mat(raw["ws"][:, :, 0, 0].T, cin_p, cout_p)
    return kp


# ----------------------------- pure-JAX reference ---------------------------

def reference_forward(x_nchw, raw, half_res):
    s = 2 if half_res else 1
    hi = jax.lax.Precision.HIGHEST

    def conv(x, w, stride, padding):
        return jax.lax.conv_general_dilated(
            x, w, (stride, stride), padding,
            dimension_numbers=("NCHW", "OIHW", "NCHW"), precision=hi)

    def bn(h, g, b):
        mean = jnp.mean(h, axis=(0, 2, 3), keepdims=True)
        var = jnp.var(h, axis=(0, 2, 3), keepdims=True)
        return ((h - mean) * jax.lax.rsqrt(var + EPS) * g.reshape(1, -1, 1, 1)
                + b.reshape(1, -1, 1, 1))

    h = jax.nn.relu(bn(conv(x_nchw, raw["w1"], 1, "VALID"), raw["g1"], raw["b1"]))
    h = conv(h, raw["w2"], s, ((1, 1), (1, 1))) + raw["cb2"].reshape(1, -1, 1, 1)
    h = jax.nn.relu(bn(h, raw["g2"], raw["b2"]))
    h = bn(conv(h, raw["w3"], 1, "VALID"), raw["g3"], raw["b3"])
    short = conv(x_nchw, raw["ws"], s, "VALID") if "ws" in raw else x_nchw
    return jax.nn.relu(h + short)


# ------------------------------------ main -----------------------------------

if __name__ == "__main__":
    def run_case(key, *, indim, outdim, half_res, N, H, W, row_tile, conv_row_chunk):
        kx, kparam = jax.random.split(key)
        x = jax.random.normal(kx, (N, indim, H, W), dtype=jnp.float32)
        raw = init_params(kparam, indim, outdim)
        kp = prepare_kernel_params(raw)
        fwd = jax.jit(functools.partial(bottleneck_block, outdim=outdim,
                                        half_res=half_res, row_tile=row_tile,
                                        conv_row_chunk=conv_row_chunk))
        out = jax.block_until_ready(fwd(x, kp))
        s = 2 if half_res else 1
        ho, wo = (H - 1) // s + 1, (W - 1) // s + 1
        assert out.shape == (N, outdim, ho, wo), out.shape
        assert bool(jnp.all(out >= 0.0))                       # final ReLU
        ref = jax.block_until_ready(reference_forward(x, raw, half_res))
        err = float(jnp.max(jnp.abs(out - ref)))
        assert bool(jnp.allclose(out, ref, rtol=8e-2, atol=8e-2)), err

    key = jax.random.PRNGKey(0)
    k1, k2 = jax.random.split(key)

    # projection shortcut, stride 2, ragged 3x3 row chunks, multi-tile 1x1 layers
    run_case(k1, indim=8, outdim=16, half_res=True, N=2, H=16, W=16,
             row_tile=128, conv_row_chunk=3)
    # identity shortcut, stride 1, odd spatial size -> row padding + stats masking
    run_case(k2, indim=16, outdim=16, half_res=False, N=2, H=15, W=15,
             row_tile=128, conv_row_chunk=4)

    print("KERNEL_OK")
</pallas_src>

<mosaic_0001>
module attributes {stable_mosaic.version = 11 : i64} {
  func.func @conv1x1_stats_kernel(%arg0: i32, %arg1: memref<128x128xbf16, #tpu.memory_space<vmem>>, %arg2: memref<128x128xbf16, #tpu.memory_space<vmem>>, %arg3: memref<128x128xbf16, #tpu.memory_space<vmem>>, %arg4: memref<1x128xf32, #tpu.memory_space<vmem>>, %arg5: memref<1x128xf32, #tpu.memory_space<vmem>>) attributes {dimension_semantics = [#tpu.dimension_semantics<arbitrary>], iteration_bounds = array<i64: 4>, scalar_prefetch = 0 : i64, scratch_operands = 0 : i64, tpu.core_type = #tpu.core_type<tc>, window_params = [{transform_indices = @transform_0, window_bounds = array<i64: 128, 128>}, {pipeline_mode = #tpu.pipeline_mode<synchronous>, transform_indices = @transform_1, window_bounds = array<i64: 128, 128>}, {transform_indices = @transform_2, window_bounds = array<i64: 128, 128>}, {pipeline_mode = #tpu.pipeline_mode<synchronous>, transform_indices = @transform_3, window_bounds = array<i64: 1, 128>}, {pipeline_mode = #tpu.pipeline_mode<synchronous>, transform_indices = @transform_4, window_bounds = array<i64: 1, 128>}]} {
    %c0_i32 = arith.constant 0 : i32
    %0 = arith.cmpi eq, %arg0, %c0_i32 : i32
    %1 = arith.extui %0 : i1 to i32
    %c0_i32_0 = arith.constant 0 : i32
    %2 = arith.cmpi ne, %1, %c0_i32_0 : i32
    scf.if %2 {
      %cst_16 = arith.constant 0.000000e+00 : f32
      %19 = vector.broadcast %cst_16 : f32 to vector<1x128xf32>
      %c0_17 = arith.constant 0 : index
      %c0_18 = arith.constant 0 : index
      %20 = vector.load %arg4[%c0_17, %c0_18] : memref<1x128xf32, #tpu.memory_space<vmem>>, vector<1x128xf32>
      tpu.vector_store %arg4[%c0_17, %c0_18], %19 {strides = array<i32>} : memref<1x128xf32, #tpu.memory_space<vmem>>, vector<1x128xf32>,
      %cst_19 = arith.constant 0.000000e+00 : f32
      %21 = vector.broadcast %cst_19 : f32 to vector<1x128xf32>
      %c0_20 = arith.constant 0 : index
      %c0_21 = arith.constant 0 : index
      %22 = vector.load %arg5[%c0_20, %c0_21] : memref<1x128xf32, #tpu.memory_space<vmem>>, vector<1x128xf32>
      tpu.vector_store %arg5[%c0_20, %c0_21], %21 {strides = array<i32>} : memref<1x128xf32, #tpu.memory_space<vmem>>, vector<1x128xf32>,
    } else {
    }
    %c0 = arith.constant 0 : index
    %c0_1 = arith.constant 0 : index
    %3 = vector.load %arg1[%c0, %c0_1] : memref<128x128xbf16, #tpu.memory_space<vmem>>, vector<128x128xbf16>
    %c0_2 = arith.constant 0 : index
    %c0_3 = arith.constant 0 : index
    %4 = vector.load %arg2[%c0_2, %c0_3] : memref<128x128xbf16, #tpu.memory_space<vmem>>, vector<128x128xbf16>
    %cst = arith.constant dense<0.000000e+00> : vector<128x128xf32>
    %5 = tpu.matmul %3, %4, %cst {dimension_numbers = #tpu.dot_dimension_numbers<[1], [0], [0], [1], [0, 0, 1, 1], [], []>} : vector<128x128xbf16>, vector<128x128xbf16>, vector<128x128xf32> -> vector<128x128xf32>
    %6 = arith.truncf %5 : vector<128x128xf32> to vector<128x128xbf16>
    %c0_4 = arith.constant 0 : index
    %c0_5 = arith.constant 0 : index
    %7 = vector.load %arg3[%c0_4, %c0_5] : memref<128x128xbf16, #tpu.memory_space<vmem>>, vector<128x128xbf16>
    tpu.vector_store %arg3[%c0_4, %c0_5], %6 {strides = array<i32>} : memref<128x128xbf16, #tpu.memory_space<vmem>>, vector<128x128xbf16>,
    %c0_6 = arith.constant 0 : index
    %c0_7 = arith.constant 0 : index
    %8 = vector.load %arg4[%c0_6, %c0_7] : memref<1x128xf32, #tpu.memory_space<vmem>>, vector<1x128xf32>
    %cst_8 = arith.constant dense<0.000000e+00> : vector<128xf32>
    %9 = vector.multi_reduction <add>, %5, %cst_8 [0] : vector<128x128xf32> to vector<128xf32>
    %10 = vector.shape_cast %9 : vector<128xf32> to vector<1x128xf32>
    %11 = arith.addf %8, %10 : vector<1x128xf32>
    %c0_9 = arith.constant 0 : index
    %c0_10 = arith.constant 0 : index
    %12 = vector.load %arg4[%c0_9, %c0_10] : memref<1x128xf32, #tpu.memory_space<vmem>>, vector<1x128xf32>
    tpu.vector_store %arg4[%c0_9, %c0_10], %11 {strides = array<i32>} : memref<1x128xf32, #tpu.memory_space<vmem>>, vector<1x128xf32>,
    %c0_11 = arith.constant 0 : index
    %c0_12 = arith.constant 0 : index
    %13 = vector.load %arg5[%c0_11, %c0_12] : memref<1x128xf32, #tpu.memory_space<vmem>>, vector<1x128xf32>
    %14 = arith.mulf %5, %5 : vector<128x128xf32>
    %cst_13 = arith.constant dense<0.000000e+00> : vector<128xf32>
    %15 = vector.multi_reduction <add>, %14, %cst_13 [0] : vector<128x128xf32> to vector<128xf32>
    %16 = vector.shape_cast %15 : vector<128xf32> to vector<1x128xf32>
    %17 = arith.addf %13, %16 : vector<1x128xf32>
    %c0_14 = arith.constant 0 : index
    %c0_15 = arith.constant 0 : index
    %18 = vector.load %arg5[%c0_14, %c0_15] : memref<1x128xf32, #tpu.memory_space<vmem>>, vector<1x128xf32>
    tpu.vector_store %arg5[%c0_14, %c0_15], %17 {strides = array<i32>} : memref<1x128xf32, #tpu.memory_space<vmem>>, vector<1x128xf32>,
    return
  }
  func.func @transform_0(%arg0: i32) -> (i32, i32) {
    %c0_i32 = arith.constant 0 : i32
    %c0_i32_0 = arith.constant 0 : i32
    return %arg0, %c0_i32 : i32, i32
  }
  func.func @transform_1(%arg0: i32) -> (i32, i32) {
    %c0_i32 = arith.constant 0 : i32
    %c0_i32_0 = arith.constant 0 : i32
    %c0_i32_1 = arith.constant 0 : i32
    return %c0_i32, %c0_i32_0 : i32, i32
  }
  func.func @transform_2(%arg0: i32) -> (i32, i32) {
    %c0_i32 = arith.constant 0 : i32
    %c0_i32_0 = arith.constant 0 : i32
    return %arg0, %c0_i32 : i32, i32
  }
  func.func @transform_3(%arg0: i32) -> (i32, i32) {
    %c0_i32 = arith.constant 0 : i32
    %c0_i32_0 = arith.constant 0 : i32
    %c0_i32_1 = arith.constant 0 : i32
    return %c0_i32, %c0_i32_0 : i32, i32
  }
  func.func @transform_4(%arg0: i32) -> (i32, i32) {
    %c0_i32 = arith.constant 0 : i32
    %c0_i32_0 = arith.constant 0 : i32
    %c0_i32_1 = arith.constant 0 : i32
    return %c0_i32, %c0_i32_0 : i32, i32
  }
}

module attributes {stable_mosaic.version = 11 : i64} {
  func.func @conv3x3_stats_kernel(%arg0: i32, %arg1: memref<1x4x9x9x128xbf16, #tpu.memory_space<vmem>>, %arg2: memref<1152x128xbf16, #tpu.memory_space<vmem>>, %arg3: memref<1x64x128xbf16, #tpu.memory_space<vmem>>, %arg4: memref<1x128xf32, #tpu.memory_space<vmem>>, %arg5: memref<1x128xf32, #tpu.memory_space<vmem>>) attributes {dimension_semantics = [#tpu.dimension_semantics<arbitrary>], iteration_bounds = array<i64: 2>, scalar_prefetch = 0 : i64, scratch_operands = 0 : i64, tpu.core_type = #tpu.core_type<tc>, window_params = [{transform_indices = @transform_0, window_bounds = array<i64: 1, 4, 9, 9, 128>}, {pipeline_mode = #tpu.pipeline_mode<synchronous>, transform_indices = @transform_1, window_bounds = array<i64: 1152, 128>}, {transform_indices = @transform_2, window_bounds = array<i64: 1, 64, 128>}, {pipeline_mode = #tpu.pipeline_mode<synchronous>, transform_indices = @transform_3, window_bounds = array<i64: 1, 128>}, {pipeline_mode = #tpu.pipeline_mode<synchronous>, transform_indices = @transform_4, window_bounds = array<i64: 1, 128>}]} {
    %c0_i32 = arith.constant 0 : i32
    %0 = arith.cmpi eq, %arg0, %c0_i32 : i32
    %1 = arith.extui %0 : i1 to i32
    %c0_i32_0 = arith.constant 0 : i32
    %2 = arith.cmpi ne, %1, %c0_i32_0 : i32
    scf.if %2 {
      %cst_174 = arith.constant 0.000000e+00 : f32
      %138 = vector.broadcast %cst_174 : f32 to vector<1x128xf32>
      %c0_175 = arith.constant 0 : index
      %c0_176 = arith.constant 0 : index
      %139 = vector.load %arg4[%c0_175, %c0_176] : memref<1x128xf32, #tpu.memory_space<vmem>>, vector<1x128xf32>
      tpu.vector_store %arg4[%c0_175, %c0_176], %138 {strides = array<i32>} : memref<1x128xf32, #tpu.memory_space<vmem>>, vector<1x128xf32>,
      %cst_177 = arith.constant 0.000000e+00 : f32
      %140 = vector.broadcast %cst_177 : f32 to vector<1x128xf32>
      %c0_178 = arith.constant 0 : index
      %c0_179 = arith.constant 0 : index
      %141 = vector.load %arg5[%c0_178, %c0_179] : memref<1x128xf32, #tpu.memory_space<vmem>>, vector<1x128xf32>
      tpu.vector_store %arg5[%c0_178, %c0_179], %140 {strides = array<i32>} : memref<1x128xf32, #tpu.memory_space<vmem>>, vector<1x128xf32>,
    } else {
    }
    %c0 = arith.constant 0 : index
    %c0_1 = arith.constant 0 : index
    %c0_2 = arith.constant 0 : index
    %c0_3 = arith.constant 0 : index
    %c0_4 = arith.constant 0 : index
    %3 = vector.load %arg1[%c0, %c0_1, %c0_2, %c0_3, %c0_4] : memref<1x4x9x9x128xbf16, #tpu.memory_space<vmem>>, vector<1x1x3x8x128xbf16>
    %4 = vector.shape_cast %3 : vector<1x1x3x8x128xbf16> to vector<3x8x128xbf16>
    %5 = vector.shape_cast %4 : vector<3x8x128xbf16> to vector<24x128xbf16>
    %c0_5 = arith.constant 0 : index
    %c1 = arith.constant 1 : index
    %c0_6 = arith.constant 0 : index
    %c0_7 = arith.constant 0 : index
    %c0_8 = arith.constant 0 : index
    %6 = vector.load %arg1[%c0_5, %c1, %c0_6, %c0_7, %c0_8] : memref<1x4x9x9x128xbf16, #tpu.memory_space<vmem>>, vector<1x1x3x8x128xbf16>
    %7 = vector.shape_cast %6 : vector<1x1x3x8x128xbf16> to vector<3x8x128xbf16>
    %8 = vector.shape_cast %7 : vector<3x8x128xbf16> to vector<24x128xbf16>
    %c0_9 = arith.constant 0 : index
    %c0_10 = arith.constant 0 : index
    %c0_11 = arith.constant 0 : index
    %c1_12 = arith.constant 1 : index
    %c0_13 = arith.constant 0 : index
    %9 = vector.load %arg1[%c0_9, %c0_10, %c0_11, %c1_12, %c0_13] : memref<1x4x9x9x128xbf16, #tpu.memory_space<vmem>>, vector<1x1x3x8x128xbf16>
    %10 = vector.shape_cast %9 : vector<1x1x3x8x128xbf16> to vector<3x8x128xbf16>
    %11 = vector.shape_cast %10 : vector<3x8x128xbf16> to vector<24x128xbf16>
    %c0_14 = arith.constant 0 : index
    %c2 = arith.constant 2 : index
    %c0_15 = arith.constant 0 : index
    %c0_16 = arith.constant 0 : index
    %c0_17 = arith.constant 0 : index
    %12 = vector.load %arg1[%c0_14, %c2, %c0_15, %c0_16, %c0_17] : memref<1x4x9x9x128xbf16, #tpu.memory_space<vmem>>, vector<1x1x3x8x128xbf16>
    %13 = vector.shape_cast %12 : vector<1x1x3x8x128xbf16> to vector<3x8x128xbf16>
    %14 = vector.shape_cast %13 : vector<3x8x128xbf16> to vector<24x128xbf16>
    %c0_18 = arith.constant 0 : index
    %c3 = arith.constant 3 : index
    %c0_19 = arith.constant 0 : index
    %c0_20 = arith.constant 0 : index
    %c0_21 = arith.constant 0 : index
    %15 = vector.load %arg1[%c0_18, %c3, %c0_19, %c0_20, %c0_21] : memref<1x4x9x9x128xbf16, #tpu.memory_space<vmem>>, vector<1x1x3x8x128xbf16>
    %16 = vector.shape_cast %15 : vector<1x1x3x8x128xbf16> to vector<3x8x128xbf16>
    %17 = vector.shape_cast %16 : vector<3x8x128xbf16> to vector<24x128xbf16>
    %c0_22 = arith.constant 0 : index
    %c2_23 = arith.constant 2 : index
    %c0_24 = arith.constant 0 : index
    %c1_25 = arith.constant 1 : index
    %c0_26 = arith.constant 0 : index
    %18 = vector.load %arg1[%c0_22, %c2_23, %c0_24, %c1_25, %c0_26] : memref<1x4x9x9x128xbf16, #tpu.memory_space<vmem>>, vector<1x1x3x8x128xbf16>
    %19 = vector.shape_cast %18 : vector<1x1x3x8x128xbf16> to vector<3x8x128xbf16>
    %20 = vector.shape_cast %19 : vector<3x8x128xbf16> to vector<24x128xbf16>
    %c0_27 = arith.constant 0 : index
    %c0_28 = arith.constant 0 : index
    %c1_29 = arith.constant 1 : index
    %c0_30 = arith.constant 0 : index
    %c0_31 = arith.constant 0 : index
    %21 = vector.load %arg1[%c0_27, %c0_28, %c1_29, %c0_30, %c0_31] : memref<1x4x9x9x128xbf16, #tpu.memory_space<vmem>>, vector<1x1x3x8x128xbf16>
    %22 = vector.shape_cast %21 : vector<1x1x3x8x128xbf16> to vector<3x8x128xbf16>
    %23 = vector.shape_cast %22 : vector<3x8x128xbf16> to vector<24x128xbf16>
    %c0_32 = arith.constant 0 : index
    %c1_33 = arith.constant 1 : index
    %c1_34 = arith.constant 1 : index
    %c0_35 = arith.constant 0 : index
    %c0_36 = arith.constant 0 : index
    %24 = vector.load %arg1[%c0_32, %c1_33, %c1_34, %c0_35, %c0_36] : memref<1x4x9x9x128xbf16, #tpu.memory_space<vmem>>, vector<1x1x3x8x128xbf16>
    %25 = vector.shape_cast %24 : vector<1x1x3x8x128xbf16> to vector<3x8x128xbf16>
    %26 = vector.shape_cast %25 : vector<3x8x128xbf16> to vector<24x128xbf16>
    %c0_37 = arith.constant 0 : index
    %c0_38 = arith.constant 0 : index
    %c1_39 = arith.constant 1 : index
    %c1_40 = arith.constant 1 : index
    %c0_41 = arith.constant 0 : index
    %27 = vector.load %arg1[%c0_37, %c0_38, %c1_39, %c1_40, %c0_41] : memref<1x4x9x9x128xbf16, #tpu.memory_space<vmem>>, vector<1x1x3x8x128xbf16>
    %28 = vector.shape_cast %27 : vector<1x1x3x8x128xbf16> to vector<3x8x128xbf16>
    %29 = vector.shape_cast %28 : vector<3x8x128xbf16> to vector<24x128xbf16>
    %30 = tpu.concatenate %5, %8, %11, %14, %17, %20, %23, %26, %29 in 1 : vector<24x128xbf16>, vector<24x128xbf16>, vector<24x128xbf16>, vector<24x128xbf16>, vector<24x128xbf16>, vector<24x128xbf16>, vector<24x128xbf16>, vector<24x128xbf16>, vector<24x128xbf16> -> vector<24x1152xbf16>
    %c0_42 = arith.constant 0 : index
    %c0_43 = arith.constant 0 : index
    %31 = vector.load %arg2[%c0_42, %c0_43] : memref<1152x128xbf16, #tpu.memory_space<vmem>>, vector<1152x128xbf16>
    %cst = arith.constant dense<0.000000e+00> : vector<24x128xf32>
    %32 = tpu.matmul %30, %31, %cst {dimension_numbers = #tpu.dot_dimension_numbers<[1], [0], [0], [1], [0, 0, 1, 1], [], []>} : vector<24x1152xbf16>, vector<1152x128xbf16>, vector<24x128xf32> -> vector<24x128xf32>
    %33 = arith.truncf %32 : vector<24x128xf32> to vector<24x128xbf16>
    %c0_44 = arith.constant 0 : index
    %c0_45 = arith.constant 0 : index
    %c0_46 = arith.constant 0 : index
    %34 = vector.load %arg3[%c0_44, %c0_45, %c0_46] : memref<1x64x128xbf16, #tpu.memory_space<vmem>>, vector<1x24x128xbf16>
    %35 = vector.shape_cast %34 : vector<1x24x128xbf16> to vector<24x128xbf16>
    %36 = vector.shape_cast %33 : vector<24x128xbf16> to vector<1x24x128xbf16>
    tpu.vector_store %arg3[%c0_44, %c0_45, %c0_46], %36 {strides = array<i32>} : memref<1x64x128xbf16, #tpu.memory_space<vmem>>, vector<1x24x128xbf16>,
    %c0_47 = arith.constant 0 : index
    %c0_48 = arith.constant 0 : index
    %37 = vector.load %arg4[%c0_47, %c0_48] : memref<1x128xf32, #tpu.memory_space<vmem>>, vector<1x128xf32>
    %cst_49 = arith.constant dense<0.000000e+00> : vector<128xf32>
    %38 = vector.multi_reduction <add>, %32, %cst_49 [0] : vector<24x128xf32> to vector<128xf32>
    %39 = vector.shape_cast %38 : vector<128xf32> to vector<1x128xf32>
    %40 = arith.addf %37, %39 : vector<1x128xf32>
    %c0_50 = arith.constant 0 : index
    %c0_51 = arith.constant 0 : index
    %41 = vector.load %arg4[%c0_50, %c0_51] : memref<1x128xf32, #tpu.memory_space<vmem>>, vector<1x128xf32>
    tpu.vector_store %arg4[%c0_50, %c0_51], %40 {strides = array<i32>} : memref<1x128xf32, #tpu.memory_space<vmem>>, vector<1x128xf32>,
    %c0_52 = arith.constant 0 : index
    %c0_53 = arith.constant 0 : index
    %42 = vector.load %arg5[%c0_52, %c0_53] : memref<1x128xf32, #tpu.memory_space<vmem>>, vector<1x128xf32>
    %43 = arith.mulf %32, %32 : vector<24x128xf32>
    %cst_54 = arith.constant dense<0.000000e+00> : vector<128xf32>
    %44 = vector.multi_reduction <add>, %43, %cst_54 [0] : vector<24x128xf32> to vector<128xf32>
    %45 = vector.shape_cast %44 : vector<128xf32> to vector<1x128xf32>
    %46 = arith.addf %42, %45 : vector<1x128xf32>
    %c0_55 = arith.constant 0 : index
    %c0_56 = arith.constant 0 : index
    %47 = vector.load %arg5[%c0_55, %c0_56] : memref<1x128xf32, #tpu.memory_space<vmem>>, vector<1x128xf32>
    tpu.vector_store %arg5[%c0_55, %c0_56], %46 {strides = array<i32>} : memref<1x128xf32, #tpu.memory_space<vmem>>, vector<1x128xf32>,
    %c0_57 = arith.constant 0 : index
    %c0_58 = arith.constant 0 : index
    %c3_59 = arith.constant 3 : index
    %c0_60 = arith.constant 0 : index
    %c0_61 = arith.constant 0 : index
    %48 = vector.load %arg1[%c0_57, %c0_58, %c3_59, %c0_60, %c0_61] : memref<1x4x9x9x128xbf16, #tpu.memory_space<vmem>>, vector<1x1x3x8x128xbf16>
    %49 = vector.shape_cast %48 : vector<1x1x3x8x128xbf16> to vector<3x8x128xbf16>
    %50 = vector.shape_cast %49 : vector<3x8x128xbf16> to vector<24x128xbf16>
    %c0_62 = arith.constant 0 : index
    %c1_63 = arith.constant 1 : index
    %c3_64 = arith.constant 3 : index
    %c0_65 = arith.constant 0 : index
    %c0_66 = arith.constant 0 : index
    %51 = vector.load %arg1[%c0_62, %c1_63, %c3_64, %c0_65, %c0_66] : memref<1x4x9x9x128xbf16, #tpu.memory_space<vmem>>, vector<1x1x3x8x128xbf16>
    %52 = vector.shape_cast %51 : vector<1x1x3x8x128xbf16> to vector<3x8x128xbf16>
    %53 = vector.shape_cast %52 : vector<3x8x128xbf16> to vector<24x128xbf16>
    %c0_67 = arith.constant 0 : index
    %c0_68 = arith.constant 0 : index
    %c3_69 = arith.constant 3 : index
    %c1_70 = arith.constant 1 : index
    %c0_71 = arith.constant 0 : index
    %54 = vector.load %arg1[%c0_67, %c0_68, %c3_69, %c1_70, %c0_71] : memref<1x4x9x9x128xbf16, #tpu.memory_space<vmem>>, vector<1x1x3x8x128xbf16>
    %55 = vector.shape_cast %54 : vector<1x1x3x8x128xbf16> to vector<3x8x128xbf16>
    %56 = vector.shape_cast %55 : vector<3x8x128xbf16> to vector<24x128xbf16>
    %c0_72 = arith.constant 0 : index
    %c2_73 = arith.constant 2 : index
    %c3_74 = arith.constant 3 : index
    %c0_75 = arith.constant 0 : index
    %c0_76 = arith.constant 0 : index
    %57 = vector.load %arg1[%c0_72, %c2_73, %c3_74, %c0_75, %c0_76] : memref<1x4x9x9x128xbf16, #tpu.memory_space<vmem>>, vector<1x1x3x8x128xbf16>
    %58 = vector.shape_cast %57 : vector<1x1x3x8x128xbf16> to vector<3x8x128xbf16>
    %59 = vector.shape_cast %58 : vector<3x8x128xbf16> to vector<24x128xbf16>
    %c0_77 = arith.constant 0 : index
    %c3_78 = arith.constant 3 : index
    %c3_79 = arith.constant 3 : index
    %c0_80 = arith.constant 0 : index
    %c0_81 = arith.constant 0 : index
    %60 = vector.load %arg1[%c0_77, %c3_78, %c3_79, %c0_80, %c0_81] : memref<1x4x9x9x128xbf16, #tpu.memory_space<vmem>>, vector<1x1x3x8x128xbf16>
    %61 = vector.shape_cast %60 : vector<1x1x3x8x128xbf16> to vector<3x8x128xbf16>
    %62 = vector.shape_cast %61 : vector<3x8x128xbf16> to vector<24x128xbf16>
    %c0_82 = arith.constant 0 : index
    %c2_83 = arith.constant 2 : index
    %c3_84 = arith.constant 3 : index
    %c1_85 = arith.constant 1 : index
    %c0_86 = arith.constant 0 : index
    %63 = vector.load %arg1[%c0_82, %c2_83, %c3_84, %c1_85, %c0_86] : memref<1x4x9x9x128xbf16, #tpu.memory_space<vmem>>, vector<1x1x3x8x128xbf16>
    %64 = vector.shape_cast %63 : vector<1x1x3x8x128xbf16> to vector<3x8x128xbf16>
    %65 = vector.shape_cast %64 : vector<3x8x128xbf16> to vector<24x128xbf16>
    %c0_87 = arith.constant 0 : index
    %c0_88 = arith.constant 0 : index
    %c4 = arith.constant 4 : index
    %c0_89 = arith.constant 0 : index
    %c0_90 = arith.constant 0 : index
    %66 = vector.load %arg1[%c0_87, %c0_88, %c4, %c0_89, %c0_90] : memref<1x4x9x9x128xbf16, #tpu.memory_space<vmem>>, vector<1x1x3x8x128xbf16>
    %67 = vector.shape_cast %66 : vector<1x1x3x8x128xbf16> to vector<3x8x128xbf16>
    %68 = vector.shape_cast %67 : vector<3x8x128xbf16> to vector<24x128xbf16>
    %c0_91 = arith.constant 0 : index
    %c1_92 = arith.constant 1 : index
    %c4_93 = arith.constant 4 : index
    %c0_94 = arith.constant 0 : index
    %c0_95 = arith.constant 0 : index
    %69 = vector.load %arg1[%c0_91, %c1_92, %c4_93, %c0_94, %c0_95] : memref<1x4x9x9x128xbf16, #tpu.memory_space<vmem>>, vector<1x1x3x8x128xbf16>
    %70 = vector.shape_cast %69 : vector<1x1x3x8x128xbf16> to vector<3x8x128xbf16>
    %71 = vector.shape_cast %70 : vector<3x8x128xbf16> to vector<24x128xbf16>
    %c0_96 = arith.constant 0 : index
    %c0_97 = arith.constant 0 : index
    %c4_98 = arith.constant 4 : index
    %c1_99 = arith.constant 1 : index
    %c0_100 = arith.constant 0 : index
    %72 = vector.load %arg1[%c0_96, %c0_97, %c4_98, %c1_99, %c0_100] : memref<1x4x9x9x128xbf16, #tpu.memory_space<vmem>>, vector<1x1x3x8x128xbf16>
    %73 = vector.shape_cast %72 : vector<1x1x3x8x128xbf16> to vector<3x8x128xbf16>
    %74 = vector.shape_cast %73 : vector<3x8x128xbf16> to vector<24x128xbf16>
    %75 = tpu.concatenate %50, %53, %56, %59, %62, %65, %68, %71, %74 in 1 : vector<24x128xbf16>, vector<24x128xbf16>, vector<24x128xbf16>, vector<24x128xbf16>, vector<24x128xbf16>, vector<24x128xbf16>, vector<24x128xbf16>, vector<24x128xbf16>, vector<24x128xbf16> -> vector<24x1152xbf16>
    %c0_101 = arith.constant 0 : index
    %c0_102 = arith.constant 0 : index
    %76 = vector.load %arg2[%c0_101, %c0_102] : memref<1152x128xbf16, #tpu.memory_space<vmem>>, vector<1152x128xbf16>
    %cst_103 = arith.constant dense<0.000000e+00> : vector<24x128xf32>
    %77 = tpu.matmul %75, %76, %cst_103 {dimension_numbers = #tpu.dot_dimension_numbers<[1], [0], [0], [1], [0, 0, 1, 1], [], []>} : vector<24x1152xbf16>, vector<1152x128xbf16>, vector<24x128xf32> -> vector<24x128xf32>
    %78 = arith.truncf %77 : vector<24x128xf32> to vector<24x128xbf16>
    %c0_104 = arith.constant 0 : index
    %c24 = arith.constant 24 : index
    %c0_105 = arith.constant 0 : index
    %79 = vector.load %arg3[%c0_104, %c24, %c0_105] : memref<1x64x128xbf16, #tpu.memory_space<vmem>>, vector<1x24x128xbf16>
    %80 = vector.shape_cast %79 : vector<1x24x128xbf16> to vector<24x128xbf16>
    %81 = vector.shape_cast %78 : vector<24x128xbf16> to vector<1x24x128xbf16>
    tpu.vector_store %arg3[%c0_104, %c24, %c0_105], %81 {strides = array<i32>} : memref<1x64x128xbf16, #tpu.memory_space<vmem>>, vector<1x24x128xbf16>,
    %c0_106 = arith.constant 0 : index
    %c0_107 = arith.constant 0 : index
    %82 = vector.load %arg4[%c0_106, %c0_107] : memref<1x128xf32, #tpu.memory_space<vmem>>, vector<1x128xf32>
    %cst_108 = arith.constant dense<0.000000e+00> : vector<128xf32>
    %83 = vector.multi_reduction <add>, %77, %cst_108 [0] : vector<24x128xf32> to vector<128xf32>
    %84 = vector.shape_cast %83 : vector<128xf32> to vector<1x128xf32>
    %85 = arith.addf %82, %84 : vector<1x128xf32>
    %c0_109 = arith.constant 0 : index
    %c0_110 = arith.constant 0 : index
    %86 = vector.load %arg4[%c0_109, %c0_110] : memref<1x128xf32, #tpu.memory_space<vmem>>, vector<1x128xf32>
    tpu.vector_store %arg4[%c0_109, %c0_110], %85 {strides = array<i32>} : memref<1x128xf32, #tpu.memory_space<vmem>>, vector<1x128xf32>,
    %c0_111 = arith.constant 0 : index
    %c0_112 = arith.constant 0 : index
    %87 = vector.load %arg5[%c0_111, %c0_112] : memref<1x128xf32, #tpu.memory_space<vmem>>, vector<1x128xf32>
    %88 = arith.mulf %77, %77 : vector<24x128xf32>
    %cst_113 = arith.constant dense<0.000000e+00> : vector<128xf32>
    %89 = vector.multi_reduction <add>, %88, %cst_113 [0] : vector<24x128xf32> to vector<128xf32>
    %90 = vector.shape_cast %89 : vector<128xf32> to vector<1x128xf32>
    %91 = arith.addf %87, %90 : vector<1x128xf32>
    %c0_114 = arith.constant 0 : index
    %c0_115 = arith.constant 0 : index
    %92 = vector.load %arg5[%c0_114, %c0_115] : memref<1x128xf32, #tpu.memory_space<vmem>>, vector<1x128xf32>
    tpu.vector_store %arg5[%c0_114, %c0_115], %91 {strides = array<i32>} : memref<1x128xf32, #tpu.memory_space<vmem>>, vector<1x128xf32>,
    %c0_116 = arith.constant 0 : index
    %c0_117 = arith.constant 0 : index
    %c6 = arith.constant 6 : index
    %c0_118 = arith.constant 0 : index
    %c0_119 = arith.constant 0 : index
    %93 = vector.load %arg1[%c0_116, %c0_117, %c6, %c0_118, %c0_119] : memref<1x4x9x9x128xbf16, #tpu.memory_space<vmem>>, vector<1x1x2x8x128xbf16>
    %94 = vector.shape_cast %93 : vector<1x1x2x8x128xbf16> to vector<2x8x128xbf16>
    %95 = vector.shape_cast %94 : vector<2x8x128xbf16> to vector<16x128xbf16>
    %c0_120 = arith.constant 0 : index
    %c1_121 = arith.constant 1 : index
    %c6_122 = arith.constant 6 : index
    %c0_123 = arith.constant 0 : index
    %c0_124 = arith.constant 0 : index
    %96 = vector.load %arg1[%c0_120, %c1_121, %c6_122, %c0_123, %c0_124] : memref<1x4x9x9x128xbf16, #tpu.memory_space<vmem>>, vector<1x1x2x8x128xbf16>
    %97 = vector.shape_cast %96 : vector<1x1x2x8x128xbf16> to vector<2x8x128xbf16>
    %98 = vector.shape_cast %97 : vector<2x8x128xbf16> to vector<16x128xbf16>
    %c0_125 = arith.constant 0 : index
    %c0_126 = arith.constant 0 : index
    %c6_127 = arith.constant 6 : index
    %c1_128 = arith.constant 1 : index
    %c0_129 = arith.constant 0 : index
    %99 = vector.load %arg1[%c0_125, %c0_126, %c6_127, %c1_128, %c0_129] : memref<1x4x9x9x128xbf16, #tpu.memory_space<vmem>>, vector<1x1x2x8x128xbf16>
    %100 = vector.shape_cast %99 : vector<1x1x2x8x128xbf16> to vector<2x8x128xbf16>
    %101 = vector.shape_cast %100 : vector<2x8x128xbf16> to vector<16x128xbf16>
    %c0_130 = arith.constant 0 : index
    %c2_131 = arith.constant 2 : index
    %c6_132 = arith.constant 6 : index
    %c0_133 = arith.constant 0 : index
    %c0_134 = arith.constant 0 : index
    %102 = vector.load %arg1[%c0_130, %c2_131, %c6_132, %c0_133, %c0_134] : memref<1x4x9x9x128xbf16, #tpu.memory_space<vmem>>, vector<1x1x2x8x128xbf16>
    %103 = vector.shape_cast %102 : vector<1x1x2x8x128xbf16> to vector<2x8x128xbf16>
    %104 = vector.shape_cast %103 : vector<2x8x128xbf16> to vector<16x128xbf16>
    %c0_135 = arith.constant 0 : index
    %c3_136 = arith.constant 3 : index
    %c6_137 = arith.constant 6 : index
    %c0_138 = arith.constant 0 : index
    %c0_139 = arith.constant 0 : index
    %105 = vector.load %arg1[%c0_135, %c3_136, %c6_137, %c0_138, %c0_139] : memref<1x4x9x9x128xbf16, #tpu.memory_space<vmem>>, vector<1x1x2x8x128xbf16>
    %106 = vector.shape_cast %105 : vector<1x1x2x8x128xbf16> to vector<2x8x128xbf16>
    %107 = vector.shape_cast %106 : vector<2x8x128xbf16> to vector<16x128xbf16>
    %c0_140 = arith.constant 0 : index
    %c2_141 = arith.constant 2 : index
    %c6_142 = arith.constant 6 : index
    %c1_143 = arith.constant 1 : index
    %c0_144 = arith.constant 0 : index
    %108 = vector.load %arg1[%c0_140, %c2_141, %c6_142, %c1_143, %c0_144] : memref<1x4x9x9x128xbf16, #tpu.memory_space<vmem>>, vector<1x1x2x8x128xbf16>
    %109 = vector.shape_cast %108 : vector<1x1x2x8x128xbf16> to vector<2x8x128xbf16>
    %110 = vector.shape_cast %109 : vector<2x8x128xbf16> to vector<16x128xbf16>
    %c0_145 = arith.constant 0 : index
    %c0_146 = arith.constant 0 : index
    %c7 = arith.constant 7 : index
    %c0_147 = arith.constant 0 : index
    %c0_148 = arith.constant 0 : index
    %111 = vector.load %arg1[%c0_145, %c0_146, %c7, %c0_147, %c0_148] : memref<1x4x9x9x128xbf16, #tpu.memory_space<vmem>>, vector<1x1x2x8x128xbf16>
    %112 = vector.shape_cast %111 : vector<1x1x2x8x128xbf16> to vector<2x8x128xbf16>
    %113 = vector.shape_cast %112 : vector<2x8x128xbf16> to vector<16x128xbf16>
    %c0_149 = arith.constant 0 : index
    %c1_150 = arith.constant 1 : index
    %c7_151 = arith.constant 7 : index
    %c0_152 = arith.constant 0 : index
    %c0_153 = arith.constant 0 : index
    %114 = vector.load %arg1[%c0_149, %c1_150, %c7_151, %c0_152, %c0_153] : memref<1x4x9x9x128xbf16, #tpu.memory_space<vmem>>, vector<1x1x2x8x128xbf16>
    %115 = vector.shape_cast %114 : vector<1x1x2x8x128xbf16> to vector<2x8x128xbf16>
    %116 = vector.shape_cast %115 : vector<2x8x128xbf16> to vector<16x128xbf16>
    %c0_154 = arith.constant 0 : index
    %c0_155 = arith.constant 0 : index
    %c7_156 = arith.constant 7 : index
    %c1_157 = arith.constant 1 : index
    %c0_158 = arith.constant 0 : index
    %117 = vector.load %arg1[%c0_154, %c0_155, %c7_156, %c1_157, %c0_158] : memref<1x4x9x9x128xbf16, #tpu.memory_space<vmem>>, vector<1x1x2x8x128xbf16>
    %118 = vector.shape_cast %117 : vector<1x1x2x8x128xbf16> to vector<2x8x128xbf16>
    %119 = vector.shape_cast %118 : vector<2x8x128xbf16> to vector<16x128xbf16>
    %120 = tpu.concatenate %95, %98, %101, %104, %107, %110, %113, %116, %119 in 1 : vector<16x128xbf16>, vector<16x128xbf16>, vector<16x128xbf16>, vector<16x128xbf16>, vector<16x128xbf16>, vector<16x128xbf16>, vector<16x128xbf16>, vector<16x128xbf16>, vector<16x128xbf16> -> vector<16x1152xbf16>
    %c0_159 = arith.constant 0 : index
    %c0_160 = arith.constant 0 : index
    %121 = vector.load %arg2[%c0_159, %c0_160] : memref<1152x128xbf16, #tpu.memory_space<vmem>>, vector<1152x128xbf16>
    %cst_161 = arith.constant dense<0.000000e+00> : vector<16x128xf32>
    %122 = tpu.matmul %120, %121, %cst_161 {dimension_numbers = #tpu.dot_dimension_numbers<[1], [0], [0], [1], [0, 0, 1, 1], [], []>} : vector<16x1152xbf16>, vector<1152x128xbf16>, vector<16x128xf32> -> vector<16x128xf32>
    %123 = arith.truncf %122 : vector<16x128xf32> to vector<16x128xbf16>
    %c0_162 = arith.constant 0 : index
    %c48 = arith.constant 48 : index
    %c0_163 = arith.constant 0 : index
    %124 = vector.load %arg3[%c0_162, %c48, %c0_163] : memref<1x64x128xbf16, #tpu.memory_space<vmem>>, vector<1x16x128xbf16>
    %125 = vector.shape_cast %124 : vector<1x16x128xbf16> to vector<16x128xbf16>
    %126 = vector.shape_cast %123 : vector<16x128xbf16> to vector<1x16x128xbf16>
    tpu.vector_store %arg3[%c0_162, %c48, %c0_163], %126 {strides = array<i32>} : memref<1x64x128xbf16, #tpu.memory_space<vmem>>, vector<1x16x128xbf16>,
    %c0_164 = arith.constant 0 : index
    %c0_165 = arith.constant 0 : index
    %127 = vector.load %arg4[%c0_164, %c0_165] : memref<1x128xf32, #tpu.memory_space<vmem>>, vector<1x128xf32>
    %cst_166 = arith.constant dense<0.000000e+00> : vector<128xf32>
    %128 = vector.multi_reduction <add>, %122, %cst_166 [0] : vector<16x128xf32> to vector<128xf32>
    %129 = vector.shape_cast %128 : vector<128xf32> to vector<1x128xf32>
    %130 = arith.addf %127, %129 : vector<1x128xf32>
    %c0_167 = arith.constant 0 : index
    %c0_168 = arith.constant 0 : index
    %131 = vector.load %arg4[%c0_167, %c0_168] : memref<1x128xf32, #tpu.memory_space<vmem>>, vector<1x128xf32>
    tpu.vector_store %arg4[%c0_167, %c0_168], %130 {strides = array<i32>} : memref<1x128xf32, #tpu.memory_space<vmem>>, vector<1x128xf32>,
    %c0_169 = arith.constant 0 : index
    %c0_170 = arith.constant 0 : index
    %132 = vector.load %arg5[%c0_169, %c0_170] : memref<1x128xf32, #tpu.memory_space<vmem>>, vector<1x128xf32>
    %133 = arith.mulf %122, %122 : vector<16x128xf32>
    %cst_171 = arith.constant dense<0.000000e+00> : vector<128xf32>
    %134 = vector.multi_reduction <add>, %133, %cst_171 [0] : vector<16x128xf32> to vector<128xf32>
    %135 = vector.shape_cast %134 : vector<128xf32> to vector<1x128xf32>
    %136 = arith.addf %132, %135 : vector<1x128xf32>
    %c0_172 = arith.constant 0 : index
    %c0_173 = arith.constant 0 : index
    %137 = vector.load %arg5[%c0_172, %c0_173] : memref<1x128xf32, #tpu.memory_space<vmem>>, vector<1x128xf32>
    tpu.vector_store %arg5[%c0_172, %c0_173], %136 {strides = array<i32>} : memref<1x128xf32, #tpu.memory_space<vmem>>, vector<1x128xf32>,
    return
  }
  func.func @transform_0(%arg0: i32) -> (i32, i32, i32, i32, i32) {
    %c0_i32 = arith.constant 0 : i32
    %c0_i32_0 = arith.constant 0 : i32
    %c0_i32_1 = arith.constant 0 : i32
    %c0_i32_2 = arith.constant 0 : i32
    %c0_i32_3 = arith.constant 0 : i32
    return %arg0, %c0_i32, %c0_i32_0, %c0_i32_1, %c0_i32_2 : i32, i32, i32, i32, i32
  }
  func.func @transform_1(%arg0: i32) -> (i32, i32) {
    %c0_i32 = arith.constant 0 : i32
    %c0_i32_0 = arith.constant 0 : i32
    %c0_i32_1 = arith.constant 0 : i32
    return %c0_i32, %c0_i32_0 : i32, i32
  }
  func.func @transform_2(%arg0: i32) -> (i32, i32, i32) {
    %c0_i32 = arith.constant 0 : i32
    %c0_i32_0 = arith.constant 0 : i32
    %c0_i32_1 = arith.constant 0 : i32
    return %arg0, %c0_i32, %c0_i32_0 : i32, i32, i32
  }
  func.func @transform_3(%arg0: i32) -> (i32, i32) {
    %c0_i32 = arith.constant 0 : i32
    %c0_i32_0 = arith.constant 0 : i32
    %c0_i32_1 = arith.constant 0 : i32
    return %c0_i32, %c0_i32_0 : i32, i32
  }
  func.func @transform_4(%arg0: i32) -> (i32, i32) {
    %c0_i32 = arith.constant 0 : i32
    %c0_i32_0 = arith.constant 0 : i32
    %c0_i32_1 = arith.constant 0 : i32
    return %c0_i32, %c0_i32_0 : i32, i32
  }
}

module attributes {stable_mosaic.version = 11 : i64} {
  func.func @conv1x1_bn_add_relu_proj_kernel(%arg0: i32, %arg1: i32, %arg2: memref<128x128xbf16, #tpu.memory_space<vmem>>, %arg3: memref<1x128xf32, #tpu.memory_space<vmem>>, %arg4: memref<1x128xf32, #tpu.memory_space<vmem>>, %arg5: memref<128x128xbf16, #tpu.memory_space<vmem>>, %arg6: memref<1x128xf32, #tpu.memory_space<vmem>>, %arg7: memref<1x128xf32, #tpu.memory_space<vmem>>, %arg8: memref<128x128xbf16, #tpu.memory_space<vmem>>, %arg9: memref<128x128xbf16, #tpu.memory_space<vmem>>, %arg10: memref<128x128xf32, #tpu.memory_space<vmem>>, %arg11: memref<1x128xf32, #tpu.memory_space<vmem>>, %arg12: memref<1x128xf32, #tpu.memory_space<vmem>>) attributes {dimension_semantics = [#tpu.dimension_semantics<arbitrary>, #tpu.dimension_semantics<arbitrary>], iteration_bounds = array<i64: 2, 1>, scalar_prefetch = 0 : i64, scratch_operands = 2 : i64, tpu.core_type = #tpu.core_type<tc>, window_params = [{transform_indices = @transform_0, window_bounds = array<i64: 128, 128>}, {pipeline_mode = #tpu.pipeline_mode<synchronous>, transform_indices = @transform_1, window_bounds = array<i64: 1, 128>}, {pipeline_mode = #tpu.pipeline_mode<synchronous>, transform_indices = @transform_2, window_bounds = array<i64: 1, 128>}, {pipeline_mode = #tpu.pipeline_mode<synchronous>, transform_indices = @transform_3, window_bounds = array<i64: 128, 128>}, {pipeline_mode = #tpu.pipeline_mode<synchronous>, transform_indices = @transform_4, window_bounds = array<i64: 1, 128>}, {pipeline_mode = #tpu.pipeline_mode<synchronous>, transform_indices = @transform_5, window_bounds = array<i64: 1, 128>}, {transform_indices = @transform_6, window_bounds = array<i64: 128, 128>}, {pipeline_mode = #tpu.pipeline_mode<synchronous>, transform_indices = @transform_7, window_bounds = array<i64: 128, 128>}, {transform_indices = @transform_8, window_bounds = array<i64: 128, 128>}]} {
    %c0 = arith.constant 0 : index
    %c0_0 = arith.constant 0 : index
    %0 = vector.load %arg2[%c0, %c0_0] : memref<128x128xbf16, #tpu.memory_space<vmem>>, vector<128x128xbf16>
    %1 = arith.extf %0 : vector<128x128xbf16> to vector<128x128xf32>
    %c0_1 = arith.constant 0 : index
    %c0_2 = arith.constant 0 : index
    %2 = vector.load %arg3[%c0_1, %c0_2] : memref<1x128xf32, #tpu.memory_space<vmem>>, vector<1x128xf32>
    %3 = vector.broadcast %2 : vector<1x128xf32> to vector<128x128xf32>
    %4 = arith.mulf %1, %3 : vector<128x128xf32>
    %c0_3 = arith.constant 0 : index
    %c0_4 = arith.constant 0 : index
    %5 = vector.load %arg4[%c0_3, %c0_4] : memref<1x128xf32, #tpu.memory_space<vmem>>, vector<1x128xf32>
    %6 = vector.broadcast %5 : vector<1x128xf32> to vector<128x128xf32>
    %7 = arith.addf %4, %6 : vector<128x128xf32>
    %cst = arith.constant 0.000000e+00 : f32
    %8 = vector.broadcast %cst : f32 to vector<128x128xf32>
    %9 = arith.maximumf %7, %8 : vector<128x128xf32>
    %10 = arith.truncf %9 : vector<128x128xf32> to vector<128x128xbf16>
    %c0_5 = arith.constant 0 : index
    %c0_6 = arith.constant 0 : index
    %11 = vector.load %arg5[%c0_5, %c0_6] : memref<128x128xbf16, #tpu.memory_space<vmem>>, vector<128x128xbf16>
    %cst_7 = arith.constant dense<0.000000e+00> : vector<128x128xf32>
    %12 = tpu.matmul %10, %11, %cst_7 {dimension_numbers = #tpu.dot_dimension_numbers<[1], [0], [0], [1], [0, 0, 1, 1], [], []>} : vector<128x128xbf16>, vector<128x128xbf16>, vector<128x128xf32> -> vector<128x128xf32>
    %c0_i32 = arith.constant 0 : i32
    %13 = arith.cmpi eq, %arg0, %c0_i32 : i32
    %14 = arith.extui %13 : i1 to i32
    %c0_i32_8 = arith.constant 0 : i32
    %15 = arith.cmpi ne, %14, %c0_i32_8 : i32
    scf.if %15 {
      %c0_i32_10 = arith.constant 0 : i32
      %19 = arith.cmpi eq, %arg1, %c0_i32_10 : i32
      %20 = arith.extui %19 : i1 to i32
      %c0_i32_11 = arith.constant 0 : i32
      %21 = arith.cmpi ne, %20, %c0_i32_11 : i32
      scf.if %21 {
        %cst_22 = arith.constant 0.000000e+00 : f32
        %33 = vector.broadcast %cst_22 : f32 to vector<1x128xf32>
        %c0_23 = arith.constant 0 : index
        %c0_24 = arith.constant 0 : index
        %34 = vector.load %arg11[%c0_23, %c0_24] : memref<1x128xf32, #tpu.memory_space<vmem>>, vector<1x128xf32>
        tpu.vector_store %arg11[%c0_23, %c0_24], %33 {strides = array<i32>} : memref<1x128xf32, #tpu.memory_space<vmem>>, vector<1x128xf32>,
        %cst_25 = arith.constant 0.000000e+00 : f32
        %35 = vector.broadcast %cst_25 : f32 to vector<1x128xf32>
        %c0_26 = arith.constant 0 : index
        %c0_27 = arith.constant 0 : index
        %36 = vector.load %arg12[%c0_26, %c0_27] : memref<1x128xf32, #tpu.memory_space<vmem>>, vector<1x128xf32>
        tpu.vector_store %arg12[%c0_26, %c0_27], %35 {strides = array<i32>} : memref<1x128xf32, #tpu.memory_space<vmem>>, vector<1x128xf32>,
      } else {
      }
      %c0_12 = arith.constant 0 : index
      %c0_13 = arith.constant 0 : index
      %22 = vector.load %arg11[%c0_12, %c0_13] : memref<1x128xf32, #tpu.memory_space<vmem>>, vector<1x128xf32>
      %cst_14 = arith.constant dense<0.000000e+00> : vector<128xf32>
      %23 = vector.multi_reduction <add>, %12, %cst_14 [0] : vector<128x128xf32> to vector<128xf32>
      %24 = vector.shape_cast %23 : vector<128xf32> to vector<1x128xf32>
      %25 = arith.addf %22, %24 : vector<1x128xf32>
      %c0_15 = arith.constant 0 : index
      %c0_16 = arith.constant 0 : index
      %26 = vector.load %arg11[%c0_15, %c0_16] : memref<1x128xf32, #tpu.memory_space<vmem>>, vector<1x128xf32>
      tpu.vector_store %arg11[%c0_15, %c0_16], %25 {strides = array<i32>} : memref<1x128xf32, #tpu.memory_space<vmem>>, vector<1x128xf32>,
      %c0_17 = arith.constant 0 : index
      %c0_18 = arith.constant 0 : index
      %27 = vector.load %arg12[%c0_17, %c0_18] : memref<1x128xf32, #tpu.memory_space<vmem>>, vector<1x128xf32>
      %28 = arith.mulf %12, %12 : vector<128x128xf32>
      %cst_19 = arith.constant dense<0.000000e+00> : vector<128xf32>
      %29 = vector.multi_reduction <add>, %28, %cst_19 [0] : vector<128x128xf32> to vector<128xf32>
      %30 = vector.shape_cast %29 : vector<128xf32> to vector<1x128xf32>
      %31 = arith.addf %27, %30 : vector<1x128xf32>
      %c0_20 = arith.constant 0 : index
      %c0_21 = arith.constant 0 : index
      %32 = vector.load %arg12[%c0_20, %c0_21] : memref<1x128xf32, #tpu.memory_space<vmem>>, vector<1x128xf32>
      tpu.vector_store %arg12[%c0_20, %c0_21], %31 {strides = array<i32>} : memref<1x128xf32, #tpu.memory_space<vmem>>, vector<1x128xf32>,
    } else {
    }
    %c1_i32 = arith.constant 1 : i32
    %16 = arith.cmpi eq, %arg0, %c1_i32 : i32
    %17 = arith.extui %16 : i1 to i32
    %c0_i32_9 = arith.constant 0 : i32
    %18 = arith.cmpi ne, %17, %c0_i32_9 : i32
    scf.if %18 {
      %c0_10 = arith.constant 0 : index
      %c0_11 = arith.constant 0 : index
      %19 = vector.load %arg11[%c0_10, %c0_11] : memref<1x128xf32, #tpu.memory_space<vmem>>, vector<1x128xf32>
      %c0_12 = arith.constant 0 : index
      %c0_13 = arith.constant 0 : index
      %20 = vector.load %arg12[%c0_12, %c0_13] : memref<1x128xf32, #tpu.memory_space<vmem>>, vector<1x128xf32>
      %c0_14 = arith.constant 0 : index
      %c0_15 = arith.constant 0 : index
      %21 = vector.load %arg6[%c0_14, %c0_15] : memref<1x128xf32, #tpu.memory_space<vmem>>, vector<1x128xf32>
      %c0_16 = arith.constant 0 : index
      %c0_17 = arith.constant 0 : index
      %22 = vector.load %arg7[%c0_16, %c0_17] : memref<1x128xf32, #tpu.memory_space<vmem>>, vector<1x128xf32>
      %cst_18 = arith.constant 7.812500e-03 : f32
      %23 = vector.broadcast %cst_18 : f32 to vector<1x128xf32>
      %24 = arith.mulf %19, %23 : vector<1x128xf32>
      %cst_19 = arith.constant 7.812500e-03 : f32
      %25 = vector.broadcast %cst_19 : f32 to vector<1x128xf32>
      %26 = arith.mulf %20, %25 : vector<1x128xf32>
      %27 = arith.mulf %24, %24 : vector<1x128xf32>
      %28 = arith.subf %26, %27 : vector<1x128xf32>
      %cst_20 = arith.constant 0.000000e+00 : f32
      %29 = vector.broadcast %cst_20 : f32 to vector<1x128xf32>
      %30 = arith.maximumf %28, %29 : vector<1x128xf32>
      %cst_21 = arith.constant 9.99999974E-6 : f32
      %31 = vector.broadcast %cst_21 : f32 to vector<1x128xf32>
      %32 = arith.addf %30, %31 : vector<1x128xf32>
      %33 = math.rsqrt %32 : vector<1x128xf32>
      %34 = arith.mulf %21, %33 : vector<1x128xf32>
      %35 = arith.mulf %24, %34 : vector<1x128xf32>
      %36 = arith.subf %22, %35 : vector<1x128xf32>
      %c0_22 = arith.constant 0 : index
      %c0_23 = arith.constant 0 : index
      %37 = vector.load %arg8[%c0_22, %c0_23] : memref<128x128xbf16, #tpu.memory_space<vmem>>, vector<128x128xbf16>
      %c0_24 = arith.constant 0 : index
      %c0_25 = arith.constant 0 : index
      %38 = vector.load %arg9[%c0_24, %c0_25] : memref<128x128xbf16, #tpu.memory_space<vmem>>, vector<128x128xbf16>
      %cst_26 = arith.constant dense<0.000000e+00> : vector<128x128xf32>
      %39 = tpu.matmul %37, %38, %cst_26 {dimension_numbers = #tpu.dot_dimension_numbers<[1], [0], [0], [1], [0, 0, 1, 1], [], []>} : vector<128x128xbf16>, vector<128x128xbf16>, vector<128x128xf32> -> vector<128x128xf32>
      %40 = vector.broadcast %34 : vector<1x128xf32> to vector<128x128xf32>
      %41 = arith.mulf %12, %40 : vector<128x128xf32>
      %42 = vector.broadcast %36 : vector<1x128xf32> to vector<128x128xf32>
      %43 = arith.addf %41, %42 : vector<128x128xf32>
      %44 = arith.addf %43, %39 : vector<128x128xf32>
      %cst_27 = arith.constant 0.000000e+00 : f32
      %45 = vector.broadcast %cst_27 : f32 to vector<128x128xf32>
      %46 = arith.maximumf %44, %45 : vector<128x128xf32>
      %c0_28 = arith.constant 0 : index
      %c0_29 = arith.constant 0 : index
      %47 = vector.load %arg10[%c0_28, %c0_29] : memref<128x128xf32, #tpu.memory_space<vmem>>, vector<128x128xf32>
      tpu.vector_store %arg10[%c0_28, %c0_29], %46 {strides = array<i32>} : memref<128x128xf32, #tpu.memory_space<vmem>>, vector<128x128xf32>,
    } else {
    }
    return
  }
  func.func @transform_0(%arg0: i32, %arg1: i32) -> (i32, i32) {
    %c0_i32 = arith.constant 0 : i32
    %c0_i32_0 = arith.constant 0 : i32
    return %arg1, %c0_i32 : i32, i32
  }
  func.func @transform_1(%arg0: i32, %arg1: i32) -> (i32, i32) {
    %c0_i32 = arith.constant 0 : i32
    %c0_i32_0 = arith.constant 0 : i32
    %c0_i32_1 = arith.constant 0 : i32
    return %c0_i32, %c0_i32_0 : i32, i32
  }
  func.func @transform_2(%arg0: i32, %arg1: i32) -> (i32, i32) {
    %c0_i32 = arith.constant 0 : i32
    %c0_i32_0 = arith.constant 0 : i32
    %c0_i32_1 = arith.constant 0 : i32
    return %c0_i32, %c0_i32_0 : i32, i32
  }
  func.func @transform_3(%arg0: i32, %arg1: i32) -> (i32, i32) {
    %c0_i32 = arith.constant 0 : i32
    %c0_i32_0 = arith.constant 0 : i32
    %c0_i32_1 = arith.constant 0 : i32
    return %c0_i32, %c0_i32_0 : i32, i32
  }
  func.func @transform_4(%arg0: i32, %arg1: i32) -> (i32, i32) {
    %c0_i32 = arith.constant 0 : i32
    %c0_i32_0 = arith.constant 0 : i32
    %c0_i32_1 = arith.constant 0 : i32
    return %c0_i32, %c0_i32_0 : i32, i32
  }
  func.func @transform_5(%arg0: i32, %arg1: i32) -> (i32, i32) {
    %c0_i32 = arith.constant 0 : i32
    %c0_i32_0 = arith.constant 0 : i32
    %c0_i32_1 = arith.constant 0 : i32
    return %c0_i32, %c0_i32_0 : i32, i32
  }
  func.func @transform_6(%arg0: i32, %arg1: i32) -> (i32, i32) {
    %0 = arith.muli %arg0, %arg1 : i32
    %c0_i32 = arith.constant 0 : i32
    %c0_i32_0 = arith.constant 0 : i32
    return %0, %c0_i32 : i32, i32
  }
  func.func @transform_7(%arg0: i32, %arg1: i32) -> (i32, i32) {
    %c0_i32 = arith.constant 0 : i32
    %c0_i32_0 = arith.constant 0 : i32
    %c0_i32_1 = arith.constant 0 : i32
    return %c0_i32, %c0_i32_0 : i32, i32
  }
  func.func @transform_8(%arg0: i32, %arg1: i32) -> (i32, i32) {
    %0 = arith.muli %arg0, %arg1 : i32
    %c0_i32 = arith.constant 0 : i32
    %c0_i32_0 = arith.constant 0 : i32
    return %0, %c0_i32 : i32, i32
  }
}

</mosaic_0001>

<bundles_post_ra>
// kernel: bottleneck_block.3
= control target key start
LH: loop header
LB: loop body
LE: loop exit
PB: predicated region body
PF: predicated region fallthrough
CT: control target
= control target key end

     0   :  { %s870_s15 = smov 0   ;;  %s949_s0 = inlined_call_operand.vmem [shape: bf16[512,128], index: 0, kind: input, shape index: {}]   ;;  %s950_s1 = inlined_call_operand.vmem [shape: bf16[128,128], index: 1, kind: input, shape index: {}]   ;;  %s951_s2 = inlined_call_operand.vmem [shape: bf16[512,128], index: 2, kind: output, shape index: {0}]   ;;  %s952_s3 = inlined_call_operand.vmem [shape: f32[1,128], index: 3, kind: output, shape index: {1}]   ;;  %s953_s4 = inlined_call_operand.vmem [shape: f32[1,128], index: 4, kind: output, shape index: {2}]  }
   0x1 LB: > { %s640_s16 = sadd.s32 4294967295, %s842_s15   ;;  %p644_p0 = scmp.ge.s32.totalorder %s842_s15, 1  ;;  %s842_s15 = sphi %s870_s15, %s15_s15  }
   0x2   : > { %p158_p1 = scmp.lt.s32.totalorder %s842_s15, 5 }
   0x4   : > { %p159_p2 = pnand %p644_p0, %p158_p1 }
   0x5   : > { %s645_s17 = sshll.u32 (!%p159_p2), %s640_s16, 4  ;;  %p649_p4 = scmp.ne.s32.totalorder (!%p159_p2), %s640_s16, 0 }
   0x6   : > { %162 = sbr.rel (%p159_p2) target bundleno = 297 (0x129), region = 28  ;;  %p185_p3 = scmp.lt.s32.totalorder (!%p159_p2), %s645_s17, 63 }
   0xb   : > { %s955_s17 = smov (!%p185_p3, %s645_s17), 63  ;;  %200 = sbr.rel (%p649_p4) target bundleno = 18 (0x12), region = 32 }
   0xc   : > { %s646_s18 = sshll.u32 %s955_s17, 2 }
   0xd   : > { %s881_s21 = scalar_lea.vmem %s949_s0, %s646_s18  ;;  %s886_s24 = scalar_lea.vmem %s951_s2, %s646_s18 }
  0x10   : > { %v844_v0 = vmov 0.0  }
  0x11   : > { %201 = vst [vmem:[%s952_s3] sm:$0x1] %v844_v0  ;;  %202 = vst [vmem:[%s953_s4] sm:$0x1] %v844_v0 }
  0x12 PF: > { %v820_v1 = vld [vmem:[%s950_s1 + $0x38] sm:$0xff]   ;;  %v821_v2 = vld [vmem:[%s950_s1 + $0x30] sm:$0xff]   ;;  %v822_v3 = vld [vmem:[%s950_s1 + $0x28] sm:$0xff]  }
  0x13   : > { %763 = vmatprep.subr.bf16.mxu0 %v820_v1  ;;  %795 = vmatprep.subr.bf16.mxu1 %v820_v1  ;;  %v823_v4 = vld [vmem:[%s950_s1 + $0x20] sm:$0xff]   ;;  %v824_v6 = vld [vmem:[%s950_s1 + $0x18] sm:$0xff]   ;;  %v825_v8 = vld [vmem:[%s950_s1 + $0x10] sm:$0xff]  }
  0x14   : > { %764 = vmatpush3.bf16.msra.mxu0 %v820_v1  ;;  %803 = vmatpush3.bf16.msra.mxu1 %v820_v1  ;;  %v828_v5 = vld [vmem:[%s881_s21] sm:$0xff]   ;;  %v826_v9 = vld [vmem:[%s950_s1 + $0x8] sm:$0xff]   ;;  %v830_v13 = vld [vmem:[%s881_s21 + $0x10] sm:$0xff]  }
  0x15   : > { %765 = vmatprep.subr.bf16.mxu0 %v821_v2  ;;  %796 = vmatprep.subr.bf16.mxu1 %v821_v2  ;;  %v832_v7 = vld [vmem:[%s881_s21 + $0x20] sm:$0xff]   ;;  %v829_v11 = vld [vmem:[%s881_s21 + $0x8] sm:$0xff]   ;;  %v834_v14 = vld [vmem:[%s881_s21 + $0x30] sm:$0xff]  }
  0x16   : > { %779 = vmatprep.mubr.bf16.mxu0 %v828_v5  ;;  %787 = vmatprep.mubr.bf16.mxu1 %v832_v7  ;;  %v827_v10 = vld [vmem:[%s950_s1] sm:$0xff]   ;;  %v833_v12 = vld [vmem:[%s881_s21 + $0x28] sm:$0xff]   ;;  %v831_v15 = vld [vmem:[%s881_s21 + $0x18] sm:$0xff]  }
  0x17   : > { %v835_v16 = vld [vmem:[%s881_s21 + $0x38] sm:$0xff]  }
  0x18   : > { %766 = vmatpush3.bf16.msra.mxu0 %v821_v2  ;;  %804 = vmatpush3.bf16.msra.mxu1 %v821_v2 }
  0x19   : > { %767 = vmatprep.subr.bf16.mxu0 %v822_v3  ;;  %797 = vmatprep.subr.bf16.mxu1 %v822_v3 }
  0x1c   : > { %768 = vmatpush3.bf16.msra.mxu0 %v822_v3  ;;  %805 = vmatpush3.bf16.msra.mxu1 %v822_v3 }
  0x1d   : > { %769 = vmatprep.subr.bf16.mxu0 %v823_v4  ;;  %798 = vmatprep.subr.bf16.mxu1 %v823_v4 }
  0x20   : > { %770 = vmatpush3.bf16.msra.mxu0 %v823_v4  ;;  %806 = vmatpush3.bf16.msra.mxu1 %v823_v4 }
  0x21   : > { %771 = vmatprep.subr.bf16.mxu0 %v824_v6  ;;  %799 = vmatprep.subr.bf16.mxu1 %v824_v6 }
  0x24   : > { %772 = vmatpush3.bf16.msra.mxu0 %v824_v6  ;;  %807 = vmatpush3.bf16.msra.mxu1 %v824_v6 }
  0x25   : > { %773 = vmatprep.subr.bf16.mxu0 %v825_v8  ;;  %800 = vmatprep.subr.bf16.mxu1 %v825_v8 }
  0x28   : > { %774 = vmatpush3.bf16.msra.mxu0 %v825_v8  ;;  %808 = vmatpush3.bf16.msra.mxu1 %v825_v8 }
  0x29   : > { %775 = vmatprep.subr.bf16.mxu0 %v826_v9  ;;  %801 = vmatprep.subr.bf16.mxu1 %v826_v9 }
  0x2c   : > { %776 = vmatpush3.bf16.msra.mxu0 %v826_v9  ;;  %809 = vmatpush3.bf16.msra.mxu1 %v826_v9 }
  0x2d   : > { %777 = vmatprep.subr.bf16.mxu0 %v827_v10  ;;  %802 = vmatprep.subr.bf16.mxu1 %v827_v10 }
  0x30   : > { %778 = vmatpush3.bf16.msra.mxu0 %v827_v10  ;;  %810 = vmatpush3.bf16.msra.mxu1 %v827_v10 }
  0x33   : > { %780 = vmatmul.mubr.bf16.vlgmr.msra.gmra.mxu0 %v829_v11  ;;  %788 = vmatmul.mubr.bf16.vlgmr.msra.gmra.mxu1 %v833_v12 }
  0x34   : > { %783 = vmatprep.mubr.bf16.mxu0 %v830_v13  ;;  %791 = vmatprep.mubr.bf16.mxu1 %v834_v14 }
  0x3b   : > { %784 = vmatmul.mubr.bf16.gmra.mxu0 %v831_v15  ;;  %792 = vmatmul.mubr.bf16.gmra.mxu1 %v835_v16 }
  0xf3   : > { %v781_v17 = vpop.f32.mrf.mxu0  ;;  %v789_v18 = vpop.f32.mrf.mxu1 }
  0xf4   : > { %v535_v34 = vmul.f32 %v781_v17, %v781_v17  ;;  %v543_v4 = vmul.f32 %v789_v18, %v789_v18 }
  0xf5   : > { %v365_v19 = vpop.f32.mrf.mxu0  ;;  %v397_v20 = vpop.f32.mrf.mxu1 }
  0xf6   : > { %v533_v25 = vmul.f32 %v365_v19, %v365_v19  ;;  %v541_v62 = vmul.f32 %v397_v20, %v397_v20 }
  0xf7   : > { %v782_v21 = vpop.f32.mrf.mxu0  ;;  %v790_v22 = vpop.f32.mrf.mxu1 }
  0xf8   : > { %v708_v23 = vpack.c.bf16 %v782_v21, %v781_v17  ;;  %v728_v24 = vpack.c.bf16 %v790_v22, %v789_v18  ;;  %v536_v39 = vmul.f32 %v782_v21, %v782_v21  ;;  %v544_v7 = vmul.f32 %v790_v22, %v790_v22 }
  0xf9   : > { %v368_v26 = vpop.f32.mrf.mxu0  ;;  %v400_v27 = vpop.f32.mrf.mxu1 }
  0xfa   : > { %740 = vst [vmem:[%s886_s24 + $0x8] sm:$0xff] %v708_v23   ;;  %v703_v28 = vpack.c.bf16 %v368_v26, %v365_v19  ;;  %v509_v29 = vadd.f32 %v368_v26, %v365_v19  ;;  %v534_v30 = vmul.f32 %v368_v26, %v368_v26  ;;  %744 = vst [vmem:[%s886_s24 + $0x28] sm:$0xff] %v728_v24  }
  0xfb   : > { %v723_v31 = vpack.c.bf16 %v400_v27, %v397_v20  ;;  %v785_v32 = vpop.f32.mrf.mxu0  ;;  %v793_v33 = vpop.f32.mrf.mxu1  ;;  %v542_v2 = vmul.f32 %v400_v27, %v400_v27 }
  0xfc   : > { %704 = vst [vmem:[%s886_s24] sm:$0xff] %v703_v28   ;;  %v510_v35 = vadd.f32 %v781_v17, %v509_v29  ;;  %v549_v36 = vadd.f32 %v534_v30, %v533_v25  ;;  %v539_v56 = vmul.f32 %v785_v32, %v785_v32  ;;  %v547_v16 = vmul.f32 %v793_v33, %v793_v33 }
  0xfd   : > { %743 = vst [vmem:[%s886_s24 + $0x20] sm:$0xff] %v723_v31   ;;  %v381_v37 = vpop.f32.mrf.mxu0  ;;  %v413_v38 = vpop.f32.mrf.mxu1 }
  0xfe   : > { %v550_v40 = vadd.f32 %v549_v36, %v535_v34  ;;  %v511_v41 = vadd.f32 %v782_v21, %v510_v35  ;;  %v537_v45 = vmul.f32 %v381_v37, %v381_v37  ;;  %v545_v11 = vmul.f32 %v413_v38, %v413_v38  ;;  %v532_v35 = vld [vmem:[%s953_s4] sm:$0x1] }
  0xff   : > { %v786_v42 = vpop.f32.mrf.mxu0  ;;  %v794_v43 = vpop.f32.mrf.mxu1 }
 0x100   : > { %v512_v44 = vadd.f32 %v511_v41, %v381_v37  ;;  %v551_v46 = vadd.f32 %v550_v40, %v536_v39  ;;  %v718_v47 = vpack.c.bf16 %v786_v42, %v785_v32  ;;  %v738_v49 = vpack.c.bf16 %v794_v43, %v793_v33 }
 0x101   : > { %v384_v48 = vpop.f32.mrf.mxu0  ;;  %v416_v50 = vpop.f32.mrf.mxu1  ;;  %v540_v59 = vmul.f32 %v786_v42, %v786_v42  ;;  %v548_v21 = vmul.f32 %v794_v43, %v794_v43 }
 0x102   : > { %v552_v51 = vadd.f32 %v551_v46, %v537_v45  ;;  %742 = vst [vmem:[%s886_s24 + $0x18] sm:$0xff] %v718_v47   ;;  %v713_v52 = vpack.c.bf16 %v384_v48, %v381_v37  ;;  %v513_v53 = vadd.f32 %v512_v44, %v384_v48  ;;  %v538_v54 = vmul.f32 %v384_v48, %v384_v48 }
 0x103   : > { %746 = vst [vmem:[%s886_s24 + $0x38] sm:$0xff] %v738_v49   ;;  %v733_v55 = vpack.c.bf16 %v416_v50, %v413_v38  ;;  %v546_v15 = vmul.f32 %v416_v50, %v416_v50 }
 0x104   : > { %741 = vst [vmem:[%s886_s24 + $0x10] sm:$0xff] %v713_v52   ;;  %v514_v57 = vadd.f32 %v785_v32, %v513_v53  ;;  %v553_v58 = vadd.f32 %v552_v51, %v538_v54  ;;  %v508_v32 = vld [vmem:[%s952_s3] sm:$0x1] }
 0x105   : > { %745 = vst [vmem:[%s886_s24 + $0x30] sm:$0xff] %v733_v55  }
 0x106   : > { %v515_v60 = vadd.f32 %v786_v42, %v514_v57  ;;  %v554_v61 = vadd.f32 %v553_v58, %v539_v56 }
 0x108   : > { %v555_v63 = vadd.f32 %v554_v61, %v540_v59  ;;  %v516_v0 = vadd.f32 %v515_v60, %v397_v20 }
 0x10a   : > { %v517_v1 = vadd.f32 %v516_v0, %v400_v27  ;;  %v556_v3 = vadd.f32 %v555_v63, %v541_v62 }
 0x10c   : > { %v518_v5 = vadd.f32 %v789_v18, %v517_v1  ;;  %v557_v6 = vadd.f32 %v556_v3, %v542_v2 }
 0x10e   : > { %v558_v8 = vadd.f32 %v557_v6, %v543_v4  ;;  %v519_v9 = vadd.f32 %v790_v22, %v518_v5 }
 0x110   : > { %v520_v10 = vadd.f32 %v519_v9, %v413_v38  ;;  %v559_v12 = vadd.f32 %v558_v8, %v544_v7 }
 0x112   : > { %v560_v13 = vadd.f32 %v559_v12, %v545_v11  ;;  %v521_v14 = vadd.f32 %v520_v10, %v416_v50 }
 0x114   : > { %v522_v17 = vadd.f32 %v793_v33, %v521_v14  ;;  %v561_v19 = vadd.f32 %v560_v13, %v546_v15 }
 0x116   : > { %v523_v20 = vadd.f32 %v794_v43, %v522_v17  ;;  %v562_v23 = vadd.f32 %v561_v19, %v547_v16 }
 0x118   : > { %v524_v24 = vrot.slane %v523_v20, 4  ;;  %v563_v25 = vadd.f32 %v562_v23, %v548_v21 }
 0x11a   : > { %v525_v26 = vadd.f32 %v524_v24, %v523_v20  ;;  %v564_v18 = vrot.slane %v563_v25, 4 }
 0x11c   : > { %v526_v27 = vrot.slane %v525_v26, 2  ;;  %v565_v28 = vadd.f32 %v564_v18, %v563_v25 }
 0x11e   : > { %v527_v29 = vadd.f32 %v526_v27, %v525_v26  ;;  %v566_v22 = vrot.slane %v565_v28, 2 }
 0x120   : > { %v528_v30 = vrot.slane %v527_v29, 1  ;;  %v567_v31 = vadd.f32 %v566_v22, %v565_v28 }
 0x122   : > { %v529_v34 = vadd.f32 %v528_v30, %v527_v29  ;;  %v568_v33 = vrot.slane %v567_v31, 1 }
 0x124   : > { %v530_v36 = vadd.f32 %v529_v34, %v508_v32  ;;  %v569_v37 = vadd.f32 %v568_v33, %v567_v31 }
 0x126   : > { %531 = vst [vmem:[%s952_s3] sm:$0x1] %v530_v36  ;;  %v570_v38 = vadd.f32 %v569_v37, %v532_v35 }
 0x128   : > { %571 = vst [vmem:[%s953_s4] sm:$0x1] %v570_v38 }
 0x129 PF: > { %s15_s15 = sadd.s32 1, %s842_s15  }
 0x12a   : > { %p12_p5 = scmp.ge.s32.totalorder %s15_s15, 6  }
 0x12c   :  { %14 = sbr.rel (!%p12_p5) target bundleno = 1 (0x1), region = 78 }

// kernel: bottleneck_block.4
= control target key start
LH: loop header
LB: loop body
LE: loop exit
PB: predicated region body
PF: predicated region fallthrough
CT: control target
= control target key end

     0   :  { %s4499_s15 = smov 0   ;;  %s5400_s0 = inlined_call_operand.vmem [shape: bf16[2,4,9,9,128], index: 0, kind: input, shape index: {}]   ;;  %s5401_s1 = inlined_call_operand.vmem [shape: bf16[1152,128], index: 1, kind: input, shape index: {}]   ;;  %s5402_s2 = inlined_call_operand.vmem [shape: bf16[2,64,128], index: 2, kind: output, shape index: {0}]   ;;  %s5403_s3 = inlined_call_operand.vmem [shape: f32[1,128], index: 3, kind: output, shape index: {1}]   ;;  %s5404_s4 = inlined_call_operand.vmem [shape: f32[1,128], index: 4, kind: output, shape index: {2}]  }
   0x1 LB: > { %s3432_s16 = sadd.s32 4294967295, %s4469_s15   ;;  %p3436_p0 = scmp.ge.s32.totalorder %s4469_s15, 1  ;;  %s4469_s15 = sphi %s4499_s15, %s15_s15  }
   0x2   : > { %p157_p1 = scmp.lt.s32.totalorder %s4469_s15, 3 }
   0x4   : > { %p158_p2 = pnand %p3436_p0, %p157_p1 }
   0x5   : > { %p183_p3 = scmp.lt.s32.totalorder (!%p158_p2), %s3432_s16, 1  ;;  %p3440_p4 = scmp.ne.s32.totalorder (!%p158_p2), %s3432_s16, 0 }
   0x6   : > { %161 = sbr.rel (%p158_p2) target bundleno = 495 (0x1ef), region = 28 }
   0xb   : > { %s184_s17 = scalar_select %p183_p3, %s3432_s16, 1 }
   0xc   : > { %197 = sbr.rel (%p3440_p4) target bundleno = 19 (0x13), region = 32 }
   0xd   : > { %s4205_s18 = smul.u32 288, %s184_s17  ;;  %s3778_s19 = sshll.u32 %s184_s17, 5 }
   0xe   : > { %s4510_s22 = scalar_lea.vmem %s5402_s2, %s3778_s19 }
   0xf   : > { %s4515_s25 = scalar_lea.vmem %s5400_s0, %s4205_s18 }
  0x11   : > { %v4471_v0 = vmov 0.0  }
  0x12   : > { %198 = vst [vmem:[%s5403_s3] sm:$0x1] %v4471_v0  ;;  %199 = vst [vmem:[%s5404_s4] sm:$0x1] %v4471_v0 }
  0x13 PF: > { %v4217_v1 = vld [vmem:[%s5401_s1 + $0x78] sm:$0xff]   ;;  %v4221_v5 = vld [vmem:[%s5401_s1 + $0x70] sm:$0xff]   ;;  %v4225_v9 = vld [vmem:[%s5401_s1 + $0x68] sm:$0xff]   ;;  %vm210_vm0 = vsmask.f32 3328  ;;  %vm4473_vm3 = vmmov 0  }
  0x14   : > { %v4218_v2 = vld [vmem:[%s5401_s1 + $0xf8] sm:$0xff]   ;;  %3804 = vmatprep.subr.bf16.mxu0 %v4217_v1  ;;  %v4222_v6 = vld [vmem:[%s5401_s1 + $0xf0] sm:$0xff]   ;;  %v4226_v10 = vld [vmem:[%s5401_s1 + $0xe8] sm:$0xff]   ;;  %vm211_vm1 = vsmask.f32 7440 }
  0x15   : > { %v4219_v3 = vld [vmem:[%s5401_s1 + $0x38] sm:$0xff]   ;;  %3832 = vmatprep.subr.bf16.mxu1 %v4218_v2  ;;  %v4223_v7 = vld [vmem:[%s5401_s1 + $0x30] sm:$0xff]   ;;  %v4227_v11 = vld [vmem:[%s5401_s1 + $0x28] sm:$0xff]  }
  0x16   : > { %v4220_v4 = vld [vmem:[%s5401_s1 + $0xb8] sm:$0xff]   ;;  %3805 = vmatpush3.bf16.msra.mxu0 %v4219_v3  ;;  %v4224_v8 = vld [vmem:[%s5401_s1 + $0xb0] sm:$0xff]   ;;  %v4228_v12 = vld [vmem:[%s5401_s1 + $0xa8] sm:$0xff]  }
  0x17   : > { %3833 = vmatpush3.bf16.msra.mxu1 %v4220_v4  ;;  %3806 = vmatprep.subr.bf16.mxu0 %v4221_v5  ;;  %v4229_v13 = vld [vmem:[%s5401_s1 + $0x60] sm:$0xff]   ;;  %v4233_v17 = vld [vmem:[%s5401_s1 + $0x58] sm:$0xff]   ;;  %v4237_v21 = vld [vmem:[%s5401_s1 + $0x50] sm:$0xff]  }
  0x18   : > { %3834 = vmatprep.subr.bf16.mxu1 %v4222_v6  ;;  %v4230_v14 = vld [vmem:[%s5401_s1 + $0xe0] sm:$0xff]   ;;  %v4234_v18 = vld [vmem:[%s5401_s1 + $0xd8] sm:$0xff]   ;;  %v4238_v22 = vld [vmem:[%s5401_s1 + $0xd0] sm:$0xff]  }
  0x19   : > { %v4231_v15 = vld [vmem:[%s5401_s1 + $0x20] sm:$0xff]   ;;  %v4235_v19 = vld [vmem:[%s5401_s1 + $0x18] sm:$0xff]   ;;  %v4239_v23 = vld [vmem:[%s5401_s1 + $0x10] sm:$0xff]  }
  0x1a   : > { %3807 = vmatpush3.bf16.msra.mxu0 %v4223_v7  ;;  %v4232_v16 = vld [vmem:[%s5401_s1 + $0xa0] sm:$0xff]   ;;  %v4236_v20 = vld [vmem:[%s5401_s1 + $0x98] sm:$0xff]   ;;  %v4240_v24 = vld [vmem:[%s5401_s1 + $0x90] sm:$0xff]  }
  0x1b   : > { %3835 = vmatpush3.bf16.msra.mxu1 %v4224_v8  ;;  %3808 = vmatprep.subr.bf16.mxu0 %v4225_v9  ;;  %v4241_v25 = vld [vmem:[%s5401_s1 + $0x48] sm:$0xff]   ;;  %v4245_v29 = vld [vmem:[%s5401_s1 + $0x40] sm:$0xff]   ;;  %v4621_v34 = vld [vmem:[%s4515_s25 + $0x90] sm:$0xf] }
  0x1c   : > { %3836 = vmatprep.subr.bf16.mxu1 %v4226_v10  ;;  %v4242_v26 = vld [vmem:[%s5401_s1 + $0xc8] sm:$0xff]   ;;  %v4246_v30 = vld [vmem:[%s5401_s1 + $0xc0] sm:$0xff]   ;;  %v4624_v35 = vld [vmem:[%s4515_s25 + $0x98] sm:$0xf]  ;;  %v267_v10 = vshrl.u32 %v4621_v34, 16 }
  0x1d   : > { %v4243_v27 = vld [vmem:[%s5401_s1 + $0x8] sm:$0xff]   ;;  %v4247_v31 = vld [vmem:[%s5401_s1] sm:$0xff]   ;;  %v3468_v38 = vcombine.low %v4621_v34, %v4624_v35  ;;  %v4252_v42 = vld [vmem:[%s5401_s1 + $0x178] sm:$0xff]  }
  0x1e   : > { %3809 = vmatpush3.bf16.msra.mxu0 %v4227_v11  ;;  %v4244_v28 = vld [vmem:[%s5401_s1 + $0x88] sm:$0xff]   ;;  %v4248_v32 = vld [vmem:[%s5401_s1 + $0x80] sm:$0xff]   ;;  %vm4635_vm2 = vmor %vm210_vm0, %vm211_vm1 }
  0x1f   : > { %3837 = vmatpush3.bf16.msra.mxu1 %v4228_v12  ;;  %3810 = vmatprep.subr.bf16.mxu0 %v4229_v13  ;;  %v4249_v33 = vld [vmem:[%s4515_s25 + $0x48] ss:$8 sps:$4 sm:$0xff]   ;;  %v200_v36 = vld [vmem:[%s4515_s25] sm:$0xf]  ;;  %v207_v43 = vld [vmem:[%s4515_s25 + $0x4] sm:$0x1] }
  0x20   : > { %3838 = vmatprep.subr.bf16.mxu1 %v4230_v14  ;;  %1050 = vmatprep.mubr.bf16.mxu0 %v4249_v33  ;;  %v201_v37 = vld [vmem:[%s4515_s25 + $0x8] sm:$0xf]  ;;  %v214_v39 = vshrl.u32 %v200_v36, 16  ;;  %v217_v40 = vshll.u32 %v200_v36, 16  ;;  %v208_v44 = vld [vmem:[%s4515_s25 + $0xc] sm:$0x1] }
  0x21   : > { %v228_v41 = vshrl.u32 %v201_v37, 16  ;;  %1098 = vmatprep.mubr.bf16.mxu1 %v3468_v38  ;;  %v231_v48 = vshll.u32 %v201_v37, 16  ;;  %v3462_v49 = vcombine.low %v200_v36, %v201_v37  ;;  %v223_v52 = vshll.u32 %v207_v43, 16  ;;  %v4253_v55 = vld [vmem:[%s5401_s1 + $0x1f8] sm:$0xff]   ;;  %v4256_v61 = vld [vmem:[%s5401_s1 + $0x170] sm:$0xff]   ;;  %v4260_v5 = vld [vmem:[%s5401_s1 + $0x168] sm:$0xff]  }
  0x22   : > { %3811 = vmatpush3.bf16.msra.mxu0 %v4231_v15  ;;  %v216_v45 = vrot.slane %v214_v39, 4  ;;  %v219_v46 = vrot.slane %v217_v40, 5  ;;  %v237_v54 = vshll.u32 %v208_v44, 16  ;;  %v4254_v59 = vld [vmem:[%s5401_s1 + $0x138] sm:$0xff]   ;;  %v4258_v2 = vld [vmem:[%s5401_s1 + $0x130] sm:$0xff]   ;;  %v4262_v7 = vld [vmem:[%s5401_s1 + $0x128] sm:$0xff]  }
  0x23   : > { %3839 = vmatpush3.bf16.msra.mxu1 %v4232_v16  ;;  %3812 = vmatprep.subr.bf16.mxu0 %v4233_v17  ;;  %v230_v47 = vrot.slane %v228_v41, 4  ;;  %v233_v50 = vrot.slane %v231_v48, 5  ;;  %v225_v57 = vrot.slane %v223_v52, 5  ;;  %v4255_v0 = vld [vmem:[%s5401_s1 + $0x1b8] sm:$0xff]   ;;  %v4257_v4 = vld [vmem:[%s5401_s1 + $0x1f0] sm:$0xff]   ;;  %v4261_v8 = vld [vmem:[%s5401_s1 + $0x1e8] sm:$0xff]  }
  0x24   : > { %3840 = vmatprep.subr.bf16.mxu1 %v4234_v18  ;;  %v220_v51 = vor.u32 %v219_v46, %v216_v45  ;;  %v239_v60 = vrot.slane %v237_v54, 5  ;;  %v4259_v6 = vld [vmem:[%s5401_s1 + $0x1b0] sm:$0xff]   ;;  %v4264_v9 = vld [vmem:[%s5401_s1 + $0x160] sm:$0xff]   ;;  %v4263_v11 = vld [vmem:[%s5401_s1 + $0x1a8] sm:$0xff]   ;;  %v270_v12 = vshll.u32 %v4621_v34, 16  ;;  %v281_v14 = vshrl.u32 %v4624_v35, 16 }
  0x25   : > { %v234_v58 = vor.u32 %v233_v50, %v230_v47  ;;  %v4266_v13 = vld [vmem:[%s5401_s1 + $0x120] sm:$0xff]   ;;  %v284_v16 = vshll.u32 %v4624_v35, 16  ;;  %v4268_v17 = vld [vmem:[%s5401_s1 + $0x158] sm:$0xff]   ;;  %v269_v18 = vrot.slane %v267_v10, 4  ;;  %v4275_v33 = vld [vmem:[%s5401_s1 + $0x1d0] sm:$0xff]  }
  0x26   : > { %3813 = vmatpush3.bf16.msra.mxu0 %v4235_v19  ;;  %v221_v56 = vrot.slane %v220_v51, 4  ;;  %v4265_v15 = vld [vmem:[%s5401_s1 + $0x1e0] sm:$0xff]   ;;  %v4276_v34 = vld [vmem:[%s5401_s1 + $0x110] sm:$0xff]   ;;  %v4280_v44 = vld [vmem:[%s5401_s1 + $0x1c8] sm:$0xff]  }
  0x27   : > { %3841 = vmatpush3.bf16.msra.mxu1 %v4236_v20  ;;  %3814 = vmatprep.subr.bf16.mxu0 %v4237_v21  ;;  %v235_v63 = vrot.slane %v234_v58, 4  ;;  %v4267_v19 = vld [vmem:[%s5401_s1 + $0x1a0] sm:$0xff]   ;;  %v272_v20 = vrot.slane %v270_v12, 5  ;;  %v4270_v21 = vld [vmem:[%s5401_s1 + $0x118] sm:$0xff]   ;;  %v286_v36 = vrot.slane %v284_v16, 5  ;;  %v4277_v37 = vld [vmem:[%s5401_s1 + $0x190] sm:$0xff]  }
  0x28   : > { %3842 = vmatprep.subr.bf16.mxu1 %v4238_v22  ;;  %v226_v62 = vsel %vm4635_vm2, %v221_v56, %v225_v57  ;;  %v283_v22 = vrot.slane %v281_v14, 4  ;;  %v3446_v35 = vld [vmem:[%s4515_s25 + $0xa0] sm:$0xf]  ;;  %v209_v39 = vld [vmem:[%s4515_s25 + $0x14] sm:$0x1]  ;;  %v4281_v47 = vld [vmem:[%s5401_s1 + $0x108] sm:$0xff]  }
  0x29   : > { %v240_v1 = vsel %vm4635_vm2, %v235_v63, %v239_v60  ;;  %v3469_v38 = vcombine.low %v3446_v35, %v3446_v35  ;;  %v251_v41 = vshll.u32 %v209_v39, 16  ;;  %v273_v45 = vor.u32 %v272_v20, %v269_v18  ;;  %v4283_v52 = vld [vmem:[%s5401_s1 + $0x140] sm:$0xff]   ;;  %v4290_v10 = vld [vmem:[%s5401_s1 + $0x78] sm:$0xff]   ;;  %v4762_v12 = vld [vmem:[%s4515_s25 + $0x10] sm:$0xf] }
  0x2a   : > { %3815 = vmatpush3.bf16.msra.mxu0 %v4239_v23  ;;  %v3466_v3 = vcombine.low %v226_v62, %v240_v1  ;;  %v4269_v23 = vld [vmem:[%s5401_s1 + $0x1d8] sm:$0xff]   ;;  %v287_v48 = vor.u32 %v286_v36, %v283_v22  ;;  %v295_v50 = vshrl.u32 %v3446_v35, 16  ;;  %v298_v54 = vshll.u32 %v3446_v35, 16  ;;  %v4284_v56 = vld [vmem:[%s5401_s1 + $0x1c0] sm:$0xff]   ;;  %v4294_v18 = vld [vmem:[%s5401_s1 + $0x70] sm:$0xff]  }
  0x2b   : > { %3843 = vmatpush3.bf16.msra.mxu1 %v4240_v24  ;;  %3816 = vmatprep.subr.bf16.mxu0 %v4241_v25  ;;  %v4272_v24 = vld [vmem:[%s4515_s25 + $0x58] ss:$0 sps:$4 sm:$0xff]   ;;  %v202_v25 = vld [vmem:[%s4515_s25 + $0x10] sm:$0xf]  ;;  %v253_v46 = vrot.slane %v251_v41, 5  ;;  %v274_v57 = vrot.slane %v273_v45, 4 }
  0x2c   : > { %3844 = vmatprep.subr.bf16.mxu1 %v4242_v26  ;;  %v4271_v26 = vld [vmem:[%s5401_s1 + $0x198] sm:$0xff]   ;;  %v4285_v58 = vld [vmem:[%s5401_s1 + $0x100] sm:$0xff]   ;;  %v297_v63 = vrot.slane %v295_v50, 4  ;;  %v4295_v20 = vld [vmem:[%s5401_s1 + $0x30] sm:$0xff]  }
  0x2d   : > { %v4286_v60 = vld [vmem:[%s5401_s1 + $0x180] sm:$0xff]   ;;  %v3451_v62 = vld [vmem:[%s4515_s25 + $0x9c] sm:$0x1]  ;;  %v4308_v50 = vld [vmem:[%s5401_s1 + $0x210] sm:$0xff]  }
  0x2e   : > { %3817 = vmatpush3.bf16.msra.mxu0 %v4243_v27  ;;  %v242_v27 = vshrl.u32 %v202_v25, 16  ;;  %v4303_v41 = vld [vmem:[%s5401_s1 + $0x60] sm:$0xff]   ;;  %v4305_v45 = vld [vmem:[%s5401_s1 + $0x218] sm:$0xff]  }
  0x2f   : > { %3845 = vmatpush3.bf16.msra.mxu1 %v4244_v28  ;;  %3818 = vmatprep.subr.bf16.mxu0 %v4245_v29  ;;  %v245_v28 = vshll.u32 %v202_v25, 16  ;;  %v3463_v29 = vcombine.low %v202_v25, %v202_v25  ;;  %v4297_v25 = vld [vmem:[%s5401_s1 + $0x228] sm:$0xff]  }
  0x30   : > { %3846 = vmatprep.subr.bf16.mxu1 %v4246_v30  ;;  %v4274_v30 = vld [vmem:[%s5401_s1 + $0x150] sm:$0xff]  }
  0x32   : > { %3819 = vmatpush3.bf16.msra.mxu0 %v4247_v31  ;;  %v244_v31 = vrot.slane %v242_v27, 4 }
  0x33   : > { %3847 = vmatpush3.bf16.msra.mxu1 %v4248_v32  ;;  %3860 = vmatprep.subr.bf16.mxu0 %v4252_v42  ;;  %v247_v32 = vrot.slane %v245_v28, 5  ;;  %v4279_v42 = vld [vmem:[%s5401_s1 + $0x148] sm:$0xff]  }
  0x34   : > { %3888 = vmatprep.subr.bf16.mxu1 %v4253_v55 }
  0x35   : > { %1051 = vmatmul.mubr.bf16.vlgmr.msra.gmra.mxu0 %v3462_v49  ;;  %v248_v40 = vor.u32 %v247_v32, %v244_v31  ;;  %v4282_v49 = vld [vmem:[%s5401_s1 + $0x188] sm:$0xff]   ;;  %v3455_v32 = vld [vmem:[%s4515_s25 + $0x18] sm:$0xf] }
  0x36   : > { %3861 = vmatpush3.bf16.msra.mxu0 %v4254_v59  ;;  %1099 = vmatmul.mubr.bf16.vlgmr.msra.gmra.mxu1 %v3466_v3  ;;  %v288_v59 = vrot.slane %v287_v48, 4  ;;  %v4288_v3 = vld [vmem:[%s4515_s25 + $0x50] ss:$8 sps:$4 sm:$0xff]   ;;  %v4300_v31 = vld [vmem:[%s5401_s1 + $0x28] sm:$0xff]   ;;  %v351_v35 = vshll.u32 %v3455_v32, 16  ;;  %v3475_v36 = vcombine.low %v3455_v32, %v3455_v32 }
  0x37   : > { %3862 = vmatprep.subr.bf16.mxu0 %v4256_v61  ;;  %3889 = vmatpush3.bf16.msra.mxu1 %v4255_v0  ;;  %v249_v43 = vrot.slane %v248_v40, 4  ;;  %v3450_v61 = vld [vmem:[%s4515_s25 + $0x94] sm:$0x1]  ;;  %v300_v0 = vrot.slane %v298_v54, 5  ;;  %v4307_v48 = vld [vmem:[%s5401_s1 + $0x18] sm:$0xff]  }
  0x38   : > { %3890 = vmatprep.subr.bf16.mxu1 %v4257_v4  ;;  %1058 = vmatprep.mubr.bf16.mxu0 %v4272_v24  ;;  %v276_v1 = vshll.u32 %v3450_v61, 16 }
  0x39   : > { %1106 = vmatprep.mubr.bf16.mxu1 %v3469_v38  ;;  %v254_v51 = vsel %vm4635_vm2, %v249_v43, %v253_v46  ;;  %v301_v16 = vor.u32 %v300_v0, %v297_v63  ;;  %v4302_v38 = vld [vmem:[%s5401_s1 + $0x220] sm:$0xff]   ;;  %v334_v43 = vshrl.u32 %v4762_v12, 16  ;;  %v4306_v46 = vld [vmem:[%s5401_s1 + $0x58] sm:$0xff]  }
  0x3a   : > { %3863 = vmatpush3.bf16.msra.mxu0 %v4258_v2  ;;  %v3467_v55 = vcombine.low %v254_v51, %v254_v51  ;;  %v290_v2 = vshll.u32 %v3451_v62, 16  ;;  %v278_v4 = vrot.slane %v276_v1, 5  ;;  %v4314_v63 = vld [vmem:[%s5401_s1 + $0x200] sm:$0xff]   ;;  %v3459_v1 = vld [vmem:[%s4515_s25 + $0xc] sm:$0x1] }
  0x3b   : > { %3864 = vmatprep.subr.bf16.mxu0 %v4260_v5  ;;  %3891 = vmatpush3.bf16.msra.mxu1 %v4259_v6  ;;  %v4287_v6 = vld [vmem:[%s4515_s25 + $0xd8] ss:$8 sps:$4 sm:$0xff]   ;;  %v302_v22 = vrot.slane %v301_v16, 4 }
  0x3c   : > { %3892 = vmatprep.subr.bf16.mxu1 %v4261_v8  ;;  %v292_v5 = vrot.slane %v290_v2, 5  ;;  %v279_v8 = vsel %vm4635_vm2, %v274_v57, %v278_v4  ;;  %v4312_v57 = vld [vmem:[%s5401_s1 + $0x48] sm:$0xff]   ;;  %v4315_v0 = vld [vmem:[%s5401_s1 + $0x40] sm:$0xff]   ;;  %v3460_v2 = vld [vmem:[%s4515_s25 + $0x14] sm:$0x1]  ;;  %v329_v4 = vshll.u32 %v3459_v1, 16 }
  0x3d   : > { %1059 = vmatmul.mubr.bf16.gmra.mxu0 %v3463_v29  ;;  %v4296_v29 = vld [vmem:[%s4515_s25 + $0xe8] ss:$0 sps:$4 sm:$0xff]  }
  0x3e   : > { %3865 = vmatpush3.bf16.msra.mxu0 %v4262_v7  ;;  %1107 = vmatmul.mubr.bf16.gmra.mxu1 %v3467_v55  ;;  %v4289_v7 = vld [vmem:[%s5401_s1 + $0x238] sm:$0xff]  }
  0x3f   : > { %3866 = vmatprep.subr.bf16.mxu0 %v4264_v9  ;;  %3893 = vmatpush3.bf16.msra.mxu1 %v4263_v11  ;;  %v293_v9 = vsel %vm4635_vm2, %v288_v59, %v292_v5  ;;  %v3453_v11 = vld [vmem:[%s4515_s25 + $0x8] sm:$0xf]  ;;  %v343_v5 = vshll.u32 %v3460_v2, 16 }
  0x40   : > { %3894 = vmatprep.subr.bf16.mxu1 %v4265_v15  ;;  %1194 = vmatprep.mubr.bf16.mxu1 %v4288_v3  ;;  %v3474_v14 = vcombine.low %v3453_v11, %v4762_v12  ;;  %v4292_v15 = vld [vmem:[%s5401_s1 + $0x38] sm:$0xff]   ;;  %v4311_v59 = vld [vmem:[%s5401_s1 + $0x208] sm:$0xff]  }
  0x42   : > { %3867 = vmatpush3.bf16.msra.mxu0 %v4266_v13  ;;  %v3472_v13 = vcombine.low %v279_v8, %v293_v9  ;;  %v4317_v9 = vld [vmem:[%s4515_s25 + $0x60] ss:$8 sps:$4 sm:$0xff]  }
  0x43   : > { %3868 = vmatprep.subr.bf16.mxu0 %v4268_v17  ;;  %3895 = vmatpush3.bf16.msra.mxu1 %v4267_v19  ;;  %v4293_v17 = vld [vmem:[%s5401_s1 + $0x230] sm:$0xff]   ;;  %v320_v19 = vshrl.u32 %v3453_v11, 16 }
  0x44   : > { %3896 = vmatprep.subr.bf16.mxu1 %v4269_v23  ;;  %1146 = vmatprep.mubr.bf16.mxu0 %v3472_v13  ;;  %v323_v23 = vshll.u32 %v3453_v11, 16  ;;  %v345_v11 = vrot.slane %v343_v5, 5 }
  0x45   : > { %v322_v27 = vrot.slane %v320_v19, 4 }
  0x46   : > { %3869 = vmatpush3.bf16.msra.mxu0 %v4270_v21  ;;  %v3452_v21 = vld [vmem:[%s4515_s25 + $0xa4] sm:$0x1]  ;;  %v325_v39 = vrot.slane %v323_v23, 5 }
  0x47   : > { %3870 = vmatprep.subr.bf16.mxu0 %v4274_v30  ;;  %3897 = vmatpush3.bf16.msra.mxu1 %v4271_v26  ;;  %v304_v24 = vshll.u32 %v3452_v21, 16  ;;  %v4298_v26 = vld [vmem:[%s5401_s1 + $0x68] sm:$0xff]   ;;  %v4299_v30 = vld [vmem:[%s4515_s25 + $0x60] ss:$0 sps:$4 sm:$0xff]  }
  0x48   : > { %3898 = vmatprep.subr.bf16.mxu1 %v4275_v33  ;;  %v326_v54 = vor.u32 %v325_v39, %v322_v27  ;;  %v4325_v27 = vld [vmem:[%s5401_s1 + $0xb0] sm:$0xff]   ;;  %v4335_v39 = vld [vmem:[%s5401_s1 + $0xd8] sm:$0xff]  }
  0x49   : > { %v306_v28 = vrot.slane %v304_v24, 5  ;;  %v4322_v24 = vld [vmem:[%s5401_s1 + $0x138] sm:$0xff]  }
  0x4a   : > { %3871 = vmatpush3.bf16.msra.mxu0 %v4276_v34  ;;  %v348_v34 = vshrl.u32 %v3455_v32, 16  ;;  %v327_v61 = vrot.slane %v326_v54, 4  ;;  %v4330_v32 = vld [vmem:[%s5401_s1 + $0x128] sm:$0xff]   ;;  %v4343_v54 = vld [vmem:[%s4515_s25 + $0x70] ss:$0 sps:$4 sm:$0xff]  }
  0x4b   : > { %3872 = vmatprep.subr.bf16.mxu0 %v4279_v42  ;;  %3899 = vmatpush3.bf16.msra.mxu1 %v4277_v37  ;;  %v307_v33 = vsel %vm4635_vm2, %v302_v22, %v306_v28  ;;  %v4304_v42 = vld [vmem:[%s5401_s1 + $0x20] sm:$0xff]   ;;  %v4321_v22 = vld [vmem:[%s5401_s1 + $0xb8] sm:$0xff]   ;;  %v4326_v28 = vld [vmem:[%s5401_s1 + $0x130] sm:$0xff]  }
  0x4c   : > { %3900 = vmatprep.subr.bf16.mxu1 %v4280_v44  ;;  %v3473_v37 = vcombine.low %v307_v33, %v307_v33  ;;  %v350_v40 = vrot.slane %v348_v34, 4  ;;  %v353_v44 = vrot.slane %v351_v35, 5  ;;  %v4331_v33 = vld [vmem:[%s5401_s1 + $0xe0] sm:$0xff]  }
  0x4d   : > { %v4332_v34 = vld [vmem:[%s5401_s1 + $0x160] sm:$0xff]  }
  0x4e   : > { %3873 = vmatpush3.bf16.msra.mxu0 %v4281_v47  ;;  %v337_v47 = vshll.u32 %v4762_v12, 16  ;;  %v354_v55 = vor.u32 %v353_v44, %v350_v40  ;;  %v4318_v12 = vld [vmem:[%s5401_s1 + $0xf8] sm:$0xff]   ;;  %v4333_v35 = vld [vmem:[%s5401_s1 + $0xa0] sm:$0xff]  }
  0x4f   : > { %3874 = vmatprep.subr.bf16.mxu0 %v4283_v52  ;;  %3901 = vmatpush3.bf16.msra.mxu1 %v4282_v49  ;;  %v336_v49 = vrot.slane %v334_v43, 4  ;;  %v4309_v52 = vld [vmem:[%s5401_s1 + $0x50] sm:$0xff]   ;;  %v4337_v43 = vld [vmem:[%s5401_s1 + $0x98] sm:$0xff]  }
  0x50   : > { %3902 = vmatprep.subr.bf16.mxu1 %v4284_v56  ;;  %v339_v51 = vrot.slane %v337_v47, 5  ;;  %v4310_v56 = vld [vmem:[%s5401_s1 + $0x10] sm:$0xff]   ;;  %v355_v62 = vrot.slane %v354_v55, 4  ;;  %v4344_v55 = vld [vmem:[%s5401_s1 + $0xc8] sm:$0xff]  }
  0x51   : > { %v4339_v47 = vld [vmem:[%s5401_s1 + $0xd0] sm:$0xff]  }
  0x52   : > { %3875 = vmatpush3.bf16.msra.mxu0 %v4285_v58  ;;  %v340_v58 = vor.u32 %v339_v51, %v336_v49  ;;  %v4340_v49 = vld [vmem:[%s5401_s1 + $0x150] sm:$0xff]  }
  0x53   : > { %3903 = vmatpush3.bf16.msra.mxu1 %v4286_v60  ;;  %4145 = vmatprep.subr.bf16.mxu0 %v4289_v7  ;;  %v4313_v60 = vld [vmem:[%s5401_s1 + $0x8] sm:$0xff]   ;;  %v4341_v51 = vld [vmem:[%s5401_s1 + $0x90] sm:$0xff]  }
  0x54   : > { %3926 = vmatprep.subr.bf16.mxu1 %v4290_v10  ;;  %v341_v3 = vrot.slane %v340_v58, 4  ;;  %v331_v10 = vrot.slane %v329_v4, 5  ;;  %v4345_v58 = vld [vmem:[%s5401_s1 + $0x148] sm:$0xff]   ;;  %v4351_v4 = vld [vmem:[%s5401_s1 + $0x80] sm:$0xff]  }
  0x55   : > { %1147 = vmatmul.mubr.bf16.vlgmr.msra.gmra.mxu0 %v4287_v6  ;;  %v3461_v6 = vld [vmem:[%s4515_s25 + $0x1c] sm:$0x1] }
  0x56   : > { %1195 = vmatmul.mubr.bf16.vlgmr.msra.gmra.mxu1 %v3474_v14  ;;  %4146 = vmatpush3.bf16.msra.mxu0 %v4289_v7  ;;  %v4316_v7 = vld [vmem:[%s5401_s1] sm:$0xff]   ;;  %v357_v8 = vshll.u32 %v3461_v6, 16  ;;  %v4319_v14 = vld [vmem:[%s5401_s1 + $0x178] sm:$0xff]   ;;  %v346_v16 = vsel %vm4635_vm2, %v341_v3, %v345_v11 }
  0x57   : > { %3927 = vmatpush3.bf16.msra.mxu1 %v4292_v15  ;;  %4147 = vmatprep.subr.bf16.mxu0 %v4293_v17  ;;  %v332_v15 = vsel %vm4635_vm2, %v327_v61, %v331_v10  ;;  %v4347_v61 = vld [vmem:[%s5401_s1 + $0x88] sm:$0xff]   ;;  %v4352_v6 = vld [vmem:[%s5401_s1 + $0x100] sm:$0xff]   ;;  %v3561_v11 = vld [vmem:[%s4515_s25 + $0x1c] sm:$0x1] }
  0x58   : > { %3928 = vmatprep.subr.bf16.mxu1 %v4294_v18  ;;  %1202 = vmatprep.mubr.bf16.mxu1 %v4299_v30  ;;  %v359_v13 = vrot.slane %v357_v8, 5  ;;  %v3556_v18 = vld [vmem:[%s4515_s25 + $0x20] sm:$0xf]  ;;  %v3478_v19 = vcombine.low %v332_v15, %v346_v16  ;;  %v4328_v30 = vld [vmem:[%s5401_s1 + $0x168] sm:$0xff]   ;;  %v3565_v8 = vld [vmem:[%s4515_s25 + $0xb0] sm:$0xf] }
  0x59   : > { %1154 = vmatprep.mubr.bf16.mxu0 %v3473_v37  ;;  %v4334_v37 = vld [vmem:[%s5401_s1 + $0x120] sm:$0xff]   ;;  %v1325_v40 = vshrl.u32 %v3556_v18, 16  ;;  %v1320_v16 = vshll.u32 %v3561_v11, 16 }
  0x5a   : > { %4148 = vmatpush3.bf16.msra.mxu0 %v4293_v17  ;;  %v3555_v17 = vld [vmem:[%s4515_s25 + $0x18] sm:$0xf]  ;;  %v3562_v15 = vld [vmem:[%s4515_s25 + $0x24] sm:$0x1] }
  0x5b   : > { %3929 = vmatpush3.bf16.msra.mxu1 %v4295_v20  ;;  %4149 = vmatprep.subr.bf16.mxu0 %v4297_v25  ;;  %v360_v20 = vsel %vm4635_vm2, %v355_v62, %v359_v13  ;;  %v3582_v21 = vcombine.low %v3555_v17, %v3556_v18  ;;  %v4348_v62 = vld [vmem:[%s5401_s1 + $0x108] sm:$0xff]   ;;  %v1381_v13 = vshll.u32 %v3565_v8, 16 }
  0x5c   : > { %3930 = vmatprep.subr.bf16.mxu1 %v4298_v26  ;;  %v3479_v23 = vcombine.low %v360_v20, %v360_v20  ;;  %v4324_v26 = vld [vmem:[%s5401_s1 + $0x170] sm:$0xff]   ;;  %v1334_v20 = vshll.u32 %v3562_v15, 16 }
  0x5d   : > { %1155 = vmatmul.mubr.bf16.gmra.mxu0 %v4296_v29  ;;  %v4327_v29 = vld [vmem:[%s5401_s1 + $0xe8] sm:$0xff]  }
  0x5e   : > { %4150 = vmatpush3.bf16.msra.mxu0 %v4297_v25  ;;  %1203 = vmatmul.mubr.bf16.gmra.mxu1 %v3475_v36  ;;  %v4323_v25 = vld [vmem:[%s5401_s1 + $0xf0] sm:$0xff]   ;;  %v1311_v36 = vshrl.u32 %v3555_v17, 16 }
  0x5f   : > { %3931 = vmatpush3.bf16.msra.mxu1 %v4300_v31  ;;  %4151 = vmatprep.subr.bf16.mxu0 %v4302_v38  ;;  %v4329_v31 = vld [vmem:[%s5401_s1 + $0xa8] sm:$0xff]  }
  0x60   : > { %3932 = vmatprep.subr.bf16.mxu1 %v4303_v41  ;;  %2147 = vmatprep.mubr.bf16.mxu1 %v4317_v9  ;;  %v4336_v41 = vld [vmem:[%s5401_s1 + $0x158] sm:$0xff]   ;;  %v1313_v44 = vrot.slane %v1311_v36, 4 }
  0x61   : > { %4161 = vmatprep.mubr.bf16.mxu0 %v3478_v19 }
  0x62   : > { %4152 = vmatpush3.bf16.msra.mxu0 %v4302_v38  ;;  %v1314_v38 = vshll.u32 %v3555_v17, 16  ;;  %v4354_v17 = vld [vmem:[%s5401_s1 + $0x1f8] sm:$0xff]  }
  0x63   : > { %3933 = vmatpush3.bf16.msra.mxu1 %v4304_v42  ;;  %4153 = vmatprep.subr.bf16.mxu0 %v4305_v45  ;;  %v1328_v42 = vshll.u32 %v3556_v18, 16 }
  0x64   : > { %3934 = vmatprep.subr.bf16.mxu1 %v4306_v46  ;;  %v1316_v46 = vrot.slane %v1314_v38, 5 }
  0x66   : > { %4154 = vmatpush3.bf16.msra.mxu0 %v4305_v45  ;;  %v4338_v45 = vld [vmem:[%s5401_s1 + $0x118] sm:$0xff]  }
  0x67   : > { %3935 = vmatpush3.bf16.msra.mxu1 %v4307_v48  ;;  %4155 = vmatprep.subr.bf16.mxu0 %v4308_v50  ;;  %v1327_v48 = vrot.slane %v1325_v40, 4  ;;  %v4356_v40 = vld [vmem:[%s4515_s25 + $0xf0] ss:$8 sps:$4 sm:$0xff]  }
  0x68   : > { %3936 = vmatprep.subr.bf16.mxu1 %v4309_v52  ;;  %v4342_v52 = vld [vmem:[%s5401_s1 + $0x110] sm:$0xff]  }
  0x6a   : > { %4156 = vmatpush3.bf16.msra.mxu0 %v4308_v50  ;;  %v1330_v50 = vrot.slane %v1328_v42, 5 }
  0x6b   : > { %3937 = vmatpush3.bf16.msra.mxu1 %v4310_v56  ;;  %4157 = vmatprep.subr.bf16.mxu0 %v4311_v59  ;;  %v1317_v56 = vor.u32 %v1316_v46, %v1313_v44  ;;  %v4359_v44 = vld [vmem:[%s5401_s1 + $0x230] sm:$0xff]  }
  0x6c   : > { %3938 = vmatprep.subr.bf16.mxu1 %v4312_v57  ;;  %v1331_v57 = vor.u32 %v1330_v50, %v1327_v48  ;;  %v4360_v46 = vld [vmem:[%s5401_s1 + $0x1b0] sm:$0xff]   ;;  %v4362_v50 = vld [vmem:[%s5401_s1 + $0x228] sm:$0xff]  }
  0x6d   : > { %v1318_v1 = vrot.slane %v1317_v56, 4  ;;  %v3566_v56 = vld [vmem:[%s4515_s25 + $0xb8] sm:$0xf] }
  0x6e   : > { %4158 = vmatpush3.bf16.msra.mxu0 %v4311_v59  ;;  %v4931_v59 = vld [vmem:[%s4515_s25 + $0x28] sm:$0xf]  ;;  %v1332_v2 = vrot.slane %v1331_v57, 4  ;;  %v4366_v57 = vld [vmem:[%s5401_s1 + $0x1a0] sm:$0xff]  }
  0x6f   : > { %3939 = vmatpush3.bf16.msra.mxu1 %v4313_v60  ;;  %4159 = vmatprep.subr.bf16.mxu0 %v4314_v63  ;;  %v3583_v60 = vcombine.low %v4931_v59, %v4931_v59  ;;  %v1339_v3 = vshrl.u32 %v4931_v59, 16  ;;  %v1342_v5 = vshll.u32 %v4931_v59, 16  ;;  %v1395_v59 = vshll.u32 %v3566_v56, 16 }
  0x70   : > { %3940 = vmatprep.subr.bf16.mxu1 %v4315_v0  ;;  %v4350_v0 = vld [vmem:[%s5401_s1 + $0x140] sm:$0xff]  }
  0x71   : > { %v1341_v48 = vrot.slane %v1339_v3, 4  ;;  %v4370_v3 = vld [vmem:[%s5401_s1 + $0x198] sm:$0xff]  }
  0x72   : > { %4160 = vmatpush3.bf16.msra.mxu0 %v4314_v63  ;;  %v4349_v63 = vld [vmem:[%s5401_s1 + $0xc0] sm:$0xff]  }
  0x73   : > { %3941 = vmatpush3.bf16.msra.mxu1 %v4316_v7  ;;  %3954 = vmatprep.subr.bf16.mxu0 %v4318_v12  ;;  %v3564_v7 = vld [vmem:[%s4515_s25 + $0xa8] sm:$0xf]  ;;  %v1378_v12 = vshrl.u32 %v3565_v8, 16 }
  0x74   : > { %3982 = vmatprep.subr.bf16.mxu1 %v4319_v14  ;;  %v1364_v9 = vshrl.u32 %v3564_v7, 16  ;;  %v1367_v10 = vshll.u32 %v3564_v7, 16  ;;  %v3588_v14 = vcombine.low %v3564_v7, %v3565_v8  ;;  %v4369_v8 = vld [vmem:[%s5401_s1 + $0x218] sm:$0xff]  }
  0x75   : > { %4162 = vmatmul.mubr.bf16.vlgmr.msra.gmra.mxu0 %v3479_v23  ;;  %v1380_v23 = vrot.slane %v1378_v12, 4  ;;  %v4372_v12 = vld [vmem:[%s5401_s1 + $0x1d0] sm:$0xff]  }
  0x76   : > { %2148 = vmatmul.mubr.bf16.vlgmr.msra.gmra.mxu1 %v3582_v21  ;;  %3955 = vmatpush3.bf16.msra.mxu0 %v4321_v22  ;;  %v1366_v18 = vrot.slane %v1364_v9, 4  ;;  %v1369_v19 = vrot.slane %v1367_v10, 5  ;;  %v3570_v21 = vld [vmem:[%s4515_s25 + $0xac] sm:$0x1]  ;;  %v4355_v22 = vld [vmem:[%s5401_s1 + $0x238] sm:$0xff]  }
  0x77   : > { %3983 = vmatpush3.bf16.msra.mxu1 %v4322_v24  ;;  %3956 = vmatprep.subr.bf16.mxu0 %v4323_v25  ;;  %v1383_v24 = vrot.slane %v1381_v13, 5  ;;  %v1322_v25 = vrot.slane %v1320_v16, 5  ;;  %v4374_v16 = vld [vmem:[%s5401_s1 + $0x190] sm:$0xff]  }
  0x78   : > { %3984 = vmatprep.subr.bf16.mxu1 %v4324_v26  ;;  %2155 = vmatprep.mubr.bf16.mxu1 %v4343_v54  ;;  %v3571_v26 = vld [vmem:[%s4515_s25 + $0xb4] sm:$0x1] }
  0x79   : > { %2195 = vmatprep.mubr.bf16.mxu0 %v3588_v14  ;;  %v4371_v14 = vld [vmem:[%s4515_s25 + $0x100] ss:$0 sps:$4 sm:$0xff]  }
  0x7a   : > { %3957 = vmatpush3.bf16.msra.mxu0 %v4325_v27  ;;  %v1373_v27 = vshll.u32 %v3570_v21, 16  ;;  %v4377_v21 = vld [vmem:[%s5401_s1 + $0x188] sm:$0xff]  }
  0x7b   : > { %3985 = vmatpush3.bf16.msra.mxu1 %v4326_v28  ;;  %3958 = vmatprep.subr.bf16.mxu0 %v4327_v29  ;;  %v1336_v28 = vrot.slane %v1334_v20, 5  ;;  %v1370_v29 = vor.u32 %v1369_v19, %v1366_v18  ;;  %v4373_v18 = vld [vmem:[%s5401_s1 + $0x210] sm:$0xff]   ;;  %v4375_v19 = vld [vmem:[%s5401_s1 + $0x1c8] sm:$0xff]  }
  0x7c   : > { %3986 = vmatprep.subr.bf16.mxu1 %v4328_v30  ;;  %v1387_v30 = vshll.u32 %v3571_v26, 16  ;;  %v4376_v20 = vld [vmem:[%s5401_s1 + $0x208] sm:$0xff]  }
  0x7d   : > { %v1371_v36 = vrot.slane %v1370_v29, 4  ;;  %v3574_v26 = vld [vmem:[%s4515_s25 + $0x28] sm:$0xf] }
  0x7e   : > { %3959 = vmatpush3.bf16.msra.mxu0 %v4329_v31  ;;  %2156 = vmatmul.mubr.bf16.gmra.mxu1 %v3583_v60  ;;  %v1323_v31 = vsel %vm4635_vm2, %v1318_v1, %v1322_v25  ;;  %v3589_v60 = vcombine.low %v3566_v56, %v3566_v56  ;;  %v3573_v25 = vld [vmem:[%s4515_s25 + $0x20] sm:$0xf] }
  0x7f   : > { %3987 = vmatpush3.bf16.msra.mxu1 %v4330_v32  ;;  %3960 = vmatprep.subr.bf16.mxu0 %v4331_v33  ;;  %v1375_v32 = vrot.slane %v1373_v27, 5  ;;  %v1384_v33 = vor.u32 %v1383_v24, %v1380_v23  ;;  %v4380_v23 = vld [vmem:[%s5401_s1 + $0x180] sm:$0xff]   ;;  %v4381_v24 = vld [vmem:[%s4515_s25 + $0x68] ss:$8 sps:$4 sm:$0xff]   ;;  %v1417_v29 = vshrl.u32 %v3573_v25, 16 }
  0x80   : > { %3988 = vmatprep.subr.bf16.mxu1 %v4332_v34  ;;  %v4357_v34 = vld [vmem:[%s5401_s1 + $0x1b8] sm:$0xff]   ;;  %v3579_v27 = vld [vmem:[%s4515_s25 + $0x24] sm:$0x1] }
  0x81   : > { %v1376_v42 = vsel %vm4635_vm2, %v1371_v36, %v1375_v32  ;;  %v1431_v32 = vshrl.u32 %v3574_v26, 16  ;;  %v1419_v36 = vrot.slane %v1417_v29, 4  ;;  %v4415_v29 = vld [vmem:[%s5401_s1] sm:$0xff]  }
  0x82   : > { %3961 = vmatpush3.bf16.msra.mxu0 %v4333_v35  ;;  %v1337_v35 = vsel %vm4635_vm2, %v1332_v2, %v1336_v28  ;;  %v3580_v28 = vld [vmem:[%s4515_s25 + $0x2c] sm:$0x1] }
  0x83   : > { %3989 = vmatpush3.bf16.msra.mxu1 %v4334_v37  ;;  %3962 = vmatprep.subr.bf16.mxu0 %v4335_v39  ;;  %v1389_v37 = vrot.slane %v1387_v30, 5  ;;  %v3586_v38 = vcombine.low %v1323_v31, %v1337_v35  ;;  %v1385_v39 = vrot.slane %v1384_v33, 4  ;;  %v1420_v30 = vshll.u32 %v3573_v25, 16  ;;  %v4379_v35 = vld [vmem:[%s5401_s1 + $0x200] sm:$0xff]  }
  0x84   : > { %3990 = vmatprep.subr.bf16.mxu1 %v4336_v41  ;;  %v4358_v41 = vld [vmem:[%s5401_s1 + $0x1f0] sm:$0xff]   ;;  %v1426_v31 = vshll.u32 %v3579_v27, 16  ;;  %v1434_v33 = vshll.u32 %v3574_v26, 16  ;;  %v4413_v27 = vld [vmem:[%s5401_s1 + $0x40] sm:$0xff]  }
  0x86   : > { %3963 = vmatpush3.bf16.msra.mxu0 %v4337_v43  ;;  %v1390_v43 = vsel %vm4635_vm2, %v1385_v39, %v1389_v37  ;;  %v1422_v37 = vrot.slane %v1420_v30, 5  ;;  %v1428_v39 = vrot.slane %v1426_v31, 5  ;;  %v4412_v30 = vld [vmem:[%s5401_s1 + $0x88] sm:$0xff]   ;;  %v4417_v31 = vld [vmem:[%s4515_s25 + $0x78] ss:$8 sps:$4 sm:$0xff]  }
  0x87   : > { %3991 = vmatpush3.bf16.msra.mxu1 %v4338_v45  ;;  %3964 = vmatprep.subr.bf16.mxu0 %v4339_v47  ;;  %v3592_v45 = vcombine.low %v1376_v42, %v1390_v43  ;;  %v4361_v47 = vld [vmem:[%s5401_s1 + $0x1e8] sm:$0xff]   ;;  %v3594_v43 = vcombine.low %v3573_v25, %v3574_v26  ;;  %v4408_v26 = vld [vmem:[%s5401_s1 + $0x90] sm:$0xff]  }
  0x88   : > { %3992 = vmatprep.subr.bf16.mxu1 %v4340_v49  ;;  %v1344_v49 = vrot.slane %v1342_v5, 5  ;;  %v4411_v25 = vld [vmem:[%s5401_s1 + $0x8] sm:$0xff]  }
  0x89   : > { %2243 = vmatprep.mubr.bf16.mxu1 %v3592_v45  ;;  %v3575_v45 = vld [vmem:[%s4515_s25 + $0x30] sm:$0xf] }
  0x8a   : > { %3965 = vmatpush3.bf16.msra.mxu0 %v4341_v51  ;;  %v4363_v51 = vld [vmem:[%s5401_s1 + $0x1a8] sm:$0xff]   ;;  %v1345_v54 = vor.u32 %v1344_v49, %v1341_v48  ;;  %v1445_v48 = vshrl.u32 %v3575_v45, 16  ;;  %v1448_v49 = vshll.u32 %v3575_v45, 16 }
  0x8b   : > { %3993 = vmatpush3.bf16.msra.mxu1 %v4342_v52  ;;  %3966 = vmatprep.subr.bf16.mxu0 %v4344_v55  ;;  %v4364_v52 = vld [vmem:[%s5401_s1 + $0x1e0] sm:$0xff]  }
  0x8c   : > { %3994 = vmatprep.subr.bf16.mxu1 %v4345_v58  ;;  %v4365_v55 = vld [vmem:[%s5401_s1 + $0x220] sm:$0xff]   ;;  %v1392_v58 = vshrl.u32 %v3566_v56, 16  ;;  %v1346_v1 = vrot.slane %v1345_v54, 4  ;;  %v4384_v54 = vld [vmem:[%s5401_s1 + $0xf8] sm:$0xff]   ;;  %v1447_v56 = vrot.slane %v1445_v48, 4 }
  0x8e   : > { %3967 = vmatpush3.bf16.msra.mxu0 %v4347_v61  ;;  %v4368_v61 = vld [vmem:[%s5401_s1 + $0x1d8] sm:$0xff]  }
  0x8f   : > { %3995 = vmatpush3.bf16.msra.mxu1 %v4348_v62  ;;  %3968 = vmatprep.subr.bf16.mxu0 %v4349_v63  ;;  %v3563_v62 = vld [vmem:[%s4515_s25 + $0x2c] sm:$0x1]  ;;  %v1394_v63 = vrot.slane %v1392_v58, 4 }
  0x90   : > { %3996 = vmatprep.subr.bf16.mxu1 %v4350_v0  ;;  %v1397_v0 = vrot.slane %v1395_v59, 5  ;;  %v1348_v2 = vshll.u32 %v3563_v62, 16  ;;  %v4387_v59 = vld [vmem:[%s5401_s1 + $0x70] sm:$0xff]  }
  0x92   : > { %3969 = vmatpush3.bf16.msra.mxu0 %v4351_v4  ;;  %v3572_v4 = vld [vmem:[%s4515_s25 + $0xbc] sm:$0x1]  ;;  %v1350_v5 = vrot.slane %v1348_v2, 5 }
  0x93   : > { %3997 = vmatpush3.bf16.msra.mxu1 %v4352_v6  ;;  %4010 = vmatprep.subr.bf16.mxu0 %v4354_v17  ;;  %v1398_v6 = vor.u32 %v1397_v0, %v1394_v63  ;;  %v1401_v7 = vshll.u32 %v3572_v4, 16  ;;  %v4389_v0 = vld [vmem:[%s5401_s1 + $0x30] sm:$0xff]   ;;  %v4386_v2 = vld [vmem:[%s5401_s1 + $0xb8] sm:$0xff]   ;;  %v3595_v4 = vcombine.low %v3575_v45, %v3575_v45 }
  0x94   : > { %4165 = vmatprep.subr.bf16.mxu1 %v4355_v22  ;;  %v1351_v9 = vsel %vm4635_vm2, %v1346_v1, %v1350_v5 }
  0x95   : > { %2196 = vmatmul.mubr.bf16.vlgmr.msra.gmra.mxu0 %v3586_v38  ;;  %v1399_v10 = vrot.slane %v1398_v6, 4  ;;  %v1403_v11 = vrot.slane %v1401_v7, 5  ;;  %v3587_v13 = vcombine.low %v1351_v9, %v1351_v9  ;;  %v4383_v38 = vld [vmem:[%s5401_s1 + $0x78] sm:$0xff]   ;;  %v4393_v6 = vld [vmem:[%s5401_s1 + $0x68] sm:$0xff]  }
  0x96   : > { %4011 = vmatpush3.bf16.msra.mxu0 %v4357_v34  ;;  %2244 = vmatmul.mubr.bf16.vlgmr.msra.gmra.mxu1 %v4356_v40  ;;  %v1440_v34 = vshll.u32 %v3580_v28, 16  ;;  %v1433_v40 = vrot.slane %v1431_v32, 4  ;;  %v4395_v9 = vld [vmem:[%s5401_s1 + $0x28] sm:$0xff]   ;;  %v5156_v32 = vld [vmem:[%s4515_s25 + $0xc0] sm:$0xf] }
  0x97   : > { %4012 = vmatprep.subr.bf16.mxu0 %v4358_v41  ;;  %4166 = vmatpush3.bf16.msra.mxu1 %v4355_v22  ;;  %v1404_v15 = vsel %vm4635_vm2, %v1399_v10, %v1403_v11  ;;  %v4378_v22 = vld [vmem:[%s5401_s1 + $0x1c0] sm:$0xff]   ;;  %v1436_v41 = vrot.slane %v1434_v33, 5  ;;  %v4390_v10 = vld [vmem:[%s5401_s1 + $0xb0] sm:$0xff]   ;;  %v4410_v28 = vld [vmem:[%s5401_s1 + $0xc8] sm:$0xff]  }
  0x98   : > { %4167 = vmatprep.subr.bf16.mxu1 %v4359_v44  ;;  %2203 = vmatprep.mubr.bf16.mxu0 %v3589_v60  ;;  %v3593_v17 = vcombine.low %v1404_v15, %v1404_v15  ;;  %v1442_v42 = vrot.slane %v1440_v34, 5  ;;  %v4397_v11 = vld [vmem:[%s5401_s1 + $0x60] sm:$0xff]   ;;  %v4401_v15 = vld [vmem:[%s5401_s1 + $0x58] sm:$0xff]   ;;  %v5162_v34 = vld [vmem:[%s4515_s25 + $0xc8] sm:$0xf] }
  0x99   : > { %v4414_v33 = vld [vmem:[%s5401_s1 + $0xc0] sm:$0xff]  }
  0x9a   : > { %4013 = vmatpush3.bf16.msra.mxu0 %v4360_v46  ;;  %2251 = vmatprep.mubr.bf16.mxu1 %v3593_v17  ;;  %v3581_v46 = vld [vmem:[%s4515_s25 + $0x34] sm:$0x1]  ;;  %v4403_v17 = vld [vmem:[%s5401_s1 + $0x18] sm:$0xff]  }
  0x9b   : > { %4014 = vmatprep.subr.bf16.mxu0 %v4361_v47  ;;  %4168 = vmatpush3.bf16.msra.mxu1 %v4359_v44  ;;  %v1423_v44 = vor.u32 %v1422_v37, %v1419_v36  ;;  %v1437_v47 = vor.u32 %v1436_v41, %v1433_v40  ;;  %v3696_v36 = vcombine.low %v5156_v32, %v5162_v34  ;;  %v3676_v37 = vld [vmem:[%s4515_s25 + $0x38] sm:$0xf]  ;;  %v3680_v40 = vld [vmem:[%s4515_s25 + $0x3c] sm:$0x1] }
  0x9c   : > { %4169 = vmatprep.subr.bf16.mxu1 %v4362_v50  ;;  %v2422_v48 = vshll.u32 %v3676_v37, 16 }
  0x9d   : > { %2204 = vmatmul.mubr.bf16.gmra.mxu0 %v3587_v13  ;;  %v4399_v13 = vld [vmem:[%s5401_s1 + $0x20] sm:$0xff]  }
  0x9e   : > { %4015 = vmatpush3.bf16.msra.mxu0 %v4363_v51  ;;  %2252 = vmatmul.mubr.bf16.gmra.mxu1 %v4371_v14  ;;  %v4385_v51 = vld [vmem:[%s5401_s1 + $0x38] sm:$0xff]   ;;  %v4396_v14 = vld [vmem:[%s5401_s1 + $0xa8] sm:$0xff]  }
  0x9f   : > { %4016 = vmatprep.subr.bf16.mxu0 %v4364_v52  ;;  %4170 = vmatpush3.bf16.msra.mxu1 %v4362_v50  ;;  %v1454_v50 = vshll.u32 %v3581_v46, 16  ;;  %v1424_v52 = vrot.slane %v1423_v44, 4 }
  0xa0   : > { %4171 = vmatprep.subr.bf16.mxu1 %v4365_v55  ;;  %2291 = vmatprep.mubr.bf16.mxu0 %v4381_v24  ;;  %v4406_v24 = vld [vmem:[%s5401_s1 + $0xd0] sm:$0xff]  }
  0xa1   : > { %v1429_v58 = vsel %vm4635_vm2, %v1424_v52, %v1428_v39  ;;  %v1456_v62 = vrot.slane %v1454_v50, 5  ;;  %v2424_v52 = vrot.slane %v2422_v48, 5 }
  0xa2   : > { %4017 = vmatpush3.bf16.msra.mxu0 %v4366_v57  ;;  %v1450_v57 = vrot.slane %v1448_v49, 5  ;;  %v2428_v49 = vshll.u32 %v3680_v40, 16 }
  0xa3   : > { %4018 = vmatprep.subr.bf16.mxu0 %v4368_v61  ;;  %4172 = vmatpush3.bf16.msra.mxu1 %v4365_v55  ;;  %v1438_v55 = vrot.slane %v1437_v47, 4  ;;  %v2419_v47 = vshrl.u32 %v3676_v37, 16 }
  0xa4   : > { %4173 = vmatprep.subr.bf16.mxu1 %v4369_v8  ;;  %v1451_v61 = vor.u32 %v1450_v57, %v1447_v56  ;;  %v4422_v57 = vld [vmem:[%s5401_s1 + $0x1f8] sm:$0xff]  }
  0xa5   : > { %v1443_v60 = vsel %vm4635_vm2, %v1438_v55, %v1442_v42  ;;  %v4420_v42 = vld [vmem:[%s5401_s1 + $0x178] sm:$0xff]  }
  0xa6   : > { %4019 = vmatpush3.bf16.msra.mxu0 %v4370_v3  ;;  %v3598_v63 = vcombine.low %v1429_v58, %v1443_v60  ;;  %v1452_v1 = vrot.slane %v1451_v61, 4  ;;  %v4391_v3 = vld [vmem:[%s4515_s25 + $0x78] ss:$0 sps:$4 sm:$0xff]   ;;  %v4424_v61 = vld [vmem:[%s5401_s1 + $0x170] sm:$0xff]  }
  0xa7   : > { %4020 = vmatprep.subr.bf16.mxu0 %v4372_v12  ;;  %4174 = vmatpush3.bf16.msra.mxu1 %v4369_v8  ;;  %v4388_v8 = vld [vmem:[%s5401_s1 + $0xf0] sm:$0xff]   ;;  %v4394_v12 = vld [vmem:[%s5401_s1 + $0xe8] sm:$0xff]  }
  0xa8   : > { %4175 = vmatprep.subr.bf16.mxu1 %v4373_v18  ;;  %4181 = vmatprep.mubr.bf16.mxu1 %v3598_v63  ;;  %v1457_v5 = vsel %vm4635_vm2, %v1452_v1, %v1456_v62  ;;  %v4425_v63 = vld [vmem:[%s5401_s1 + $0x130] sm:$0xff]   ;;  %v4423_v1 = vld [vmem:[%s5401_s1 + $0x1b8] sm:$0xff]  }
  0xa9   : > { %v3599_v7 = vcombine.low %v1457_v5, %v1457_v5  ;;  %v4428_v5 = vld [vmem:[%s5401_s1 + $0x168] sm:$0xff]  }
  0xaa   : > { %4021 = vmatpush3.bf16.msra.mxu0 %v4374_v16  ;;  %v4398_v16 = vld [vmem:[%s5401_s1 + $0xe0] sm:$0xff]  }
  0xab   : > { %4022 = vmatprep.subr.bf16.mxu0 %v4375_v19  ;;  %4176 = vmatpush3.bf16.msra.mxu1 %v4373_v18  ;;  %v4400_v18 = vld [vmem:[%s5401_s1 + $0xa0] sm:$0xff]   ;;  %v4405_v19 = vld [vmem:[%s5401_s1 + $0x50] sm:$0xff]  }
  0xac   : > { %4177 = vmatprep.subr.bf16.mxu1 %v4376_v20 }
  0xae   : > { %4023 = vmatpush3.bf16.msra.mxu0 %v4377_v21  ;;  %v4407_v21 = vld [vmem:[%s5401_s1 + $0x10] sm:$0xff]  }
  0xaf   : > { %4024 = vmatprep.subr.bf16.mxu0 %v4378_v22  ;;  %4178 = vmatpush3.bf16.msra.mxu1 %v4376_v20  ;;  %v4402_v20 = vld [vmem:[%s5401_s1 + $0xd8] sm:$0xff]  }
  0xb0   : > { %4179 = vmatprep.subr.bf16.mxu1 %v4379_v35  ;;  %v4404_v22 = vld [vmem:[%s5401_s1 + $0x98] sm:$0xff]  }
  0xb2   : > { %4025 = vmatpush3.bf16.msra.mxu0 %v4380_v23  ;;  %v4409_v23 = vld [vmem:[%s5401_s1 + $0x48] sm:$0xff]  }
  0xb3   : > { %4048 = vmatprep.subr.bf16.mxu0 %v4383_v38  ;;  %4180 = vmatpush3.bf16.msra.mxu1 %v4379_v35  ;;  %v3675_v35 = vld [vmem:[%s4515_s25 + $0x30] sm:$0xf]  ;;  %v3679_v38 = vld [vmem:[%s4515_s25 + $0x34] sm:$0x1] }
  0xb4   : > { %4070 = vmatprep.subr.bf16.mxu1 %v4384_v54  ;;  %v3693_v39 = vcombine.low %v3675_v35, %v3676_v37  ;;  %v2405_v41 = vshrl.u32 %v3675_v35, 16  ;;  %v2408_v44 = vshll.u32 %v3675_v35, 16  ;;  %v2414_v45 = vshll.u32 %v3679_v38, 16  ;;  %v4421_v54 = vld [vmem:[%s5401_s1 + $0x138] sm:$0xff]   ;;  %v4446_v35 = vld [vmem:[%s5401_s1 + $0x1c8] sm:$0xff]   ;;  %v4449_v38 = vld [vmem:[%s5401_s1 + $0x100] sm:$0xff]  }
  0xb5   : > { %2292 = vmatmul.mubr.bf16.vlgmr.msra.gmra.mxu0 %v3594_v43  ;;  %v4416_v43 = vld [vmem:[%s5401_s1 + $0x80] sm:$0xff]  }
  0xb6   : > { %4049 = vmatpush3.bf16.msra.mxu0 %v4385_v51  ;;  %2299 = vmatprep.mubr.bf16.mxu0 %v4391_v3  ;;  %v2407_v46 = vrot.slane %v2405_v41, 4  ;;  %v2410_v50 = vrot.slane %v2408_v44, 5  ;;  %v2421_v51 = vrot.slane %v2419_v47, 4  ;;  %v2416_v56 = vrot.slane %v2414_v45, 5  ;;  %v4426_v3 = vld [vmem:[%s5401_s1 + $0x1f0] sm:$0xff]   ;;  %v4450_v45 = vld [vmem:[%s5401_s1 + $0x1c0] sm:$0xff]  }
  0xb7   : > { %4050 = vmatprep.subr.bf16.mxu0 %v4387_v59  ;;  %4182 = vmatmul.mubr.bf16.vlgmr.msra.gmra.mxu1 %v3599_v7  ;;  %v2430_v59 = vrot.slane %v2428_v49, 5  ;;  %v4427_v7 = vld [vmem:[%s5401_s1 + $0x1b0] sm:$0xff]   ;;  %v4472_v47 = vmov 0.0  }
  0xb8   : > { %4071 = vmatpush3.bf16.msra.mxu1 %v4386_v2  ;;  %3201 = vmatprep.mubr.bf16.mxu1 %v3696_v36  ;;  %v2411_v55 = vor.u32 %v2410_v50, %v2407_v46  ;;  %v2425_v58 = vor.u32 %v2424_v52, %v2421_v51  ;;  %v4448_v36 = vld [vmem:[%s5401_s1 + $0x140] sm:$0xff]  }
  0xb9   : > { %4072 = vmatprep.subr.bf16.mxu1 %v4388_v8  ;;  %v4430_v8 = vld [vmem:[%s5401_s1 + $0x1e8] sm:$0xff]   ;;  %v4451_v51 = vld [vmem:[%s5401_s1 + $0x180] sm:$0xff]  }
  0xba   : > { %4051 = vmatpush3.bf16.msra.mxu0 %v4389_v0  ;;  %v2412_v60 = vrot.slane %v2411_v55, 4  ;;  %v2426_v62 = vrot.slane %v2425_v58, 4  ;;  %v3687_v58 = vld [vmem:[%s4515_s25 + $0x38] sm:$0xf] }
  0xbb   : > { %4052 = vmatprep.subr.bf16.mxu0 %v4393_v6  ;;  %v4429_v6 = vld [vmem:[%s5401_s1 + $0x128] sm:$0xff]  }
  0xbc   : > { %4073 = vmatpush3.bf16.msra.mxu1 %v4390_v10  ;;  %v2417_v0 = vsel %vm4635_vm2, %v2412_v60, %v2416_v56  ;;  %v2431_v2 = vsel %vm4635_vm2, %v2426_v62, %v2430_v59  ;;  %v4433_v10 = vld [vmem:[%s5401_s1 + $0x120] sm:$0xff]   ;;  %v4454_v62 = vld [vmem:[%s5401_s1 + $0x238] sm:$0xff]  }
  0xbd   : > { %2300 = vmatmul.mubr.bf16.gmra.mxu0 %v3595_v4  ;;  %4074 = vmatprep.subr.bf16.mxu1 %v4394_v12  ;;  %v3695_v4 = vcombine.low %v2417_v0, %v2431_v2  ;;  %v2441_v12 = vshrl.u32 %v5156_v32, 16  ;;  %v4453_v56 = vld [vmem:[%s4515_s25 + $0x80] ss:$8 sps:$4 sm:$0xff]   ;;  %v4456_v2 = vld [vmem:[%s5401_s1 + $0x230] sm:$0xff]  }
  0xbe   : > { %4053 = vmatpush3.bf16.msra.mxu0 %v4395_v9  ;;  %3160 = vmatprep.mubr.bf16.mxu0 %v4417_v31  ;;  %v4432_v9 = vld [vmem:[%s5401_s1 + $0x160] sm:$0xff]   ;;  %v4445_v31 = vld [vmem:[%s5401_s1 + $0x108] sm:$0xff]  }
  0xbf   : > { %4054 = vmatprep.subr.bf16.mxu0 %v4397_v11  ;;  %v4431_v11 = vld [vmem:[%s5401_s1 + $0x1a8] sm:$0xff]   ;;  %v3688_v59 = vld [vmem:[%s4515_s25 + $0x40] sm:$0xf] }
  0xc0   : > { %4075 = vmatpush3.bf16.msra.mxu1 %v4396_v14  ;;  %v2444_v14 = vshll.u32 %v5156_v32, 16  ;;  %v4443_v32 = vld [vmem:[%s5401_s1 + $0x190] sm:$0xff]   ;;  %v3699_v0 = vcombine.low %v3687_v58, %v3688_v59 }
  0xc1   : > { %4076 = vmatprep.subr.bf16.mxu1 %v4398_v16  ;;  %v2455_v16 = vshrl.u32 %v5162_v34, 16 }
  0xc2   : > { %4055 = vmatpush3.bf16.msra.mxu0 %v4399_v13  ;;  %v4434_v13 = vld [vmem:[%s5401_s1 + $0x1e0] sm:$0xff]  }
  0xc3   : > { %4056 = vmatprep.subr.bf16.mxu0 %v4401_v15  ;;  %v4436_v15 = vld [vmem:[%s5401_s1 + $0x158] sm:$0xff]  }
  0xc4   : > { %4077 = vmatpush3.bf16.msra.mxu1 %v4400_v18  ;;  %v2458_v18 = vshll.u32 %v5162_v34, 16 }
  0xc5   : > { %4078 = vmatprep.subr.bf16.mxu1 %v4402_v20  ;;  %v2443_v20 = vrot.slane %v2441_v12, 4  ;;  %v2491_v12 = vshrl.u32 %v3688_v59, 16 }
  0xc6   : > { %4057 = vmatpush3.bf16.msra.mxu0 %v4403_v17  ;;  %v4437_v17 = vld [vmem:[%s5401_s1 + $0x118] sm:$0xff]  }
  0xc7   : > { %4058 = vmatprep.subr.bf16.mxu0 %v4405_v19  ;;  %v4435_v19 = vld [vmem:[%s5401_s1 + $0x1a0] sm:$0xff]  }
  0xc8   : > { %4079 = vmatpush3.bf16.msra.mxu1 %v4404_v22  ;;  %v2446_v22 = vrot.slane %v2444_v14, 5  ;;  %v4458_v14 = vld [vmem:[%s5401_s1 + $0x220] sm:$0xff]  }
  0xc9   : > { %4080 = vmatprep.subr.bf16.mxu1 %v4406_v24  ;;  %v2457_v24 = vrot.slane %v2455_v16, 4 }
  0xca   : > { %4059 = vmatpush3.bf16.msra.mxu0 %v4407_v21  ;;  %v4438_v21 = vld [vmem:[%s5401_s1 + $0x1d8] sm:$0xff]  }
  0xcb   : > { %4060 = vmatprep.subr.bf16.mxu0 %v4409_v23  ;;  %v4440_v23 = vld [vmem:[%s5401_s1 + $0x150] sm:$0xff]  }
  0xcc   : > { %4081 = vmatpush3.bf16.msra.mxu1 %v4408_v26  ;;  %v2460_v26 = vrot.slane %v2458_v18, 5 }
  0xcd   : > { %4082 = vmatprep.subr.bf16.mxu1 %v4410_v28  ;;  %v4442_v28 = vld [vmem:[%s5401_s1 + $0x1d0] sm:$0xff]  }
  0xce   : > { %4061 = vmatpush3.bf16.msra.mxu0 %v4411_v25  ;;  %v4441_v25 = vld [vmem:[%s5401_s1 + $0x110] sm:$0xff]   ;;  %v2461_v34 = vor.u32 %v2460_v26, %v2457_v24  ;;  %v3692_v24 = vld [vmem:[%s4515_s25 + $0x44] sm:$0x1] }
  0xcf   : > { %4062 = vmatprep.subr.bf16.mxu0 %v4413_v27  ;;  %v4439_v27 = vld [vmem:[%s5401_s1 + $0x198] sm:$0xff]  }
  0xd0   : > { %4083 = vmatpush3.bf16.msra.mxu1 %v4412_v30  ;;  %v2462_v41 = vrot.slane %v2461_v34, 4 }
  0xd1   : > { %4084 = vmatprep.subr.bf16.mxu1 %v4414_v33  ;;  %v2447_v33 = vor.u32 %v2446_v22, %v2443_v20 }
  0xd2   : > { %4063 = vmatpush3.bf16.msra.mxu0 %v4415_v29  ;;  %v4444_v29 = vld [vmem:[%s5401_s1 + $0x148] sm:$0xff]  }
  0xd3   : > { %4092 = vmatprep.subr.bf16.mxu0 %v4420_v42  ;;  %v2448_v40 = vrot.slane %v2447_v33, 4  ;;  %v4447_v42 = vld [vmem:[%s5401_s1 + $0x188] sm:$0xff]  }
  0xd4   : > { %4085 = vmatpush3.bf16.msra.mxu1 %v4416_v43  ;;  %v3686_v43 = vld [vmem:[%s4515_s25 + $0xcc] sm:$0x1] }
  0xd5   : > { %3161 = vmatmul.mubr.bf16.vlgmr.msra.gmra.mxu0 %v3693_v39  ;;  %4114 = vmatprep.subr.bf16.mxu1 %v4422_v57  ;;  %v3685_v39 = vld [vmem:[%s4515_s25 + $0xc4] sm:$0x1]  ;;  %v2464_v46 = vshll.u32 %v3686_v43, 16 }
  0xd6   : > { %4093 = vmatpush3.bf16.msra.mxu0 %v4421_v54  ;;  %v2450_v44 = vshll.u32 %v3685_v39, 16  ;;  %v4452_v54 = vld [vmem:[%s4515_s25 + $0x108] ss:$8 sps:$4 sm:$0xff]  }
  0xd7   : > { %4094 = vmatprep.subr.bf16.mxu0 %v4424_v61  ;;  %3202 = vmatmul.mubr.bf16.vlgmr.msra.gmra.mxu1 %v3695_v4  ;;  %v2466_v50 = vrot.slane %v2464_v46, 5 }
  0xd8   : > { %4115 = vmatpush3.bf16.msra.mxu1 %v4423_v1  ;;  %v2452_v49 = vrot.slane %v2450_v44, 5  ;;  %3283 = vmatprep.mubr.bf16.mxu1 %v4453_v56 }
  0xd9   : > { %4116 = vmatprep.subr.bf16.mxu1 %v4426_v3  ;;  %v2467_v57 = vsel %vm4635_vm2, %v2462_v41, %v2466_v50 }
  0xda   : > { %4095 = vmatpush3.bf16.msra.mxu0 %v4425_v63  ;;  %v2453_v55 = vsel %vm4635_vm2, %v2448_v40, %v2452_v49 }
  0xdb   : > { %4096 = vmatprep.subr.bf16.mxu0 %v4428_v5  ;;  %v3698_v61 = vcombine.low %v2453_v55, %v2467_v57 }
  0xdc   : > { %4117 = vmatpush3.bf16.msra.mxu1 %v4427_v7  ;;  %v4457_v7 = vld [vmem:[%s5401_s1 + $0x228] sm:$0xff]  }
  0xdd   : > { %4118 = vmatprep.subr.bf16.mxu1 %v4430_v8  ;;  %3242 = vmatprep.mubr.bf16.mxu0 %v3698_v61 }
  0xde   : > { %4097 = vmatpush3.bf16.msra.mxu0 %v4429_v6 }
  0xdf   : > { %4098 = vmatprep.subr.bf16.mxu0 %v4432_v9 }
  0xe0   : > { %4119 = vmatpush3.bf16.msra.mxu1 %v4431_v11  ;;  %v2480_v11 = vshll.u32 %v3687_v58, 16 }
  0xe1   : > { %4120 = vmatprep.subr.bf16.mxu1 %v4434_v13  ;;  %v2494_v13 = vshll.u32 %v3688_v59, 16 }
  0xe2   : > { %4099 = vmatpush3.bf16.msra.mxu0 %v4433_v10  ;;  %v2477_v10 = vshrl.u32 %v3687_v58, 16  ;;  %v2482_v18 = vrot.slane %v2480_v11, 5 }
  0xe3   : > { %4100 = vmatprep.subr.bf16.mxu0 %v4436_v15  ;;  %v2496_v20 = vrot.slane %v2494_v13, 5 }
  0xe4   : > { %4121 = vmatpush3.bf16.msra.mxu1 %v4435_v19  ;;  %v2493_v19 = vrot.slane %v2491_v12, 4 }
  0xe5   : > { %4122 = vmatprep.subr.bf16.mxu1 %v4438_v21  ;;  %v4459_v21 = vld [vmem:[%s5401_s1 + $0x218] sm:$0xff]  }
  0xe6   : > { %4101 = vmatpush3.bf16.msra.mxu0 %v4437_v17  ;;  %v2479_v17 = vrot.slane %v2477_v10, 4 }
  0xe7   : > { %4102 = vmatprep.subr.bf16.mxu0 %v4440_v23  ;;  %v3691_v23 = vld [vmem:[%s4515_s25 + $0x3c] sm:$0x1] }
  0xe8   : > { %4123 = vmatpush3.bf16.msra.mxu1 %v4439_v27  ;;  %v2483_v26 = vor.u32 %v2482_v18, %v2479_v17  ;;  %v2486_v27 = vshll.u32 %v3691_v23, 16 }
  0xe9   : > { %4124 = vmatprep.subr.bf16.mxu1 %v4442_v28  ;;  %v2497_v28 = vor.u32 %v2496_v20, %v2493_v19 }
  0xea   : > { %4103 = vmatpush3.bf16.msra.mxu0 %v4441_v25  ;;  %v4460_v25 = vld [vmem:[%s5401_s1 + $0x210] sm:$0xff]  }
  0xeb   : > { %4104 = vmatprep.subr.bf16.mxu0 %v4444_v29  ;;  %v2500_v29 = vshll.u32 %v3692_v24, 16  ;;  %v2498_v39 = vrot.slane %v2497_v28, 4 }
  0xec   : > { %4125 = vmatpush3.bf16.msra.mxu1 %v4443_v32 }
  0xed   : > { %4126 = vmatprep.subr.bf16.mxu1 %v4446_v35  ;;  %v4461_v35 = vld [vmem:[%s5401_s1 + $0x208] sm:$0xff]   ;;  %v2502_v40 = vrot.slane %v2500_v29, 5 }
  0xee   : > { %4105 = vmatpush3.bf16.msra.mxu0 %v4445_v31 }
  0xef   : > { %4106 = vmatprep.subr.bf16.mxu0 %v4448_v36  ;;  %v2484_v36 = vrot.slane %v2483_v26, 4  ;;  %v2503_v49 = vsel %vm4635_vm2, %v2498_v39, %v2502_v40 }
  0xf0   : > { %4127 = vmatpush3.bf16.msra.mxu1 %v4447_v42 }
  0xf1   : > { %4128 = vmatprep.subr.bf16.mxu1 %v4450_v45  ;;  %v4462_v45 = vld [vmem:[%s5401_s1 + $0x200] sm:$0xff]  }
  0xf2   : > { %4107 = vmatpush3.bf16.msra.mxu0 %v4449_v38  ;;  %v2488_v38 = vrot.slane %v2486_v27, 5 }
  0xf3   : > { %4185 = vmatprep.subr.bf16.mxu0 %v4472_v47 }
  0xf4   : > { %4129 = vmatpush3.bf16.msra.mxu1 %v4451_v51  ;;  %v2489_v46 = vsel %vm4635_vm2, %v2484_v36, %v2488_v38 }
  0xf5   : > { %v5253_v30 = vpop.f32.mrf.mxu0  ;;  %3243 = vmatmul.mubr.bf16.vlgmr.msra.gmra.mxu0 %v4452_v54  ;;  %v3701_v50 = vcombine.low %v2489_v46, %v2503_v49  ;;  %v1285_v49 = vld [vmem:[%s5404_s4] sm:$0x1] }
  0xf6   : > { %v5286_v52 = vpop.f32.mrf.mxu1  ;;  %4186 = vmatpush3.bf16.msra.mxu0 %v4454_v62  ;;  %4201 = vmatprep.mubr.msk.bf16.mxu0 %vm4473_vm3, %v4472_v47 }
  0xf7   : > { %v5267_v37 = vpop.f32.mrf.mxu0  ;;  %3284 = vmatmul.mubr.bf16.vlgmr.msra.gmra.mxu1 %v3699_v0  ;;  %4187 = vmatprep.subr.bf16.mxu0 %v4472_v47 }
  0xf8   : > { %v5301_v63 = vpop.f32.mrf.mxu1  ;;  %v3822_v53 = vadd.f32 %v5267_v37, %v5253_v30 }
  0xf9   : > { %v5281_v48 = vpop.f32.mrf.mxu0 }
  0xfa   : > { %v5311_v4 = vpop.f32.mrf.mxu1  ;;  %4188 = vmatpush3.bf16.msra.mxu0 %v4456_v2 }
  0xfb   : > { %v5296_v60 = vpop.f32.mrf.mxu0  ;;  %4189 = vmatprep.subr.bf16.mxu0 %v4472_v47 }
  0xfc   : > { %v5317_v8 = vpop.f32.mrf.mxu1 }
  0xfd   : > { %v5303_v1 = vpop.f32.mrf.mxu0 }
  0xfe   : > { %v3854_v9 = vpop.f32.mrf.mxu1  ;;  %4190 = vmatpush3.bf16.msra.mxu0 %v4457_v7  ;;  %v3853_v7 = vadd.f32 %v5317_v8, %v5311_v4 }
  0xff   : > { %v5308_v3 = vpop.f32.mrf.mxu0  ;;  %4191 = vmatprep.subr.bf16.mxu0 %v4472_v47 }
 0x100   : > { %v3855_v15 = vpop.f32.mrf.mxu1  ;;  %v3828_v62 = vadd.f32 %v5308_v3, %v5303_v1 }
 0x101   : > { %v3829_v5 = vpop.f32.mrf.mxu0  ;;  %v3856_v0 = vadd.f32 %v3855_v15, %v3854_v9 }
 0x102   : > { %v3857_v16 = vpop.f32.mrf.mxu1  ;;  %4192 = vmatpush3.bf16.msra.mxu0 %v4458_v14 }
 0x103   : > { %v3830_v6 = vpop.f32.mrf.mxu0  ;;  %4193 = vmatprep.subr.bf16.mxu0 %v4472_v47  ;;  %v1109_v5 = vadd.f32 %v3856_v0, %v3828_v62 }
 0x104   : > { %v3858_v22 = vpop.f32.mrf.mxu1  ;;  %v3825_v6 = vadd.f32 %v5296_v60, %v5281_v48 }
 0x106   : > { %4194 = vmatpush3.bf16.msra.mxu0 %v4459_v21  ;;  %v1104_v9 = vadd.f32 %v3853_v7, %v3825_v6 }
 0x107   : > { %4195 = vmatprep.subr.bf16.mxu0 %v4472_v47 }
 0x10a   : > { %4196 = vmatpush3.bf16.msra.mxu0 %v4460_v25 }
 0x10b   : > { %4197 = vmatprep.subr.bf16.mxu0 %v4472_v47 }
 0x10e   : > { %4198 = vmatpush3.bf16.msra.mxu0 %v4461_v35 }
 0x10f   : > { %4199 = vmatprep.subr.bf16.mxu0 %v4472_v47  ;;  %v3850_v47 = vadd.f32 %v5301_v63, %v5286_v52 }
 0x111   : > { %v1101_v1 = vadd.f32 %v3850_v47, %v3822_v53 }
 0x112   : > { %4200 = vmatpush3.bf16.msra.mxu0 %v4462_v45 }
 0x115   : > { %v3876_v32 = vpop.f32.mrf.mxu0  ;;  %4202 = vmatmul.mubr.bf16.vlgmr.msra.gmra.mxu0 %v3701_v50 }
 0x116   : > { %v3904_v31 = vpop.f32.mrf.mxu1 }
 0x117   : > { %v3877_v34 = vpop.f32.mrf.mxu0 }
 0x118   : > { %v3905_v33 = vpop.f32.mrf.mxu1  ;;  %v3878_v10 = vadd.f32 %v3877_v34, %v3876_v32 }
 0x119   : > { %v3879_v42 = vpop.f32.mrf.mxu0  ;;  %v3906_v14 = vadd.f32 %v3905_v33, %v3904_v31 }
 0x11a   : > { %v3907_v41 = vpop.f32.mrf.mxu1  ;;  %v1149_v13 = vadd.f32 %v3878_v10, %v1101_v1 }
 0x11b   : > { %v3880_v43 = vpop.f32.mrf.mxu0 }
 0x11c   : > { %v3908_v44 = vpop.f32.mrf.mxu1  ;;  %v3881_v3 = vadd.f32 %v3880_v43, %v3879_v42  ;;  %v1197_v60 = vadd.f32 %v3906_v14, %v1149_v13  ;;  %v1274_v43 = vld [vmem:[%s5403_s3] sm:$0x1] }
 0x11d   : > { %v3882_v51 = vpop.f32.mrf.mxu0  ;;  %v3909_v52 = vadd.f32 %v3908_v44, %v3907_v41 }
 0x11e   : > { %v3910_v54 = vpop.f32.mrf.mxu1  ;;  %v1152_v15 = vadd.f32 %v3881_v3, %v1104_v9 }
 0x11f   : > { %v3883_v55 = vpop.f32.mrf.mxu0 }
 0x120   : > { %v3911_v56 = vpop.f32.mrf.mxu1  ;;  %v3884_v2 = vadd.f32 %v3883_v55, %v3882_v51  ;;  %v1200_v8 = vadd.f32 %v3909_v52, %v1152_v15 }
 0x121   : > { %v3885_v57 = vpop.f32.mrf.mxu0  ;;  %v3912_v12 = vadd.f32 %v3911_v56, %v3910_v54 }
 0x122   : > { %v3913_v58 = vpop.f32.mrf.mxu1  ;;  %v1157_v11 = vadd.f32 %v3884_v2, %v1109_v5 }
 0x123   : > { %v3886_v59 = vpop.f32.mrf.mxu0 }
 0x124   : > { %v3914_v61 = vpop.f32.mrf.mxu1  ;;  %v1205_v30 = vadd.f32 %v3912_v12, %v1157_v11 }
 0x135   : > { %v4163_v37 = vpop.f32.mrf.mxu0 }
 0x136   : > { %v1253_v63 = vadd.f32 %v4163_v37, %v1205_v30  ;;  %v3942_v19 = vpop.f32.mrf.mxu1 }
 0x137   : > { %v1244_v16 = vpop.f32.mrf.mxu0 }
 0x138   : > { %v3781_v48 = vpack.c.bf16 %v1253_v63, %v1253_v63  ;;  %v1245_v4 = vadd.f32 %v1244_v16, %v1197_v60  ;;  %v3943_v25 = vpop.f32.mrf.mxu1  ;;  %v1288_v26 = vmul.f32 %v1253_v63, %v1253_v63 }
 0x139   : > { %v4164_v17 = vpop.f32.mrf.mxu0  ;;  %v3944_v13 = vadd.f32 %v3943_v25, %v3942_v19 }
 0x13a   : > { %1273 = vst [vmem:[%s4510_s22 + $0x8] sm:$0xf] %v3781_v48  ;;  %v1286_v21 = vmul.f32 %v1245_v4, %v1245_v4  ;;  %v3945_v32 = vpop.f32.mrf.mxu1 }
 0x13b   : > { %v1247_v18 = vpop.f32.mrf.mxu0 }
 0x13c   : > { %v1248_v20 = vadd.f32 %v1247_v18, %v1200_v8  ;;  %v3946_v38 = vpop.f32.mrf.mxu1 }
 0x13e   : > { %v3790_v22 = vpack.c.bf16 %v1248_v20, %v1245_v4  ;;  %v1275_v23 = vadd.f32 %v1248_v20, %v1245_v4  ;;  %v1287_v24 = vmul.f32 %v1248_v20, %v1248_v20  ;;  %v3948_v44 = vpop.f32.mrf.mxu1 }
 0x140   : > { %3791 = vst [vmem:[%s4510_s22] sm:$0xff] %v3790_v22   ;;  %v1276_v27 = vadd.f32 %v1275_v23, %v1253_v63  ;;  %v1289_v28 = vadd.f32 %v1287_v24, %v1286_v21  ;;  %v3949_v50 = vpop.f32.mrf.mxu1  ;;  %v3947_v63 = vadd.f32 %v3946_v38, %v3945_v32 }
 0x141   : > { %v3950_v16 = vadd.f32 %v3949_v50, %v3948_v44 }
 0x142   : > { %v1277_v29 = vrot.slane %v1276_v27, 4  ;;  %v1290_v31 = vadd.f32 %v1289_v28, %v1288_v26  ;;  %v3951_v55 = vpop.f32.mrf.mxu1 }
 0x144   : > { %v1278_v33 = vadd.f32 %v1277_v29, %v1276_v27  ;;  %v1291_v34 = vrot.slane %v1290_v31, 4  ;;  %v3952_v57 = vpop.f32.mrf.mxu1 }
 0x146   : > { %v1279_v35 = vrot.slane %v1278_v33, 2  ;;  %v1292_v36 = vadd.f32 %v1291_v34, %v1290_v31 }
 0x148   : > { %v1280_v39 = vadd.f32 %v1279_v35, %v1278_v33  ;;  %v1293_v40 = vrot.slane %v1292_v36, 2 }
 0x14a   : > { %v1281_v41 = vrot.slane %v1280_v39, 1  ;;  %v1294_v42 = vadd.f32 %v1293_v40, %v1292_v36 }
 0x14c   : > { %v1282_v45 = vadd.f32 %v1281_v41, %v1280_v39  ;;  %v1295_v46 = vrot.slane %v1294_v42, 1 }
 0x14e   : > { %v1283_v51 = vadd.f32 %v1282_v45, %v1274_v43  ;;  %v1296_v54 = vadd.f32 %v1295_v46, %v1294_v42 }
 0x150   : > { %1284 = vst [vmem:[%s5403_s3] sm:$0x1] %v1283_v51  ;;  %v1297_v56 = vadd.f32 %v1296_v54, %v1285_v49 }
 0x152   : > { %1298 = vst [vmem:[%s5404_s4] sm:$0x1] %v1297_v56 }
 0x155   : > { %v3970_v58 = vpop.f32.mrf.mxu0 }
 0x156   : > { %v3998_v61 = vpop.f32.mrf.mxu1 }
 0x157   : > { %v3971_v59 = vpop.f32.mrf.mxu0 }
 0x158   : > { %v3999_v0 = vpop.f32.mrf.mxu1  ;;  %v3972_v9 = vadd.f32 %v3971_v59, %v3970_v58 }
 0x159   : > { %v3973_v62 = vpop.f32.mrf.mxu0  ;;  %v4000_v37 = vadd.f32 %v3999_v0, %v3998_v61 }
 0x15a   : > { %v4001_v53 = vpop.f32.mrf.mxu1  ;;  %v2198_v30 = vadd.f32 %v3972_v9, %v3944_v13 }
 0x15b   : > { %v3974_v2 = vpop.f32.mrf.mxu0 }
 0x15c   : > { %v4002_v5 = vpop.f32.mrf.mxu1  ;;  %v3975_v15 = vadd.f32 %v3974_v2, %v3973_v62  ;;  %v2246_v4 = vadd.f32 %v4000_v37, %v2198_v30 }
 0x15d   : > { %v3976_v47 = vpop.f32.mrf.mxu0  ;;  %v4003_v18 = vadd.f32 %v4002_v5, %v4001_v53  ;;  %v2371_v5 = vld [vmem:[%s5403_s3] sm:$0x1] }
 0x15e   : > { %v4004_v7 = vpop.f32.mrf.mxu1  ;;  %v2201_v8 = vadd.f32 %v3975_v15, %v3947_v63 }
 0x15f   : > { %v3977_v6 = vpop.f32.mrf.mxu0 }
 0x160   : > { %v4005_v11 = vpop.f32.mrf.mxu1  ;;  %v3978_v48 = vadd.f32 %v3977_v6, %v3976_v47  ;;  %v2249_v26 = vadd.f32 %v4003_v18, %v2201_v8 }
 0x161   : > { %v3979_v10 = vpop.f32.mrf.mxu0  ;;  %v4006_v22 = vadd.f32 %v4005_v11, %v4004_v7 }
 0x162   : > { %v4007_v1 = vpop.f32.mrf.mxu1  ;;  %v2206_v21 = vadd.f32 %v3978_v48, %v3950_v16  ;;  %v2382_v10 = vld [vmem:[%s5404_s4] sm:$0x1] }
 0x163   : > { %v3980_v12 = vpop.f32.mrf.mxu0 }
 0x164   : > { %v4008_v3 = vpop.f32.mrf.mxu1  ;;  %v2254_v29 = vadd.f32 %v4006_v22, %v2206_v21 }
 0x175   : > { %v4026_v14 = vpop.f32.mrf.mxu0 }
 0x177   : > { %v4027_v52 = vpop.f32.mrf.mxu0  ;;  %v4183_v19 = vpop.f32.mrf.mxu1 }
 0x178   : > { %v4028_v60 = vadd.f32 %v4027_v52, %v4026_v14 }
 0x179   : > { %v4029_v17 = vpop.f32.mrf.mxu0  ;;  %v2341_v27 = vpop.f32.mrf.mxu1 }
 0x17a   : > { %v2294_v24 = vadd.f32 %v4028_v60, %v2246_v4 }
 0x17b   : > { %v4030_v20 = vpop.f32.mrf.mxu0  ;;  %v4184_v34 = vpop.f32.mrf.mxu1 }
 0x17c   : > { %v4031_v23 = vadd.f32 %v4030_v20, %v4029_v17  ;;  %v2342_v31 = vadd.f32 %v2341_v27, %v2294_v24 }
 0x17d   : > { %v4032_v25 = vpop.f32.mrf.mxu0  ;;  %v2344_v39 = vpop.f32.mrf.mxu1 }
 0x17e   : > { %v2297_v33 = vadd.f32 %v4031_v23, %v2249_v26  ;;  %v3782_v36 = vpack.c.bf16 %v2342_v31, %v2342_v31  ;;  %v2383_v43 = vmul.f32 %v2342_v31, %v2342_v31 }
 0x17f   : > { %v4033_v28 = vpop.f32.mrf.mxu0 }
 0x180   : > { %v4034_v32 = vadd.f32 %v4033_v28, %v4032_v25  ;;  %2368 = vst [vmem:[%s4510_s22 + $0xc] sm:$0xf] %v3782_v36  ;;  %v2345_v42 = vadd.f32 %v2344_v39, %v2297_v33 }
 0x181   : > { %v4035_v35 = vpop.f32.mrf.mxu0 }
 0x182   : > { %v2302_v38 = vadd.f32 %v4034_v32, %v2254_v29  ;;  %v2372_v46 = vadd.f32 %v2345_v42, %v2342_v31  ;;  %v2384_v49 = vmul.f32 %v2345_v42, %v2345_v42 }
 0x183   : > { %v4036_v40 = vpop.f32.mrf.mxu0 }
 0x184   : > { %v2350_v41 = vadd.f32 %v4183_v19, %v2302_v38  ;;  %v2386_v51 = vadd.f32 %v2384_v49, %v2383_v43 }
 0x186   : > { %v2385_v44 = vmul.f32 %v2350_v41, %v2350_v41  ;;  %v3795_v45 = vpack.c.bf16 %v2350_v41, %v2345_v42  ;;  %v2373_v50 = vadd.f32 %v2372_v46, %v2350_v41 }
 0x188   : > { %3802 = vst [vmem:[%s4510_s22 + $0x10] sm:$0xff] %v3795_v45   ;;  %v2374_v54 = vrot.slane %v2373_v50, 4  ;;  %v2387_v55 = vadd.f32 %v2386_v51, %v2385_v44 }
 0x18a   : > { %v2375_v56 = vadd.f32 %v2374_v54, %v2373_v50  ;;  %v2388_v57 = vrot.slane %v2387_v55, 4 }
 0x18c   : > { %v2376_v58 = vrot.slane %v2375_v56, 2  ;;  %v2389_v59 = vadd.f32 %v2388_v57, %v2387_v55 }
 0x18e   : > { %v2377_v61 = vadd.f32 %v2376_v58, %v2375_v56  ;;  %v2390_v62 = vrot.slane %v2389_v59, 2 }
 0x190   : > { %v2378_v0 = vrot.slane %v2377_v61, 1  ;;  %v2391_v2 = vadd.f32 %v2390_v62, %v2389_v59 }
 0x192   : > { %v2379_v53 = vadd.f32 %v2378_v0, %v2377_v61  ;;  %v2392_v47 = vrot.slane %v2391_v2, 1 }
 0x194   : > { %v2380_v6 = vadd.f32 %v2379_v53, %v2371_v5  ;;  %v2393_v7 = vadd.f32 %v2392_v47, %v2391_v2 }
 0x195   : > { %v4064_v12 = vpop.f32.mrf.mxu0 }
 0x196   : > { %2381 = vst [vmem:[%s5403_s3] sm:$0x1] %v2380_v6  ;;  %v2394_v11 = vadd.f32 %v2393_v7, %v2382_v10 }
 0x197   : > { %v4086_v1 = vpop.f32.mrf.mxu1  ;;  %v4065_v3 = vpop.f32.mrf.mxu0 }
 0x198   : > { %2395 = vst [vmem:[%s5404_s4] sm:$0x1] %v2394_v11  ;;  %v4066_v60 = vadd.f32 %v4065_v3, %v4064_v12 }
 0x199   : > { %v4087_v9 = vpop.f32.mrf.mxu1  ;;  %v4067_v13 = vpop.f32.mrf.mxu0 }
 0x19a   : > { %v4088_v17 = vadd.f32 %v4087_v9, %v4086_v1 }
 0x19b   : > { %v4089_v14 = vpop.f32.mrf.mxu1  ;;  %v4068_v30 = vpop.f32.mrf.mxu0 }
 0x19c   : > { %v4069_v18 = vadd.f32 %v4068_v30, %v4067_v13  ;;  %v3204_v22 = vadd.f32 %v4088_v17, %v4066_v60 }
 0x19d   : > { %v4090_v15 = vpop.f32.mrf.mxu1  ;;  %v3343_v59 = vld [vmem:[%s5403_s3] sm:$0x1] }
 0x19e   : > { %v4091_v20 = vadd.f32 %v4090_v15, %v4089_v14 }
 0x19f   : > { %v3353_v0 = vld [vmem:[%s5404_s4] sm:$0x1] }
 0x1a0   : > { %v3207_v19 = vadd.f32 %v4091_v20, %v4069_v18 }
 0x1b5   : > { %v4108_v37 = vpop.f32.mrf.mxu0 }
 0x1b7   : > { %v4109_v52 = vpop.f32.mrf.mxu0  ;;  %v4130_v63 = vpop.f32.mrf.mxu1 }
 0x1b8   : > { %v4110_v21 = vadd.f32 %v4109_v52, %v4108_v37 }
 0x1b9   : > { %v4111_v16 = vpop.f32.mrf.mxu0  ;;  %v4131_v48 = vpop.f32.mrf.mxu1 }
 0x1ba   : > { %v3245_v25 = vadd.f32 %v4110_v21, %v3204_v22  ;;  %v4132_v26 = vadd.f32 %v4131_v48, %v4130_v63 }
 0x1bb   : > { %v4112_v4 = vpop.f32.mrf.mxu0  ;;  %v4133_v8 = vpop.f32.mrf.mxu1 }
 0x1bc   : > { %v4113_v23 = vadd.f32 %v4112_v4, %v4111_v16  ;;  %v3286_v31 = vadd.f32 %v4132_v26, %v3245_v25 }
 0x1bd   : > { %v4134_v24 = vpop.f32.mrf.mxu1 }
 0x1be   : > { %v3248_v27 = vadd.f32 %v4113_v23, %v3207_v19  ;;  %v4135_v28 = vadd.f32 %v4134_v24, %v4133_v8 }
 0x1c0   : > { %v3289_v34 = vadd.f32 %v4135_v28, %v3248_v27 }
 0x1d5   : > { %v3326_v29 = vpop.f32.mrf.mxu0 }
 0x1d6   : > { %v3327_v33 = vadd.f32 %v3326_v29, %v3286_v31 }
 0x1d7   : > { %v4203_v32 = vpop.f32.mrf.mxu0 }
 0x1d8   : > { %v3354_v39 = vmul.f32 %v3327_v33, %v3327_v33 }
 0x1d9   : > { %v3329_v35 = vpop.f32.mrf.mxu0 }
 0x1da   : > { %v3330_v36 = vadd.f32 %v3329_v35, %v3289_v34 }
 0x1db   : > { %v4204_v38 = vpop.f32.mrf.mxu0 }
 0x1dc   : > { %v3800_v40 = vpack.c.bf16 %v3330_v36, %v3327_v33  ;;  %v3344_v41 = vadd.f32 %v3330_v36, %v3327_v33  ;;  %v3355_v42 = vmul.f32 %v3330_v36, %v3330_v36 }
 0x1de   : > { %3803 = vst [vmem:[%s4510_s22 + $0x18] sm:$0xff] %v3800_v40   ;;  %v3345_v43 = vrot.slane %v3344_v41, 4  ;;  %v3356_v44 = vadd.f32 %v3355_v42, %v3354_v39 }
 0x1e0   : > { %v3346_v45 = vadd.f32 %v3345_v43, %v3344_v41  ;;  %v3357_v46 = vrot.slane %v3356_v44, 4 }
 0x1e2   : > { %v3347_v49 = vrot.slane %v3346_v45, 2  ;;  %v3358_v50 = vadd.f32 %v3357_v46, %v3356_v44 }
 0x1e4   : > { %v3348_v51 = vadd.f32 %v3347_v49, %v3346_v45  ;;  %v3359_v54 = vrot.slane %v3358_v50, 2 }
 0x1e6   : > { %v3349_v55 = vrot.slane %v3348_v51, 1  ;;  %v3360_v56 = vadd.f32 %v3359_v54, %v3358_v50 }
 0x1e8   : > { %v3350_v57 = vadd.f32 %v3349_v55, %v3348_v51  ;;  %v3361_v58 = vrot.slane %v3360_v56, 1 }
 0x1ea   : > { %v3351_v61 = vadd.f32 %v3350_v57, %v3343_v59  ;;  %v3362_v62 = vadd.f32 %v3361_v58, %v3360_v56 }
 0x1ec   : > { %3352 = vst [vmem:[%s5403_s3] sm:$0x1] %v3351_v61  ;;  %v3363_v2 = vadd.f32 %v3362_v62, %v3353_v0 }
 0x1ee   : > { %3364 = vst [vmem:[%s5404_s4] sm:$0x1] %v3363_v2 }
 0x1ef PF: > { %s15_s15 = sadd.s32 1, %s4469_s15  }
 0x1f0   : > { %p12_p5 = scmp.ge.s32.totalorder %s15_s15, 4  }
 0x1f2   :  { %14 = sbr.rel (!%p12_p5) target bundleno = 1 (0x1), region = 95 }

// kernel: bottleneck_block.5
= control target key start
LH: loop header
LB: loop body
LE: loop exit
PB: predicated region body
PF: predicated region fallthrough
CT: control target
= control target key end

     0   :  { %13 = vsyncpa [#allocation5], 0  ;;  %s1803_s0 = inlined_call_operand.vmem [shape: bf16[128,128], index: 0, kind: input, shape index: {}]   ;;  %s1804_s1 = inlined_call_operand.vmem [shape: f32[1,128], index: 1, kind: input, shape index: {}]   ;;  %s1805_s2 = inlined_call_operand.vmem [shape: f32[1,128], index: 2, kind: input, shape index: {}]   ;;  %s1806_s3 = inlined_call_operand.vmem [shape: bf16[128,128], index: 3, kind: input, shape index: {}]   ;;  %s1807_s4 = inlined_call_operand.vmem [shape: f32[1,128], index: 4, kind: input, shape index: {}]   ;;  %s1808_s5 = inlined_call_operand.vmem [shape: f32[1,128], index: 5, kind: input, shape index: {}]   ;;  %s1809_s6 = inlined_call_operand.vmem [shape: bf16[128,128], index: 6, kind: input, shape index: {}]   ;;  %s1810_s7 = inlined_call_operand.vmem [shape: bf16[128,128], index: 7, kind: input, shape index: {}]   ;;  %s1811_s8 = inlined_call_operand.hbm [shape: f32[128,128], index: 8, kind: output, shape index: {}]  }
   0x1   :  { %15 = vsyncpa [#allocation5 + $0x1], 0  ;;  %s1496_s27 = smov 0   ;;  %s1498_s28 = smov 0  }
   0x2   :  { %s1500_s29 = smov 0  }
   0x3 LB: > { %s1124_s30 = sadd.s32 4294967295, %s1445_s29   ;;  %s1125_s9 = sadd.s32 4294967294, %s1445_s29   ;;  %s1445_s29 = sphi %s1500_s29, %s21_s29   ;;  %s1441_s28 = sphi %s1498_s28, %s1814_s28   ;;  %s1437_s27 = sphi %s1496_s27, %s1813_s27  }
   0x4   : > { %s33_s10 = sadd.s32 1, %s1441_s28  ;;  %p1130_p0 = scmp.ge.s32.totalorder %s1445_s29, 1 }
   0x5   : > { %p35_p1 = scmp.ge.s32.totalorder %s33_s10, 2  ;;  %p295_p2 = scmp.lt.s32.totalorder %s1445_s29, 3 }
   0x7   : > { %s1816_s10 = smov (%p35_p1, %s33_s10), 0  ;;  %p296_p3 = pnand %p1130_p0, %p295_p2 }
   0x8   : > { %p1141_p4 = scmp.ne.s32.totalorder (!%p296_p3), %s1437_s27, 0 }
   0x9   : > { %299 = sbr.rel (%p296_p3) target bundleno = 567 (0x237), region = 52 }
   0xe   : > { %v1369_v0 = vld [vmem:[%s1806_s3 + $0x38] sm:$0xff]   ;;  %v1370_v1 = vld [vmem:[%s1806_s3 + $0x30] sm:$0xff]   ;;  %v1371_v2 = vld [vmem:[%s1806_s3 + $0x28] sm:$0xff]  }
   0xf   : > { %1234 = vmatprep.subr.bf16.mxu0 %v1369_v0  ;;  %1298 = vmatprep.subr.bf16.mxu1 %v1369_v0  ;;  %v1372_v3 = vld [vmem:[%s1806_s3 + $0x20] sm:$0xff]   ;;  %v1195_v9 = vld [vmem:[%s1803_s0 + $0x8] sm:$0xff]   ;;  %v1196_v16 = vld [vmem:[%s1803_s0 + $0x10] sm:$0xff]  }
  0x10   : > { %1235 = vmatpush3.bf16.msra.mxu0 %v1369_v0  ;;  %1306 = vmatpush3.bf16.msra.mxu1 %v1369_v0  ;;  %v1164_v4 = vld [vmem:[%s1803_s0] sm:$0xff]   ;;  %v1199_v13 = vld [vmem:[%s1803_s0 + $0x28] sm:$0xff]   ;;  %v1373_v17 = vld [vmem:[%s1806_s3 + $0x18] sm:$0xff]   ;;  %v1169_v20 = vunpack.c.l.bf16 %v1195_v9  ;;  %v1170_v21 = vunpack.c.h.bf16 %v1195_v9  ;;  %v1173_v28 = vunpack.c.l.bf16 %v1196_v16  ;;  %v1174_v40 = vunpack.c.h.bf16 %v1196_v16 }
  0x11   : > { %1236 = vmatprep.subr.bf16.mxu0 %v1370_v1  ;;  %1299 = vmatprep.subr.bf16.mxu1 %v1370_v1  ;;  %v1536_v5 = vld [vmem:[%s1804_s1] ss:$0 sm:$0xff]  ;;  %v1165_v6 = vunpack.c.l.bf16 %v1164_v4  ;;  %v1166_v7 = vunpack.c.h.bf16 %v1164_v4  ;;  %v1185_v24 = vunpack.c.l.bf16 %v1199_v13  ;;  %v1186_v25 = vunpack.c.h.bf16 %v1199_v13  ;;  %v1200_v31 = vld [vmem:[%s1803_s0 + $0x30] sm:$0xff]   ;;  %v1197_v44 = vld [vmem:[%s1803_s0 + $0x18] sm:$0xff]  }
  0x12   : > { %v1198_v8 = vld [vmem:[%s1803_s0 + $0x20] sm:$0xff]   ;;  %v1374_v32 = vld [vmem:[%s1806_s3 + $0x10] sm:$0xff]   ;;  %v393_v35 = vmul.f32 %v1169_v20, %v1536_v5  ;;  %v394_v36 = vmul.f32 %v1170_v21, %v1536_v5  ;;  %v395_v42 = vmul.f32 %v1173_v28, %v1536_v5  ;;  %v1189_v43 = vunpack.c.l.bf16 %v1200_v31  ;;  %v1201_v47 = vld [vmem:[%s1803_s0 + $0x38] sm:$0xff]  }
  0x13   : > { %v1547_v10 = vld [vmem:[%s1805_s2] ss:$0 sm:$0xff]  ;;  %v1181_v11 = vunpack.c.l.bf16 %v1198_v8  ;;  %v1182_v12 = vunpack.c.h.bf16 %v1198_v8  ;;  %v391_v14 = vmul.f32 %v1165_v6, %v1536_v5  ;;  %v392_v15 = vmul.f32 %v1166_v7, %v1536_v5  ;;  %v1375_v48 = vld [vmem:[%s1806_s3 + $0x8] sm:$0xff]  }
  0x14   : > { %1237 = vmatpush3.bf16.msra.mxu0 %v1370_v1  ;;  %1307 = vmatpush3.bf16.msra.mxu1 %v1370_v1  ;;  %v401_v38 = vmul.f32 %v1185_v24, %v1536_v5  ;;  %v402_v39 = vmul.f32 %v1186_v25, %v1536_v5  ;;  %v396_v45 = vmul.f32 %v1174_v40, %v1536_v5  ;;  %v1190_v46 = vunpack.c.h.bf16 %v1200_v31  ;;  %v1376_v63 = vld [vmem:[%s1806_s3] sm:$0xff]  }
  0x15   : > { %1238 = vmatprep.subr.bf16.mxu0 %v1371_v2  ;;  %1300 = vmatprep.subr.bf16.mxu1 %v1371_v2  ;;  %v399_v18 = vmul.f32 %v1181_v11, %v1536_v5  ;;  %v400_v19 = vmul.f32 %v1182_v12, %v1536_v5  ;;  %v414_v22 = vadd.f32 %v1547_v10, %v391_v14  ;;  %v1177_v55 = vunpack.c.l.bf16 %v1197_v44 }
  0x16   : > { %v415_v23 = vadd.f32 %v1547_v10, %v392_v15  ;;  %v416_v49 = vadd.f32 %v1547_v10, %v393_v35  ;;  %v417_v50 = vadd.f32 %v1547_v10, %v394_v36  ;;  %v403_v51 = vmul.f32 %v1189_v43, %v1536_v5 }
  0x17   : > { %v422_v26 = vadd.f32 %v1547_v10, %v399_v18  ;;  %v423_v27 = vadd.f32 %v1547_v10, %v400_v19  ;;  %v430_v29 = vmax.f32 %v414_v22, 0.0  ;;  %v424_v52 = vadd.f32 %v1547_v10, %v401_v38 }
  0x18   : > { %1239 = vmatpush3.bf16.msra.mxu0 %v1371_v2  ;;  %1308 = vmatpush3.bf16.msra.mxu1 %v1371_v2  ;;  %v431_v30 = vmax.f32 %v415_v23, 0.0  ;;  %v425_v53 = vadd.f32 %v1547_v10, %v402_v39  ;;  %v404_v54 = vmul.f32 %v1190_v46, %v1536_v5  ;;  %v418_v56 = vadd.f32 %v1547_v10, %v395_v42 }
  0x19   : > { %1240 = vmatprep.subr.bf16.mxu0 %v1372_v3  ;;  %1301 = vmatprep.subr.bf16.mxu1 %v1372_v3  ;;  %v438_v33 = vmax.f32 %v422_v26, 0.0  ;;  %v439_v34 = vmax.f32 %v423_v27, 0.0  ;;  %v1178_v57 = vunpack.c.h.bf16 %v1197_v44  ;;  %v1193_v58 = vunpack.c.l.bf16 %v1201_v47 }
  0x1a   : > { %v446_v37 = vpack.c.bf16 %v431_v30, %v430_v29  ;;  %v1194_v59 = vunpack.c.h.bf16 %v1201_v47  ;;  %v419_v60 = vadd.f32 %v1547_v10, %v396_v45  ;;  %v426_v61 = vadd.f32 %v1547_v10, %v403_v51 }
  0x1b   : > { %v450_v41 = vpack.c.bf16 %v439_v34, %v438_v33  ;;  %v427_v62 = vadd.f32 %v1547_v10, %v404_v54  ;;  %v432_v0 = vmax.f32 %v416_v49, 0.0  ;;  %v433_v1 = vmax.f32 %v417_v50, 0.0 }
  0x1c   : > { %1241 = vmatpush3.bf16.msra.mxu0 %v1372_v3  ;;  %1309 = vmatpush3.bf16.msra.mxu1 %v1372_v3  ;;  %v440_v2 = vmax.f32 %v424_v52, 0.0  ;;  %v441_v3 = vmax.f32 %v425_v53, 0.0  ;;  %v397_v4 = vmul.f32 %v1177_v55, %v1536_v5  ;;  %v398_v6 = vmul.f32 %v1178_v57, %v1536_v5 }
  0x1d   : > { %1242 = vmatprep.subr.bf16.mxu0 %v1373_v17  ;;  %1302 = vmatprep.subr.bf16.mxu1 %v1373_v17  ;;  %v405_v7 = vmul.f32 %v1193_v58, %v1536_v5  ;;  %v406_v8 = vmul.f32 %v1194_v59, %v1536_v5  ;;  %v434_v9 = vmax.f32 %v418_v56, 0.0  ;;  %v435_v11 = vmax.f32 %v419_v60, 0.0 }
  0x1e   : > { %1250 = vmatprep.mubr.bf16.mxu0 %v446_v37  ;;  %1258 = vmatprep.mubr.bf16.mxu1 %v450_v41  ;;  %v442_v12 = vmax.f32 %v426_v61, 0.0  ;;  %v443_v13 = vmax.f32 %v427_v62, 0.0  ;;  %v447_v14 = vpack.c.bf16 %v433_v1, %v432_v0  ;;  %v451_v15 = vpack.c.bf16 %v441_v3, %v440_v2 }
  0x1f   : > { %v420_v16 = vadd.f32 %v1547_v10, %v397_v4  ;;  %v428_v18 = vadd.f32 %v1547_v10, %v405_v7  ;;  %v429_v19 = vadd.f32 %v1547_v10, %v406_v8  ;;  %v448_v5 = vpack.c.bf16 %v435_v11, %v434_v9 }
  0x20   : > { %1243 = vmatpush3.bf16.msra.mxu0 %v1373_v17  ;;  %1310 = vmatpush3.bf16.msra.mxu1 %v1373_v17  ;;  %v421_v17 = vadd.f32 %v1547_v10, %v398_v6  ;;  %v452_v20 = vpack.c.bf16 %v443_v13, %v442_v12 }
  0x21   : > { %1244 = vmatprep.subr.bf16.mxu0 %v1374_v32  ;;  %1303 = vmatprep.subr.bf16.mxu1 %v1374_v32  ;;  %v436_v21 = vmax.f32 %v420_v16, 0.0  ;;  %v444_v23 = vmax.f32 %v428_v18, 0.0  ;;  %v445_v24 = vmax.f32 %v429_v19, 0.0 }
  0x22   : > { %v437_v22 = vmax.f32 %v421_v17, 0.0 }
  0x23   : > { %v453_v26 = vpack.c.bf16 %v445_v24, %v444_v23 }
  0x24   : > { %1245 = vmatpush3.bf16.msra.mxu0 %v1374_v32  ;;  %1311 = vmatpush3.bf16.msra.mxu1 %v1374_v32  ;;  %v449_v25 = vpack.c.bf16 %v437_v22, %v436_v21 }
  0x25   : > { %1246 = vmatprep.subr.bf16.mxu0 %v1375_v48  ;;  %1304 = vmatprep.subr.bf16.mxu1 %v1375_v48 }
  0x28   : > { %1247 = vmatpush3.bf16.msra.mxu0 %v1375_v48  ;;  %1312 = vmatpush3.bf16.msra.mxu1 %v1375_v48 }
  0x29   : > { %1248 = vmatprep.subr.bf16.mxu0 %v1376_v63  ;;  %1305 = vmatprep.subr.bf16.mxu1 %v1376_v63 }
  0x2c   : > { %1249 = vmatpush3.bf16.msra.mxu0 %v1376_v63  ;;  %1313 = vmatpush3.bf16.msra.mxu1 %v1376_v63 }
  0x2f   : > { %1251 = vmatmul.mubr.bf16.vlgmr.msra.gmra.mxu0 %v447_v14  ;;  %1259 = vmatmul.mubr.bf16.vlgmr.msra.gmra.mxu1 %v451_v15 }
  0x30   : > { %1254 = vmatprep.mubr.bf16.mxu0 %v448_v5  ;;  %1262 = vmatprep.mubr.bf16.mxu1 %v452_v20 }
  0x37   : > { %1255 = vmatmul.mubr.bf16.gmra.mxu0 %v449_v25  ;;  %1263 = vmatmul.mubr.bf16.gmra.mxu1 %v453_v26 }
  0xef   : > { %v1608_v27 = vpop.f32.mrf.mxu0  ;;  %v1610_v28 = vpop.f32.mrf.mxu1 }
  0xf1   : > { %v1612_v10 = vpop.f32.mrf.mxu0  ;;  %v1614_v29 = vpop.f32.mrf.mxu1 }
  0xf3   : > { %v1616_v30 = vpop.f32.mrf.mxu0  ;;  %v1618_v31 = vpop.f32.mrf.mxu1 }
  0xf5   : > { %v1620_v32 = vpop.f32.mrf.mxu0  ;;  %v1622_v33 = vpop.f32.mrf.mxu1 }
  0xf7   : > { %v1624_v34 = vpop.f32.mrf.mxu0  ;;  %v1626_v35 = vpop.f32.mrf.mxu1 }
  0xf9   : > { %v1628_v36 = vpop.f32.mrf.mxu0  ;;  %v1630_v37 = vpop.f32.mrf.mxu1  ;;  %618 = sbr.rel (%p1141_p4) target bundleno = 301 (0x12d), region = 56 }
  0xfb   : > { %v1632_v38 = vpop.f32.mrf.mxu0  ;;  %v1634_v39 = vpop.f32.mrf.mxu1 }
  0xfd   : > { %v1636_v40 = vpop.f32.mrf.mxu0  ;;  %v1638_v41 = vpop.f32.mrf.mxu1 }
  0xfe   : > { %v626_v42 = vadd.f32 %v1620_v32, %v1612_v10  ;;  %v1447_v43 = vmov 0.0   ;;  %v650_v44 = vmul.f32 %v1612_v10, %v1612_v10  ;;  %v651_v45 = vmul.f32 %v1620_v32, %v1620_v32 }
  0xff   : > { %623 = vst [vmem:[#allocation2] sm:$0x1] %v1447_v43  ;;  %624 = vst [vmem:[#allocation3] sm:$0x1] %v1447_v43  ;;  %v652_v47 = vmul.f32 %v1608_v27, %v1608_v27  ;;  %v653_v49 = vmul.f32 %v1616_v30, %v1616_v30  ;;  %v654_v52 = vmul.f32 %v1628_v36, %v1628_v36 }
 0x100   : > { %v627_v46 = vadd.f32 %v1608_v27, %v626_v42  ;;  %v666_v50 = vadd.f32 %v651_v45, %v650_v44  ;;  %v655_v55 = vmul.f32 %v1636_v40, %v1636_v40  ;;  %v656_v58 = vmul.f32 %v1624_v34, %v1624_v34 }
 0x101   : > { %v657_v61 = vmul.f32 %v1632_v38, %v1632_v38  ;;  %v658_v0 = vmul.f32 %v1614_v29, %v1614_v29  ;;  %v659_v3 = vmul.f32 %v1622_v33, %v1622_v33  ;;  %v660_v7 = vmul.f32 %v1610_v28, %v1610_v28 }
 0x102   : > { %v628_v48 = vadd.f32 %v1616_v30, %v627_v46  ;;  %v667_v53 = vadd.f32 %v666_v50, %v652_v47  ;;  %v661_v11 = vmul.f32 %v1618_v31, %v1618_v31  ;;  %v662_v14 = vmul.f32 %v1630_v37, %v1630_v37 }
 0x103   : > { %v663_v17 = vmul.f32 %v1638_v41, %v1638_v41  ;;  %v664_v5 = vmul.f32 %v1626_v35, %v1626_v35  ;;  %v665_v22 = vmul.f32 %v1634_v39, %v1634_v39 }
 0x104   : > { %v629_v51 = vadd.f32 %v628_v48, %v1628_v36  ;;  %v668_v56 = vadd.f32 %v667_v53, %v653_v49 }
 0x106   : > { %v630_v54 = vadd.f32 %v629_v51, %v1636_v40  ;;  %v669_v59 = vadd.f32 %v668_v56, %v654_v52  ;;  %v625_v48 = vld [vmem:[#allocation2] sm:$0x1] }
 0x108   : > { %v631_v57 = vadd.f32 %v1624_v34, %v630_v54  ;;  %v670_v62 = vadd.f32 %v669_v59, %v655_v55  ;;  %v649_v54 = vld [vmem:[#allocation3] sm:$0x1] }
 0x10a   : > { %v632_v60 = vadd.f32 %v1632_v38, %v631_v57  ;;  %v671_v1 = vadd.f32 %v670_v62, %v656_v58 }
 0x10c   : > { %v633_v63 = vadd.f32 %v632_v60, %v1614_v29  ;;  %v672_v4 = vadd.f32 %v671_v1, %v657_v61 }
 0x10e   : > { %v634_v2 = vadd.f32 %v633_v63, %v1622_v33  ;;  %v673_v8 = vadd.f32 %v672_v4, %v658_v0 }
 0x110   : > { %v635_v6 = vadd.f32 %v1610_v28, %v634_v2  ;;  %v674_v12 = vadd.f32 %v673_v8, %v659_v3 }
 0x112   : > { %v636_v9 = vadd.f32 %v1618_v31, %v635_v6  ;;  %v675_v15 = vadd.f32 %v674_v12, %v660_v7 }
 0x114   : > { %v637_v13 = vadd.f32 %v636_v9, %v1630_v37  ;;  %v676_v18 = vadd.f32 %v675_v15, %v661_v11 }
 0x116   : > { %v638_v16 = vadd.f32 %v637_v13, %v1638_v41  ;;  %v677_v20 = vadd.f32 %v676_v18, %v662_v14 }
 0x118   : > { %v639_v19 = vadd.f32 %v1626_v35, %v638_v16  ;;  %v678_v23 = vadd.f32 %v677_v20, %v663_v17 }
 0x11a   : > { %v640_v21 = vadd.f32 %v1634_v39, %v639_v19  ;;  %v679_v25 = vadd.f32 %v678_v23, %v664_v5 }
 0x11c   : > { %v641_v24 = vrot.slane %v640_v21, 4  ;;  %v680_v42 = vadd.f32 %v679_v25, %v665_v22 }
 0x11e   : > { %v642_v26 = vadd.f32 %v641_v24, %v640_v21  ;;  %v681_v44 = vrot.slane %v680_v42, 4 }
 0x120   : > { %v643_v43 = vrot.slane %v642_v26, 2  ;;  %v682_v46 = vadd.f32 %v681_v44, %v680_v42 }
 0x122   : > { %v644_v45 = vadd.f32 %v643_v43, %v642_v26  ;;  %v683_v49 = vrot.slane %v682_v46, 2 }
 0x124   : > { %v645_v47 = vrot.slane %v644_v45, 1  ;;  %v684_v51 = vadd.f32 %v683_v49, %v682_v46 }
 0x126   : > { %v646_v50 = vadd.f32 %v645_v47, %v644_v45  ;;  %v685_v53 = vrot.slane %v684_v51, 1 }
 0x128   : > { %v647_v52 = vadd.f32 %v646_v50, %v625_v48  ;;  %v686_v55 = vadd.f32 %v685_v53, %v684_v51 }
 0x12a   : > { %648 = vst [vmem:[#allocation2] sm:$0x1] %v647_v52  ;;  %v687_v56 = vadd.f32 %v686_v55, %v649_v54 }
 0x12c   : > { %688 = vst [vmem:[#allocation3] sm:$0x1] %v687_v56 }
 0x12d PF: > { %p1142_p5 = scmp.ne.s32.totalorder %s1437_s27, 1 }
 0x12f   : > { %692 = sbr.rel (%p1142_p5) target bundleno = 553 (0x229), region = 64 }
 0x134   : > { %v1377_v57 = vld [vmem:[%s1810_s7 + $0x38] sm:$0xff]   ;;  %v1378_v58 = vld [vmem:[%s1810_s7 + $0x30] sm:$0xff]   ;;  %v1379_v59 = vld [vmem:[%s1810_s7 + $0x28] sm:$0xff]   ;;  %v933_v19 = vlaneseq }
 0x135   : > { %1266 = vmatprep.subr.bf16.mxu0 %v1377_v57  ;;  %1314 = vmatprep.subr.bf16.mxu1 %v1377_v57  ;;  %v1380_v60 = vld [vmem:[%s1810_s7 + $0x20] sm:$0xff]   ;;  %v1381_v63 = vld [vmem:[%s1810_s7 + $0x18] sm:$0xff]   ;;  %v1382_v0 = vld [vmem:[%s1810_s7 + $0x10] sm:$0xff]  }
 0x136   : > { %1267 = vmatpush3.bf16.msra.mxu0 %v1377_v57  ;;  %1322 = vmatpush3.bf16.msra.mxu1 %v1377_v57  ;;  %v1385_v61 = vld [vmem:[%s1809_s6] sm:$0xff]   ;;  %v1383_v1 = vld [vmem:[%s1810_s7 + $0x8] sm:$0xff]   ;;  %v1389_v6 = vld [vmem:[%s1809_s6 + $0x10] sm:$0xff]   ;;  %v934_v22 = vshrl.u32 %v933_v19, 7 }
 0x137   : > { %1268 = vmatprep.subr.bf16.mxu0 %v1378_v58  ;;  %1315 = vmatprep.subr.bf16.mxu1 %v1378_v58  ;;  %v1386_v62 = vld [vmem:[%s1809_s6 + $0x20] sm:$0xff]   ;;  %v1387_v3 = vld [vmem:[%s1809_s6 + $0x8] sm:$0xff]   ;;  %v1390_v7 = vld [vmem:[%s1809_s6 + $0x30] sm:$0xff]  }
 0x138   : > { %1282 = vmatprep.mubr.bf16.mxu0 %v1385_v61  ;;  %1290 = vmatprep.mubr.bf16.mxu1 %v1386_v62  ;;  %v1384_v2 = vld [vmem:[%s1810_s7] sm:$0xff]   ;;  %v1388_v4 = vld [vmem:[%s1809_s6 + $0x28] sm:$0xff]   ;;  %v1391_v8 = vld [vmem:[%s1809_s6 + $0x18] sm:$0xff]   ;;  %v935_v24 = vsub.s32 0, %v934_v22 }
 0x139   : > { %v1392_v9 = vld [vmem:[%s1809_s6 + $0x38] sm:$0xff]   ;;  %v693_v11 = vld [vmem:[#allocation2] sm:$0x1]  ;;  %v694_v13 = vld [vmem:[#allocation3] sm:$0x1] }
 0x13a   : > { %1269 = vmatpush3.bf16.msra.mxu0 %v1378_v58  ;;  %1323 = vmatpush3.bf16.msra.mxu1 %v1378_v58  ;;  %v697_v12 = vmul.f32 0.0078125, %v693_v11  ;;  %v698_v14 = vmul.f32 0.0078125, %v694_v13  ;;  %v695_v20 = vld [vmem:[%s1807_s4] sm:$0x1] }
 0x13b   : > { %1270 = vmatprep.subr.bf16.mxu0 %v1379_v59  ;;  %1316 = vmatprep.subr.bf16.mxu1 %v1379_v59  ;;  %v696_v25 = vld [vmem:[%s1808_s5] sm:$0x1] }
 0x13c   : > { %v699_v15 = vmul.f32 %v697_v12, %v697_v12 }
 0x13e   : > { %1271 = vmatpush3.bf16.msra.mxu0 %v1379_v59  ;;  %1324 = vmatpush3.bf16.msra.mxu1 %v1379_v59  ;;  %v700_v16 = vsub.f32 %v698_v14, %v699_v15 }
 0x13f   : > { %1272 = vmatprep.subr.bf16.mxu0 %v1380_v60  ;;  %1317 = vmatprep.subr.bf16.mxu1 %v1380_v60 }
 0x140   : > { %v701_v17 = vmax.f32 %v700_v16, 0.0 }
 0x142   : > { %1273 = vmatpush3.bf16.msra.mxu0 %v1380_v60  ;;  %1325 = vmatpush3.bf16.msra.mxu1 %v1380_v60  ;;  %v702_v18 = vadd.f32 1e-05, %v701_v17 }
 0x143   : > { %1274 = vmatprep.subr.bf16.mxu0 %v1381_v63  ;;  %1318 = vmatprep.subr.bf16.mxu1 %v1381_v63 }
 0x144   : > { %1393 = vrsqrt.f32 %v702_v18 }
 0x146   : > { %1275 = vmatpush3.bf16.msra.mxu0 %v1381_v63  ;;  %1326 = vmatpush3.bf16.msra.mxu1 %v1381_v63 }
 0x147   : > { %1276 = vmatprep.subr.bf16.mxu0 %v1382_v0  ;;  %1319 = vmatprep.subr.bf16.mxu1 %v1382_v0 }
 0x14a   : > { %1277 = vmatpush3.bf16.msra.mxu0 %v1382_v0  ;;  %1327 = vmatpush3.bf16.msra.mxu1 %v1382_v0 }
 0x14b   : > { %1278 = vmatprep.subr.bf16.mxu0 %v1383_v1  ;;  %1320 = vmatprep.subr.bf16.mxu1 %v1383_v1 }
 0x14e   : > { %1279 = vmatpush3.bf16.msra.mxu0 %v1383_v1  ;;  %1328 = vmatpush3.bf16.msra.mxu1 %v1383_v1 }
 0x14f   : > { %1280 = vmatprep.subr.bf16.mxu0 %v1384_v2  ;;  %1321 = vmatprep.subr.bf16.mxu1 %v1384_v2 }
 0x151   : > { %v1394_v5 = vpop.eup %1393 }
 0x152   : > { %1281 = vmatpush3.bf16.msra.mxu0 %v1384_v2  ;;  %1329 = vmatpush3.bf16.msra.mxu1 %v1384_v2  ;;  %v704_v21 = vmul.f32 %v1394_v5, %v695_v20 }
 0x154   : > { %v705_v23 = vmul.f32 %v704_v21, %v697_v12  ;;  %v936_v42 = vrot.slane %v704_v21, %v935_v24 }
 0x155   : > { %1283 = vmatmul.mubr.bf16.vlgmr.msra.gmra.mxu0 %v1387_v3  ;;  %1291 = vmatmul.mubr.bf16.vlgmr.msra.gmra.mxu1 %v1388_v4 }
 0x156   : > { %1286 = vmatprep.mubr.bf16.mxu0 %v1389_v6  ;;  %1294 = vmatprep.mubr.bf16.mxu1 %v1390_v7  ;;  %v706_v26 = vsub.f32 %v696_v25, %v705_v23  ;;  %v940_v43 = vmul.f32 %v1608_v27, %v936_v42  ;;  %v948_v45 = vmul.f32 %v1610_v28, %v936_v42 }
 0x157   : > { %v938_v46 = vmul.f32 %v936_v42, %v1612_v10  ;;  %v946_v47 = vmul.f32 %v936_v42, %v1614_v29  ;;  %v941_v50 = vmul.f32 %v1616_v30, %v936_v42  ;;  %v949_v51 = vmul.f32 %v1618_v31, %v936_v42 }
 0x158   : > { %v1745_v44 = vrot.slane %v706_v26, %v935_v24  ;;  %v939_v52 = vmul.f32 %v936_v42, %v1620_v32  ;;  %v947_v27 = vmul.f32 %v936_v42, %v1622_v33  ;;  %v944_v29 = vmul.f32 %v1624_v34, %v936_v42 }
 0x159   : > { %v952_v55 = vmul.f32 %v1626_v35, %v936_v42  ;;  %v942_v60 = vmul.f32 %v936_v42, %v1628_v36  ;;  %v950_v61 = vmul.f32 %v936_v42, %v1630_v37  ;;  %v945_v4 = vmul.f32 %v1632_v38, %v936_v42 }
 0x15a   : > { %v962_v48 = vadd.f32 %v1745_v44, %v940_v43  ;;  %v970_v49 = vadd.f32 %v1745_v44, %v948_v45  ;;  %v960_v53 = vadd.f32 %v1745_v44, %v938_v46  ;;  %v968_v28 = vadd.f32 %v1745_v44, %v946_v47 }
 0x15b   : > { %v963_v30 = vadd.f32 %v1745_v44, %v941_v50  ;;  %v971_v31 = vadd.f32 %v1745_v44, %v949_v51  ;;  %v961_v33 = vadd.f32 %v1745_v44, %v939_v52  ;;  %v969_v59 = vadd.f32 %v1745_v44, %v947_v27 }
 0x15c   : > { %v966_v2 = vadd.f32 %v1745_v44, %v944_v29  ;;  %v974_v3 = vadd.f32 %v1745_v44, %v952_v55  ;;  %v953_v6 = vmul.f32 %v1634_v39, %v936_v42  ;;  %v964_v12 = vadd.f32 %v1745_v44, %v942_v60 }
 0x15d   : > { %1287 = vmatmul.mubr.bf16.gmra.mxu0 %v1391_v8  ;;  %1295 = vmatmul.mubr.bf16.gmra.mxu1 %v1392_v9  ;;  %v972_v13 = vadd.f32 %v1745_v44, %v950_v61  ;;  %v943_v14 = vmul.f32 %v936_v42, %v1636_v40  ;;  %v951_v15 = vmul.f32 %v936_v42, %v1638_v41 }
 0x15e   : > { %v967_v5 = vadd.f32 %v1745_v44, %v945_v4  ;;  %v975_v20 = vadd.f32 %v1745_v44, %v953_v6 }
 0x15f   : > { %v965_v25 = vadd.f32 %v1745_v44, %v943_v14  ;;  %v973_v26 = vadd.f32 %v1745_v44, %v951_v15 }
 0x215   : > { %v1284_v54 = vpop.f32.mrf.mxu0  ;;  %v1292_v10 = vpop.f32.mrf.mxu1 }
 0x216   : > { %v978_v56 = vadd.f32 %v1284_v54, %v962_v48  ;;  %v986_v57 = vadd.f32 %v1292_v10, %v970_v49 }
 0x217   : > { %v869_v58 = vpop.f32.mrf.mxu0  ;;  %v901_v32 = vpop.f32.mrf.mxu1 }
 0x218   : > { %v994_v62 = vmax.f32 %v978_v56, 0.0  ;;  %v1002_v34 = vmax.f32 %v986_v57, 0.0  ;;  %v976_v63 = vadd.f32 %v960_v53, %v869_v58  ;;  %v984_v35 = vadd.f32 %v968_v28, %v901_v32 }
 0x219   : > { %v1285_v0 = vpop.f32.mrf.mxu0  ;;  %v1293_v1 = vpop.f32.mrf.mxu1 }
 0x21a   : > { %1010 = vst [vmem:[#allocation4 + $0x10] sm:$0xff] %v994_v62  ;;  %1018 = vst [vmem:[#allocation4 + $0x50] sm:$0xff] %v1002_v34  ;;  %v992_v7 = vmax.f32 %v976_v63, 0.0  ;;  %v1000_v36 = vmax.f32 %v984_v35, 0.0  ;;  %v979_v8 = vadd.f32 %v1285_v0, %v963_v30  ;;  %v987_v37 = vadd.f32 %v1293_v1, %v971_v31 }
 0x21b   : > { %v872_v9 = vpop.f32.mrf.mxu0  ;;  %v904_v11 = vpop.f32.mrf.mxu1 }
 0x21c   : > { %1008 = vst [vmem:[#allocation4] sm:$0xff] %v992_v7  ;;  %1016 = vst [vmem:[#allocation4 + $0x40] sm:$0xff] %v1000_v36  ;;  %v995_v38 = vmax.f32 %v979_v8, 0.0  ;;  %v1003_v39 = vmax.f32 %v987_v37, 0.0  ;;  %v977_v16 = vadd.f32 %v961_v33, %v872_v9  ;;  %v985_v17 = vadd.f32 %v969_v59, %v904_v11 }
 0x21d   : > { %v1288_v18 = vpop.f32.mrf.mxu0  ;;  %v1296_v19 = vpop.f32.mrf.mxu1 }
 0x21e   : > { %1011 = vst [vmem:[#allocation4 + $0x18] sm:$0xff] %v995_v38  ;;  %1019 = vst [vmem:[#allocation4 + $0x58] sm:$0xff] %v1003_v39  ;;  %v993_v21 = vmax.f32 %v977_v16, 0.0  ;;  %v1001_v22 = vmax.f32 %v985_v17, 0.0  ;;  %v982_v23 = vadd.f32 %v1288_v18, %v966_v2  ;;  %v990_v40 = vadd.f32 %v1296_v19, %v974_v3 }
 0x21f   : > { %v885_v24 = vpop.f32.mrf.mxu0  ;;  %v917_v41 = vpop.f32.mrf.mxu1 }
 0x220   : > { %1009 = vst [vmem:[#allocation4 + $0x8] sm:$0xff] %v993_v21  ;;  %1017 = vst [vmem:[#allocation4 + $0x48] sm:$0xff] %v1001_v22  ;;  %v998_v42 = vmax.f32 %v982_v23, 0.0  ;;  %v1006_v43 = vmax.f32 %v990_v40, 0.0  ;;  %v980_v45 = vadd.f32 %v964_v12, %v885_v24  ;;  %v988_v46 = vadd.f32 %v972_v13, %v917_v41 }
 0x221   : > { %v1289_v47 = vpop.f32.mrf.mxu0  ;;  %v1297_v48 = vpop.f32.mrf.mxu1 }
 0x222   : > { %1014 = vst [vmem:[#allocation4 + $0x30] sm:$0xff] %v998_v42  ;;  %1022 = vst [vmem:[#allocation4 + $0x70] sm:$0xff] %v1006_v43  ;;  %v996_v49 = vmax.f32 %v980_v45, 0.0  ;;  %v1004_v50 = vmax.f32 %v988_v46, 0.0  ;;  %v983_v51 = vadd.f32 %v1289_v47, %v967_v5  ;;  %v991_v52 = vadd.f32 %v1297_v48, %v975_v20 }
 0x223   : > { %v888_v27 = vpop.f32.mrf.mxu0  ;;  %v920_v53 = vpop.f32.mrf.mxu1 }
 0x224   : > { %1012 = vst [vmem:[#allocation4 + $0x20] sm:$0xff] %v996_v49  ;;  %1020 = vst [vmem:[#allocation4 + $0x60] sm:$0xff] %v1004_v50  ;;  %v999_v28 = vmax.f32 %v983_v51, 0.0  ;;  %v1007_v44 = vmax.f32 %v991_v52, 0.0  ;;  %v981_v54 = vadd.f32 %v965_v25, %v888_v27  ;;  %v989_v10 = vadd.f32 %v973_v26, %v920_v53 }
 0x226   : > { %1015 = vst [vmem:[#allocation4 + $0x38] sm:$0xff] %v999_v28  ;;  %1023 = vst [vmem:[#allocation4 + $0x78] sm:$0xff] %v1007_v44  ;;  %v997_v29 = vmax.f32 %v981_v54, 0.0  ;;  %v1005_v55 = vmax.f32 %v989_v10, 0.0 }
 0x228   : > { %1013 = vst [vmem:[#allocation4 + $0x28] sm:$0xff] %v997_v29  ;;  %1021 = vst [vmem:[#allocation4 + $0x68] sm:$0xff] %v1005_v55 }
 0x229 PF: > { %p1780_p6 = scmp.eq.s32.totalorder %s1124_s30, 1  ;;  %s1448_s18 = smov [#allocation4]  }
 0x22a   : > { %s1039_s19 = sshll.u32 %s1448_s18, 4  ;;  %s1040_s19 = int_to_ptr.vmem [resolvable:$true] %s1039_s19 }
 0x22b   : > { %s1395_s20 = scalar_lea.vmem %s1040_s19, 2048  ;;  %s1401_s27 = scalar_lea.vmem %s1040_s19, 4096 }
 0x22c   : > { %p1396_p7 = scmp.ne.s32.totalorder %s1040_s19, %s1395_s20  ;;  %p1402_p10 = scmp.lt.s32.totalorder %s1040_s19, %s1040_s19 }
 0x22d   : > { %p1403_p11 = scmp.lt.s32.totalorder %s1401_s27, %s1395_s20 }
 0x22e   : > { %p1397_p8 = pnand %p1396_p7, %p1780_p6 }
 0x22f   : > { %p1404_p12 = por %p1403_p11, %p1402_p10 }
 0x230   : > { %p1398_p9 = pneg %p1397_p8 }
 0x232   : > { %p1405_p13 = pnand %p1404_p12, %p1398_p9 }
 0x234   : > { %1408 = shalt.err (!%p1405_p13)
}
 0x235   : > { %s1449_s21 = smov 128   ;;  %s1450_s30 = smov 8  }
 0x236   : > { %1331 = dma.vmem_to_hbm [thread:$0]  (%p1780_p6), %s1040_s19, 2048, %s1811_s8, [#allocation5], %s1449_s21, %s1449_s21, %s1450_s30  }
 0x237 PF: > { %p1339_p0 = scmp.ge.s32.totalorder %s1445_s29, 2  ;;  %p1340_p1 = scmp.eq.s32.totalorder %s1125_s9, 1 }
 0x239   : > { %p1335_p2 = pnand %p1340_p1, %p1339_p0 }
 0x23b   : > { %p1336_p3 = pneg %p1335_p2 }
 0x23d   : > { %1432 = dma.done.wait (%p1336_p3), [#allocation5], 2048  }
 0x23e   : > { %1434 = vsyncadd (%p1336_p3), [#allocation5], 4294965248  ;;  %s21_s29 = sadd.s32 1, %s1445_s29   ;;  %s1813_s27 = smov %s1441_s28 }
 0x23f   : > { %p18_p4 = scmp.ge.s32.totalorder %s21_s29, 4   ;;  %s1814_s28 = smov %s1816_s10 }
 0x241   :  { %20 = sbr.rel (!%p18_p4) target bundleno = 3 (0x3), region = 102 }
 0x246   :  { %1060 = vsyncpa [#allocation5], 1 }
 0x247   :  { %1062 = vsyncpa [#allocation5 + $0x1], 1 }

</bundles_post_ra>
